<compile_context>
chip_gen: v7x
topology: tpu7x:2x2x1
jax: 0.10.0
libtpu: 0.0.40
codegen_flags: <defaults>
</compile_context>

<pallas_src>
import functools

import jax
import jax.numpy as jnp
import numpy as np
from jax.experimental import pallas as pl
from jax.experimental.pallas import tpu as pltpu

NUM_GC_LAYERS = 3
BN_EPS = 1e-5          # torch.nn.BatchNorm1d default
GIN_EPS = 0.0          # GINConv default eps (train_eps=False)


def _round_up(v, m):
    return (v + m - 1) // m * m


def _pad2d(a, rows, cols, dtype, fill=0.0):
    a = jnp.pad(a, ((0, rows - a.shape[0]), (0, cols - a.shape[1])),
                constant_values=fill)
    return a.astype(dtype)


def _simclr_kernel(num_layers, x_ref, a_ref, p_ref, m_ref, *refs):
    """refs = ([W1,b1,W2,b2,gamma,beta] * L, [Wp1_block] * L, bp1, Wp2, bp2, y_out).

    x/A_hat/P and all weight matrices arrive as bf16 (MXU operands); biases,
    gamma, beta, the BN statistics and all element-wise math are f32 (VPU/XLU).
    The grid axis iterates over the augmented views.
    """
    layer_refs = refs[:6 * num_layers]
    wp1_refs = refs[6 * num_layers: 7 * num_layers]
    bp1_ref, wp2_ref, bp2_ref = refs[7 * num_layers: 7 * num_layers + 3]
    y_ref = refs[7 * num_layers + 3]

    a = a_ref[...]            # (N_pad, N_pad) bf16
    p = p_ref[...]            # (G_pad, N_pad) bf16
    w_mask = m_ref[...]       # (N_pad, 1)     f32, 1/n_real on real node rows

    h = x_ref[...]            # (N_pad, F_pad) bf16
    pooled = []
    for i in range(num_layers):
        w1_ref, b1_ref, w2_ref, b2_ref, g_ref, bt_ref = layer_refs[6 * i: 6 * i + 6]

        # GIN aggregation: (1 + eps) * x_i + sum_j x_j  ==  A_hat @ h   (MXU)
        agg = jnp.dot(a, h, preferred_element_type=jnp.float32)

        # GIN MLP: Linear -> ReLU -> Linear, then the outer F.relu.
        z = jnp.dot(agg.astype(jnp.bfloat16), w1_ref[...],
                    preferred_element_type=jnp.float32) + b1_ref[...]
        z = jnp.maximum(z, 0.0)
        z = jnp.dot(z.astype(jnp.bfloat16), w2_ref[...],
                    preferred_element_type=jnp.float32) + b2_ref[...]
        z = jnp.maximum(z, 0.0)

        # BatchNorm1d (training-mode, biased variance).  Stats in f32 on the
        # VPU/XLU: the weighted mask column both excludes padded node rows and
        # carries the 1/n scale (no MXU weight pushes, no bf16 quantization).
        mean = jnp.sum(z * w_mask, axis=0, keepdims=True)
        zc = z - mean
        var = jnp.sum(zc * zc * w_mask, axis=0, keepdims=True)
        zbn = zc * jax.lax.rsqrt(var + BN_EPS) * g_ref[...] + bt_ref[...]

        # single f32->bf16 cast reused for pooling operand and next-layer h
        zbn_bf = zbn.astype(jnp.bfloat16)
        # global add pool for this layer:  P @ z_bn  -> (G_pad, D_pad)   (MXU)
        pooled.append(jnp.dot(p, zbn_bf, preferred_element_type=jnp.float32))
        h = zbn_bf

    # cat(xpool, dim=1) @ Wp1 as a sum of per-layer block matmuls (Wp1 arrives
    # pre-split per layer; no lane concat, no value slicing).
    s = bp1_ref[...]                                  # (1, E_pad) broadcasts
    for i in range(num_layers):
        s = s + jnp.dot(pooled[i].astype(jnp.bfloat16), wp1_refs[i][...],
                        preferred_element_type=jnp.float32)
    y = jnp.maximum(s, 0.0)
    y = jnp.dot(y.astype(jnp.bfloat16), wp2_ref[...],
                preferred_element_type=jnp.float32) + bp2_ref[...]
    y_ref[...] = y                                     # lane-dense, unmasked vst


def simclr_forward_views(views, layer_params, proj_params):
    """Run the simclr forward for a list of augmented views in one pallas_call.

    views: list of (x [N,F], a_hat [N,N], pool [G,N]) per view.
    layer_params: list of (W1, b1, W2, b2, gamma, beta); proj_params: (Wp1, bp1, Wp2, bp2).
    Returns (num_views, G, EMB).
    """
    bf16, f32 = jnp.bfloat16, jnp.float32
    num_views = len(views)
    num_layers = len(layer_params)
    f = views[0][0].shape[1]
    g = views[0][2].shape[0]
    dim = layer_params[0][0].shape[1]
    emb = dim * num_layers

    # (sublane, lane) alignment: lane dims -> multiples of 128; sublane dims ->
    # the dtype-native tile (16 for bf16, 8 for f32).
    n_max = max(x.shape[0] for (x, _, _) in views)
    n_pad = _round_up(n_max, 128)        # node axis is a lane dim of A_hat / P
    f_pad = _round_up(f, 128)
    d_pad = _round_up(dim, 128)
    e_pad = _round_up(emb, 128)
    g_pad = _round_up(g, 16)             # bf16 P: native (16,128) tile

    # --- stacked per-view operands (leading grid axis = view) ---
    xs, a_s, ps, ms = [], [], [], []
    for (x, a_hat, pool) in views:
        n_v = x.shape[0]
        xs.append(_pad2d(x, n_pad, f_pad, bf16))
        a_s.append(_pad2d(a_hat, n_pad, n_pad, bf16))
        ps.append(_pad2d(pool, g_pad, n_pad, bf16))
        # weighted mask column: 1/n on real nodes, exactly 0 on padded rows
        ms.append(_pad2d(jnp.full((n_v, 1), 1.0 / n_v, f32), n_pad, 1, f32))
    xs, a_s, ps, ms = jnp.stack(xs), jnp.stack(a_s), jnp.stack(ps), jnp.stack(ms)

    view_inputs = [xs, a_s, ps, ms]
    view_specs = [
        pl.BlockSpec((None, n_pad, f_pad), lambda v: (v, 0, 0)),
        pl.BlockSpec((None, n_pad, n_pad), lambda v: (v, 0, 0)),
        pl.BlockSpec((None, g_pad, n_pad), lambda v: (v, 0, 0)),
        pl.BlockSpec((None, n_pad, 1), lambda v: (v, 0, 0)),
    ]

    # --- view-invariant weights (constant block index across the grid) ---
    weight_inputs = []
    for (w1, b1, w2, b2, gam, bet) in layer_params:
        in_pad = _round_up(w1.shape[0], 128)
        weight_inputs += [
            _pad2d(w1, in_pad, d_pad, bf16),
            _pad2d(b1, 1, d_pad, f32),
            _pad2d(w2, d_pad, d_pad, bf16),
            _pad2d(b2, 1, d_pad, f32),
            _pad2d(gam, 1, d_pad, f32, fill=1.0),
            _pad2d(bet, 1, d_pad, f32),
        ]
    wp1, bp1, wp2, bp2 = proj_params
    for l in range(num_layers):                         # Wp1 pre-split per layer
        weight_inputs.append(_pad2d(wp1[l * dim:(l + 1) * dim, :], d_pad, e_pad, bf16))
    weight_inputs += [_pad2d(bp1, 1, e_pad, f32),
                      _pad2d(wp2, e_pad, e_pad, bf16),
                      _pad2d(bp2, 1, e_pad, f32)]
    weight_specs = [pl.BlockSpec(w.shape, lambda v: (0, 0)) for w in weight_inputs]

    # --- VMEM budget: double-buffered view blocks + weights + live temporaries,
    # capped at the chip's physical VMEM (64 MiB on v7x, 128 MiB on v5e/v6e). ---
    def _buf_bytes(arr):
        r, c = int(arr.shape[-2]), int(arr.shape[-1])
        sub = 16 if arr.dtype == jnp.dtype(jnp.bfloat16) else 8
        return _round_up(r, sub) * _round_up(c, 128) * arr.dtype.itemsize

    per_view_bytes = sum(_buf_bytes(t) for t in view_inputs)
    weight_bytes = sum(_buf_bytes(t) for t in weight_inputs)
    out_block_bytes = _round_up(g_pad, 8) * _round_up(e_pad, 128) * 4
    bytes_tmp = (4 * n_pad * max(f_pad, d_pad) * 4        # agg / z / zc / zbn (f32)
                 + n_pad * max(f_pad, d_pad) * 2          # h (bf16)
                 + num_layers * g_pad * d_pad * 4         # pooled accumulators
                 + 2 * g_pad * e_pad * 4)                 # projection temporaries
    vmem_needed = 2 * (per_view_bytes + out_block_bytes) + 2 * weight_bytes + bytes_tmp
    try:
        vmem_cap = int(pltpu.get_tpu_info().vmem_capacity_bytes)
    except Exception:
        vmem_cap = 64 << 20                               # conservative (v7x)
    vmem_limit = int(min(max(vmem_needed, 32 << 20), vmem_cap - (8 << 20)))

    # --- cost estimate (padded shapes) so XLA schedules the surrounding
    # SimCLR ops (second-view pipeline / NT-Xent loss) around the call. ---
    flops, d_in = 0, f_pad
    for _ in range(num_layers):
        flops += 2 * n_pad * n_pad * d_in            # A_hat @ h
        flops += 2 * n_pad * d_in * d_pad            # Linear 1
        flops += 2 * n_pad * d_pad * d_pad           # Linear 2
        flops += 2 * g_pad * n_pad * d_pad           # global add pool
        flops += 8 * n_pad * d_pad                   # BN elementwise + reductions
        d_in = d_pad
    flops += 2 * num_layers * g_pad * d_pad * e_pad + 2 * g_pad * e_pad * e_pad
    flops *= num_views
    transcendentals = num_views * num_layers * d_pad
    bytes_accessed = (sum(int(np.prod(t.shape)) * t.dtype.itemsize
                          for t in view_inputs + weight_inputs)
                      + num_views * g_pad * e_pad * 4)

    kernel = functools.partial(_simclr_kernel, num_layers)
    y_pad = pl.pallas_call(
        kernel,
        out_shape=jax.ShapeDtypeStruct((num_views, g_pad, e_pad), f32),
        grid=(num_views,),
        in_specs=view_specs + weight_specs,
        out_specs=pl.BlockSpec((None, g_pad, e_pad), lambda v: (v, 0, 0)),
        compiler_params=pltpu.CompilerParams(
            dimension_semantics=("parallel",),       # 2 views -> 2 TCs on v7x
            vmem_limit_bytes=vmem_limit),
        cost_estimate=pl.CostEstimate(flops=int(flops),
                                      transcendentals=int(transcendentals),
                                      bytes_accessed=int(bytes_accessed)),
    )(*view_inputs, *weight_inputs)
    return y_pad[:, :g, :emb]


def simclr_forward(x, a_hat, pool, layer_params, proj_params):
    """Single-view forward matching simclr.forward (one augmented view)."""
    return simclr_forward_views([(x, a_hat, pool)], layer_params, proj_params)[0]


def xavier_uniform(key, fan_in, fan_out):
    bound = float(np.sqrt(6.0 / (fan_in + fan_out)))
    # stored [in, out] so the kernel computes h @ W
    return jax.random.uniform(key, (fan_in, fan_out), jnp.float32, -bound, bound)


def reference_forward(x, a_hat, pool, layer_params, proj_params):
    """Pure-JAX reference with bf16 matmul operands / f32 accumulation and f32
    BatchNorm statistics (matching both the kernel and PyTorch's f32 BN)."""
    bf = lambda t: t.astype(jnp.bfloat16)
    dot = lambda a, b: jnp.dot(bf(a), bf(b), preferred_element_type=jnp.float32)
    h = x
    pooled = []
    for (w1, b1, w2, b2, g, bta) in layer_params:
        agg = dot(a_hat, h)
        z = jnp.maximum(dot(agg, w1) + b1, 0.0)
        z = jnp.maximum(dot(z, w2) + b2, 0.0)
        mean = jnp.mean(z, axis=0, keepdims=True)
        zc = z - mean
        var = jnp.mean(zc * zc, axis=0, keepdims=True)
        z = zc * jax.lax.rsqrt(var + BN_EPS) * g + bta
        pooled.append(dot(pool, z))
        h = z
    y = jnp.concatenate(pooled, axis=1)
    wp1, bp1, wp2, bp2 = proj_params
    y = jnp.maximum(dot(y, wp1) + bp1, 0.0)
    y = dot(y, wp2) + bp2
    return y


if __name__ == "__main__":
    # Small synthetic graph batch: N=16 nodes, F=4 input features, hidden=32,
    # 3 GIN layers, G=2 graphs (8 nodes each), 2 augmented views.
    N, F, DIM, G = 16, 4, 32, 2
    EMB = DIM * NUM_GC_LAYERS

    key = jax.random.PRNGKey(0)
    keys = jax.random.split(key, 2 * NUM_GC_LAYERS + 4)

    # view 0: base features; view 1: feature-noise augmentation
    x0 = jax.random.normal(keys[0], (N, F), jnp.float32)
    x1 = x0 + 0.1 * jax.random.normal(keys[1], (N, F), jnp.float32)

    # Deterministic edge_index: undirected ring inside each graph of 8 nodes.
    src, dst = [], []
    for gi in range(G):
        base = gi * (N // G)
        for i in range(N // G):
            a, b = base + i, base + (i + 1) % (N // G)
            src += [a, b]
            dst += [b, a]
    A0 = np.zeros((N, N), np.float32)
    A0[np.array(dst), np.array(src)] = 1.0       # message src -> dst (sum aggregation)
    A1 = A0.copy()                               # view 1: drop one undirected edge
    A1[0, 1] = 0.0
    A1[1, 0] = 0.0
    eye = (1.0 + GIN_EPS) * jnp.eye(N, dtype=jnp.float32)
    a_hat0 = jnp.asarray(A0) + eye
    a_hat1 = jnp.asarray(A1) + eye

    # batch vector -> one-hot pooling matrix [G, N] (global add pool)
    batch = np.repeat(np.arange(G), N // G)
    P = jnp.asarray((batch[None, :] == np.arange(G)[:, None]).astype(np.float32))

    # Parameters (xavier_uniform weights, zero biases; BN gamma=1, beta=0).
    layer_params = []
    for i in range(NUM_GC_LAYERS):
        in_dim = F if i == 0 else DIM
        w1 = xavier_uniform(keys[2 + 2 * i], in_dim, DIM)
        w2 = xavier_uniform(keys[3 + 2 * i], DIM, DIM)
        b1 = jnp.zeros((1, DIM), jnp.float32)
        b2 = jnp.zeros((1, DIM), jnp.float32)
        gamma = jnp.ones((1, DIM), jnp.float32)
        beta = jnp.zeros((1, DIM), jnp.float32)
        layer_params.append((w1, b1, w2, b2, gamma, beta))

    wp1 = xavier_uniform(keys[-2], EMB, EMB)
    wp2 = xavier_uniform(keys[-1], EMB, EMB)
    proj_params = (wp1, jnp.zeros((1, EMB), jnp.float32),
                   wp2, jnp.zeros((1, EMB), jnp.float32))

    views = [(x0, a_hat0, P), (x1, a_hat1, P)]
    y = simclr_forward_views(views, layer_params, proj_params)
    y = jax.block_until_ready(y)
    assert y.shape == (2, G, EMB)

    for v, (xv, av, pv) in enumerate(views):
        y_ref = reference_forward(xv, av, pv, layer_params, proj_params)
        np.testing.assert_allclose(np.asarray(y[v]), np.asarray(y_ref),
                                   rtol=2e-3, atol=2e-3)

    print("KERNEL_OK")
</pallas_src>

<mosaic_0001>
module attributes {stable_mosaic.version = 11 : i64} {
  func.func @_simclr_kernel(%arg0: i32, %arg1: memref<1x128x128xbf16, #tpu.memory_space<vmem>>, %arg2: memref<1x128x128xbf16, #tpu.memory_space<vmem>>, %arg3: memref<1x16x128xbf16, #tpu.memory_space<vmem>>, %arg4: memref<1x128x1xf32, #tpu.memory_space<vmem>>, %arg5: memref<128x128xbf16, #tpu.memory_space<vmem>>, %arg6: memref<1x128xf32, #tpu.memory_space<vmem>>, %arg7: memref<128x128xbf16, #tpu.memory_space<vmem>>, %arg8: memref<1x128xf32, #tpu.memory_space<vmem>>, %arg9: memref<1x128xf32, #tpu.memory_space<vmem>>, %arg10: memref<1x128xf32, #tpu.memory_space<vmem>>, %arg11: memref<128x128xbf16, #tpu.memory_space<vmem>>, %arg12: memref<1x128xf32, #tpu.memory_space<vmem>>, %arg13: memref<128x128xbf16, #tpu.memory_space<vmem>>, %arg14: memref<1x128xf32, #tpu.memory_space<vmem>>, %arg15: memref<1x128xf32, #tpu.memory_space<vmem>>, %arg16: memref<1x128xf32, #tpu.memory_space<vmem>>, %arg17: memref<128x128xbf16, #tpu.memory_space<vmem>>, %arg18: memref<1x128xf32, #tpu.memory_space<vmem>>, %arg19: memref<128x128xbf16, #tpu.memory_space<vmem>>, %arg20: memref<1x128xf32, #tpu.memory_space<vmem>>, %arg21: memref<1x128xf32, #tpu.memory_space<vmem>>, %arg22: memref<1x128xf32, #tpu.memory_space<vmem>>, %arg23: memref<128x128xbf16, #tpu.memory_space<vmem>>, %arg24: memref<128x128xbf16, #tpu.memory_space<vmem>>, %arg25: memref<128x128xbf16, #tpu.memory_space<vmem>>, %arg26: memref<1x128xf32, #tpu.memory_space<vmem>>, %arg27: memref<128x128xbf16, #tpu.memory_space<vmem>>, %arg28: memref<1x128xf32, #tpu.memory_space<vmem>>, %arg29: memref<1x16x128xf32, #tpu.memory_space<vmem>>) attributes {dimension_semantics = [#tpu.dimension_semantics<parallel>], iteration_bounds = array<i64: 2>, scalar_prefetch = 0 : i64, scratch_operands = 0 : i64, tpu.core_type = #tpu.core_type<tc>, window_params = [{transform_indices = @transform_0, window_bounds = array<i64: 1, 128, 128>}, {transform_indices = @transform_1, window_bounds = array<i64: 1, 128, 128>}, {transform_indices = @transform_2, window_bounds = array<i64: 1, 16, 128>}, {transform_indices = @transform_3, window_bounds = array<i64: 1, 128, 1>}, {pipeline_mode = #tpu.pipeline_mode<synchronous>, transform_indices = @transform_4, window_bounds = array<i64: 128, 128>}, {pipeline_mode = #tpu.pipeline_mode<synchronous>, transform_indices = @transform_5, window_bounds = array<i64: 1, 128>}, {pipeline_mode = #tpu.pipeline_mode<synchronous>, transform_indices = @transform_6, window_bounds = array<i64: 128, 128>}, {pipeline_mode = #tpu.pipeline_mode<synchronous>, transform_indices = @transform_7, window_bounds = array<i64: 1, 128>}, {pipeline_mode = #tpu.pipeline_mode<synchronous>, transform_indices = @transform_8, window_bounds = array<i64: 1, 128>}, {pipeline_mode = #tpu.pipeline_mode<synchronous>, transform_indices = @transform_9, window_bounds = array<i64: 1, 128>}, {pipeline_mode = #tpu.pipeline_mode<synchronous>, transform_indices = @transform_10, window_bounds = array<i64: 128, 128>}, {pipeline_mode = #tpu.pipeline_mode<synchronous>, transform_indices = @transform_11, window_bounds = array<i64: 1, 128>}, {pipeline_mode = #tpu.pipeline_mode<synchronous>, transform_indices = @transform_12, window_bounds = array<i64: 128, 128>}, {pipeline_mode = #tpu.pipeline_mode<synchronous>, transform_indices = @transform_13, window_bounds = array<i64: 1, 128>}, {pipeline_mode = #tpu.pipeline_mode<synchronous>, transform_indices = @transform_14, window_bounds = array<i64: 1, 128>}, {pipeline_mode = #tpu.pipeline_mode<synchronous>, transform_indices = @transform_15, window_bounds = array<i64: 1, 128>}, {pipeline_mode = #tpu.pipeline_mode<synchronous>, transform_indices = @transform_16, window_bounds = array<i64: 128, 128>}, {pipeline_mode = #tpu.pipeline_mode<synchronous>, transform_indices = @transform_17, window_bounds = array<i64: 1, 128>}, {pipeline_mode = #tpu.pipeline_mode<synchronous>, transform_indices = @transform_18, window_bounds = array<i64: 128, 128>}, {pipeline_mode = #tpu.pipeline_mode<synchronous>, transform_indices = @transform_19, window_bounds = array<i64: 1, 128>}, {pipeline_mode = #tpu.pipeline_mode<synchronous>, transform_indices = @transform_20, window_bounds = array<i64: 1, 128>}, {pipeline_mode = #tpu.pipeline_mode<synchronous>, transform_indices = @transform_21, window_bounds = array<i64: 1, 128>}, {pipeline_mode = #tpu.pipeline_mode<synchronous>, transform_indices = @transform_22, window_bounds = array<i64: 128, 128>}, {pipeline_mode = #tpu.pipeline_mode<synchronous>, transform_indices = @transform_23, window_bounds = array<i64: 128, 128>}, {pipeline_mode = #tpu.pipeline_mode<synchronous>, transform_indices = @transform_24, window_bounds = array<i64: 128, 128>}, {pipeline_mode = #tpu.pipeline_mode<synchronous>, transform_indices = @transform_25, window_bounds = array<i64: 1, 128>}, {pipeline_mode = #tpu.pipeline_mode<synchronous>, transform_indices = @transform_26, window_bounds = array<i64: 128, 128>}, {pipeline_mode = #tpu.pipeline_mode<synchronous>, transform_indices = @transform_27, window_bounds = array<i64: 1, 128>}, {transform_indices = @transform_28, window_bounds = array<i64: 1, 16, 128>}]} {
    %c0 = arith.constant 0 : index
    %c0_0 = arith.constant 0 : index
    %c0_1 = arith.constant 0 : index
    %0 = vector.load %arg2[%c0, %c0_0, %c0_1] : memref<1x128x128xbf16, #tpu.memory_space<vmem>>, vector<1x128x128xbf16>
    %1 = vector.shape_cast %0 : vector<1x128x128xbf16> to vector<128x128xbf16>
    %c0_2 = arith.constant 0 : index
    %c0_3 = arith.constant 0 : index
    %c0_4 = arith.constant 0 : index
    %2 = vector.load %arg3[%c0_2, %c0_3, %c0_4] : memref<1x16x128xbf16, #tpu.memory_space<vmem>>, vector<1x16x128xbf16>
    %3 = vector.shape_cast %2 : vector<1x16x128xbf16> to vector<16x128xbf16>
    %c0_5 = arith.constant 0 : index
    %c0_6 = arith.constant 0 : index
    %c0_7 = arith.constant 0 : index
    %4 = vector.load %arg4[%c0_5, %c0_6, %c0_7] : memref<1x128x1xf32, #tpu.memory_space<vmem>>, vector<1x128x1xf32>
    %5 = vector.shape_cast %4 : vector<1x128x1xf32> to vector<128x1xf32>
    %c0_8 = arith.constant 0 : index
    %c0_9 = arith.constant 0 : index
    %c0_10 = arith.constant 0 : index
    %6 = vector.load %arg1[%c0_8, %c0_9, %c0_10] : memref<1x128x128xbf16, #tpu.memory_space<vmem>>, vector<1x128x128xbf16>
    %7 = vector.shape_cast %6 : vector<1x128x128xbf16> to vector<128x128xbf16>
    %cst = arith.constant dense<0.000000e+00> : vector<128x128xf32>
    %8 = tpu.matmul %1, %7, %cst {dimension_numbers = #tpu.dot_dimension_numbers<[1], [0], [0], [1], [0, 0, 1, 1], [], []>} : vector<128x128xbf16>, vector<128x128xbf16>, vector<128x128xf32> -> vector<128x128xf32>
    %9 = arith.truncf %8 : vector<128x128xf32> to vector<128x128xbf16>
    %c0_11 = arith.constant 0 : index
    %c0_12 = arith.constant 0 : index
    %10 = vector.load %arg5[%c0_11, %c0_12] : memref<128x128xbf16, #tpu.memory_space<vmem>>, vector<128x128xbf16>
    %cst_13 = arith.constant dense<0.000000e+00> : vector<128x128xf32>
    %11 = tpu.matmul %9, %10, %cst_13 {dimension_numbers = #tpu.dot_dimension_numbers<[1], [0], [0], [1], [0, 0, 1, 1], [], []>} : vector<128x128xbf16>, vector<128x128xbf16>, vector<128x128xf32> -> vector<128x128xf32>
    %c0_14 = arith.constant 0 : index
    %c0_15 = arith.constant 0 : index
    %12 = vector.load %arg6[%c0_14, %c0_15] : memref<1x128xf32, #tpu.memory_space<vmem>>, vector<1x128xf32>
    %13 = vector.broadcast %12 : vector<1x128xf32> to vector<128x128xf32>
    %14 = arith.addf %11, %13 : vector<128x128xf32>
    %cst_16 = arith.constant 0.000000e+00 : f32
    %15 = vector.broadcast %cst_16 : f32 to vector<128x128xf32>
    %16 = arith.maximumf %14, %15 : vector<128x128xf32>
    %17 = arith.truncf %16 : vector<128x128xf32> to vector<128x128xbf16>
    %c0_17 = arith.constant 0 : index
    %c0_18 = arith.constant 0 : index
    %18 = vector.load %arg7[%c0_17, %c0_18] : memref<128x128xbf16, #tpu.memory_space<vmem>>, vector<128x128xbf16>
    %cst_19 = arith.constant dense<0.000000e+00> : vector<128x128xf32>
    %19 = tpu.matmul %17, %18, %cst_19 {dimension_numbers = #tpu.dot_dimension_numbers<[1], [0], [0], [1], [0, 0, 1, 1], [], []>} : vector<128x128xbf16>, vector<128x128xbf16>, vector<128x128xf32> -> vector<128x128xf32>
    %c0_20 = arith.constant 0 : index
    %c0_21 = arith.constant 0 : index
    %20 = vector.load %arg8[%c0_20, %c0_21] : memref<1x128xf32, #tpu.memory_space<vmem>>, vector<1x128xf32>
    %21 = vector.broadcast %20 : vector<1x128xf32> to vector<128x128xf32>
    %22 = arith.addf %19, %21 : vector<128x128xf32>
    %cst_22 = arith.constant 0.000000e+00 : f32
    %23 = vector.broadcast %cst_22 : f32 to vector<128x128xf32>
    %24 = arith.maximumf %22, %23 : vector<128x128xf32>
    %25 = vector.broadcast %5 : vector<128x1xf32> to vector<128x128xf32>
    %26 = arith.mulf %24, %25 : vector<128x128xf32>
    %cst_23 = arith.constant dense<0.000000e+00> : vector<128xf32>
    %27 = vector.multi_reduction <add>, %26, %cst_23 [0] : vector<128x128xf32> to vector<128xf32>
    %28 = vector.shape_cast %27 : vector<128xf32> to vector<1x128xf32>
    %29 = vector.broadcast %28 : vector<1x128xf32> to vector<128x128xf32>
    %30 = arith.subf %24, %29 : vector<128x128xf32>
    %31 = arith.mulf %30, %30 : vector<128x128xf32>
    %32 = vector.broadcast %5 : vector<128x1xf32> to vector<128x128xf32>
    %33 = arith.mulf %31, %32 : vector<128x128xf32>
    %cst_24 = arith.constant dense<0.000000e+00> : vector<128xf32>
    %34 = vector.multi_reduction <add>, %33, %cst_24 [0] : vector<128x128xf32> to vector<128xf32>
    %35 = vector.shape_cast %34 : vector<128xf32> to vector<1x128xf32>
    %cst_25 = arith.constant 9.99999974E-6 : f32
    %36 = vector.broadcast %cst_25 : f32 to vector<1x128xf32>
    %37 = arith.addf %35, %36 : vector<1x128xf32>
    %38 = math.rsqrt %37 : vector<1x128xf32>
    %39 = vector.broadcast %38 : vector<1x128xf32> to vector<128x128xf32>
    %40 = arith.mulf %30, %39 : vector<128x128xf32>
    %c0_26 = arith.constant 0 : index
    %c0_27 = arith.constant 0 : index
    %41 = vector.load %arg9[%c0_26, %c0_27] : memref<1x128xf32, #tpu.memory_space<vmem>>, vector<1x128xf32>
    %42 = vector.broadcast %41 : vector<1x128xf32> to vector<128x128xf32>
    %43 = arith.mulf %40, %42 : vector<128x128xf32>
    %c0_28 = arith.constant 0 : index
    %c0_29 = arith.constant 0 : index
    %44 = vector.load %arg10[%c0_28, %c0_29] : memref<1x128xf32, #tpu.memory_space<vmem>>, vector<1x128xf32>
    %45 = vector.broadcast %44 : vector<1x128xf32> to vector<128x128xf32>
    %46 = arith.addf %43, %45 : vector<128x128xf32>
    %47 = arith.truncf %46 : vector<128x128xf32> to vector<128x128xbf16>
    %cst_30 = arith.constant dense<0.000000e+00> : vector<16x128xf32>
    %48 = tpu.matmul %3, %47, %cst_30 {dimension_numbers = #tpu.dot_dimension_numbers<[1], [0], [0], [1], [0, 0, 1, 1], [], []>} : vector<16x128xbf16>, vector<128x128xbf16>, vector<16x128xf32> -> vector<16x128xf32>
    %cst_31 = arith.constant dense<0.000000e+00> : vector<128x128xf32>
    %49 = tpu.matmul %1, %47, %cst_31 {dimension_numbers = #tpu.dot_dimension_numbers<[1], [0], [0], [1], [0, 0, 1, 1], [], []>} : vector<128x128xbf16>, vector<128x128xbf16>, vector<128x128xf32> -> vector<128x128xf32>
    %50 = arith.truncf %49 : vector<128x128xf32> to vector<128x128xbf16>
    %c0_32 = arith.constant 0 : index
    %c0_33 = arith.constant 0 : index
    %51 = vector.load %arg11[%c0_32, %c0_33] : memref<128x128xbf16, #tpu.memory_space<vmem>>, vector<128x128xbf16>
    %cst_34 = arith.constant dense<0.000000e+00> : vector<128x128xf32>
    %52 = tpu.matmul %50, %51, %cst_34 {dimension_numbers = #tpu.dot_dimension_numbers<[1], [0], [0], [1], [0, 0, 1, 1], [], []>} : vector<128x128xbf16>, vector<128x128xbf16>, vector<128x128xf32> -> vector<128x128xf32>
    %c0_35 = arith.constant 0 : index
    %c0_36 = arith.constant 0 : index
    %53 = vector.load %arg12[%c0_35, %c0_36] : memref<1x128xf32, #tpu.memory_space<vmem>>, vector<1x128xf32>
    %54 = vector.broadcast %53 : vector<1x128xf32> to vector<128x128xf32>
    %55 = arith.addf %52, %54 : vector<128x128xf32>
    %cst_37 = arith.constant 0.000000e+00 : f32
    %56 = vector.broadcast %cst_37 : f32 to vector<128x128xf32>
    %57 = arith.maximumf %55, %56 : vector<128x128xf32>
    %58 = arith.truncf %57 : vector<128x128xf32> to vector<128x128xbf16>
    %c0_38 = arith.constant 0 : index
    %c0_39 = arith.constant 0 : index
    %59 = vector.load %arg13[%c0_38, %c0_39] : memref<128x128xbf16, #tpu.memory_space<vmem>>, vector<128x128xbf16>
    %cst_40 = arith.constant dense<0.000000e+00> : vector<128x128xf32>
    %60 = tpu.matmul %58, %59, %cst_40 {dimension_numbers = #tpu.dot_dimension_numbers<[1], [0], [0], [1], [0, 0, 1, 1], [], []>} : vector<128x128xbf16>, vector<128x128xbf16>, vector<128x128xf32> -> vector<128x128xf32>
    %c0_41 = arith.constant 0 : index
    %c0_42 = arith.constant 0 : index
    %61 = vector.load %arg14[%c0_41, %c0_42] : memref<1x128xf32, #tpu.memory_space<vmem>>, vector<1x128xf32>
    %62 = vector.broadcast %61 : vector<1x128xf32> to vector<128x128xf32>
    %63 = arith.addf %60, %62 : vector<128x128xf32>
    %cst_43 = arith.constant 0.000000e+00 : f32
    %64 = vector.broadcast %cst_43 : f32 to vector<128x128xf32>
    %65 = arith.maximumf %63, %64 : vector<128x128xf32>
    %66 = vector.broadcast %5 : vector<128x1xf32> to vector<128x128xf32>
    %67 = arith.mulf %65, %66 : vector<128x128xf32>
    %cst_44 = arith.constant dense<0.000000e+00> : vector<128xf32>
    %68 = vector.multi_reduction <add>, %67, %cst_44 [0] : vector<128x128xf32> to vector<128xf32>
    %69 = vector.shape_cast %68 : vector<128xf32> to vector<1x128xf32>
    %70 = vector.broadcast %69 : vector<1x128xf32> to vector<128x128xf32>
    %71 = arith.subf %65, %70 : vector<128x128xf32>
    %72 = arith.mulf %71, %71 : vector<128x128xf32>
    %73 = vector.broadcast %5 : vector<128x1xf32> to vector<128x128xf32>
    %74 = arith.mulf %72, %73 : vector<128x128xf32>
    %cst_45 = arith.constant dense<0.000000e+00> : vector<128xf32>
    %75 = vector.multi_reduction <add>, %74, %cst_45 [0] : vector<128x128xf32> to vector<128xf32>
    %76 = vector.shape_cast %75 : vector<128xf32> to vector<1x128xf32>
    %cst_46 = arith.constant 9.99999974E-6 : f32
    %77 = vector.broadcast %cst_46 : f32 to vector<1x128xf32>
    %78 = arith.addf %76, %77 : vector<1x128xf32>
    %79 = math.rsqrt %78 : vector<1x128xf32>
    %80 = vector.broadcast %79 : vector<1x128xf32> to vector<128x128xf32>
    %81 = arith.mulf %71, %80 : vector<128x128xf32>
    %c0_47 = arith.constant 0 : index
    %c0_48 = arith.constant 0 : index
    %82 = vector.load %arg15[%c0_47, %c0_48] : memref<1x128xf32, #tpu.memory_space<vmem>>, vector<1x128xf32>
    %83 = vector.broadcast %82 : vector<1x128xf32> to vector<128x128xf32>
    %84 = arith.mulf %81, %83 : vector<128x128xf32>
    %c0_49 = arith.constant 0 : index
    %c0_50 = arith.constant 0 : index
    %85 = vector.load %arg16[%c0_49, %c0_50] : memref<1x128xf32, #tpu.memory_space<vmem>>, vector<1x128xf32>
    %86 = vector.broadcast %85 : vector<1x128xf32> to vector<128x128xf32>
    %87 = arith.addf %84, %86 : vector<128x128xf32>
    %88 = arith.truncf %87 : vector<128x128xf32> to vector<128x128xbf16>
    %cst_51 = arith.constant dense<0.000000e+00> : vector<16x128xf32>
    %89 = tpu.matmul %3, %88, %cst_51 {dimension_numbers = #tpu.dot_dimension_numbers<[1], [0], [0], [1], [0, 0, 1, 1], [], []>} : vector<16x128xbf16>, vector<128x128xbf16>, vector<16x128xf32> -> vector<16x128xf32>
    %cst_52 = arith.constant dense<0.000000e+00> : vector<128x128xf32>
    %90 = tpu.matmul %1, %88, %cst_52 {dimension_numbers = #tpu.dot_dimension_numbers<[1], [0], [0], [1], [0, 0, 1, 1], [], []>} : vector<128x128xbf16>, vector<128x128xbf16>, vector<128x128xf32> -> vector<128x128xf32>
    %91 = arith.truncf %90 : vector<128x128xf32> to vector<128x128xbf16>
    %c0_53 = arith.constant 0 : index
    %c0_54 = arith.constant 0 : index
    %92 = vector.load %arg17[%c0_53, %c0_54] : memref<128x128xbf16, #tpu.memory_space<vmem>>, vector<128x128xbf16>
    %cst_55 = arith.constant dense<0.000000e+00> : vector<128x128xf32>
    %93 = tpu.matmul %91, %92, %cst_55 {dimension_numbers = #tpu.dot_dimension_numbers<[1], [0], [0], [1], [0, 0, 1, 1], [], []>} : vector<128x128xbf16>, vector<128x128xbf16>, vector<128x128xf32> -> vector<128x128xf32>
    %c0_56 = arith.constant 0 : index
    %c0_57 = arith.constant 0 : index
    %94 = vector.load %arg18[%c0_56, %c0_57] : memref<1x128xf32, #tpu.memory_space<vmem>>, vector<1x128xf32>
    %95 = vector.broadcast %94 : vector<1x128xf32> to vector<128x128xf32>
    %96 = arith.addf %93, %95 : vector<128x128xf32>
    %cst_58 = arith.constant 0.000000e+00 : f32
    %97 = vector.broadcast %cst_58 : f32 to vector<128x128xf32>
    %98 = arith.maximumf %96, %97 : vector<128x128xf32>
    %99 = arith.truncf %98 : vector<128x128xf32> to vector<128x128xbf16>
    %c0_59 = arith.constant 0 : index
    %c0_60 = arith.constant 0 : index
    %100 = vector.load %arg19[%c0_59, %c0_60] : memref<128x128xbf16, #tpu.memory_space<vmem>>, vector<128x128xbf16>
    %cst_61 = arith.constant dense<0.000000e+00> : vector<128x128xf32>
    %101 = tpu.matmul %99, %100, %cst_61 {dimension_numbers = #tpu.dot_dimension_numbers<[1], [0], [0], [1], [0, 0, 1, 1], [], []>} : vector<128x128xbf16>, vector<128x128xbf16>, vector<128x128xf32> -> vector<128x128xf32>
    %c0_62 = arith.constant 0 : index
    %c0_63 = arith.constant 0 : index
    %102 = vector.load %arg20[%c0_62, %c0_63] : memref<1x128xf32, #tpu.memory_space<vmem>>, vector<1x128xf32>
    %103 = vector.broadcast %102 : vector<1x128xf32> to vector<128x128xf32>
    %104 = arith.addf %101, %103 : vector<128x128xf32>
    %cst_64 = arith.constant 0.000000e+00 : f32
    %105 = vector.broadcast %cst_64 : f32 to vector<128x128xf32>
    %106 = arith.maximumf %104, %105 : vector<128x128xf32>
    %107 = vector.broadcast %5 : vector<128x1xf32> to vector<128x128xf32>
    %108 = arith.mulf %106, %107 : vector<128x128xf32>
    %cst_65 = arith.constant dense<0.000000e+00> : vector<128xf32>
    %109 = vector.multi_reduction <add>, %108, %cst_65 [0] : vector<128x128xf32> to vector<128xf32>
    %110 = vector.shape_cast %109 : vector<128xf32> to vector<1x128xf32>
    %111 = vector.broadcast %110 : vector<1x128xf32> to vector<128x128xf32>
    %112 = arith.subf %106, %111 : vector<128x128xf32>
    %113 = arith.mulf %112, %112 : vector<128x128xf32>
    %114 = vector.broadcast %5 : vector<128x1xf32> to vector<128x128xf32>
    %115 = arith.mulf %113, %114 : vector<128x128xf32>
    %cst_66 = arith.constant dense<0.000000e+00> : vector<128xf32>
    %116 = vector.multi_reduction <add>, %115, %cst_66 [0] : vector<128x128xf32> to vector<128xf32>
    %117 = vector.shape_cast %116 : vector<128xf32> to vector<1x128xf32>
    %cst_67 = arith.constant 9.99999974E-6 : f32
    %118 = vector.broadcast %cst_67 : f32 to vector<1x128xf32>
    %119 = arith.addf %117, %118 : vector<1x128xf32>
    %120 = math.rsqrt %119 : vector<1x128xf32>
    %121 = vector.broadcast %120 : vector<1x128xf32> to vector<128x128xf32>
    %122 = arith.mulf %112, %121 : vector<128x128xf32>
    %c0_68 = arith.constant 0 : index
    %c0_69 = arith.constant 0 : index
    %123 = vector.load %arg21[%c0_68, %c0_69] : memref<1x128xf32, #tpu.memory_space<vmem>>, vector<1x128xf32>
    %124 = vector.broadcast %123 : vector<1x128xf32> to vector<128x128xf32>
    %125 = arith.mulf %122, %124 : vector<128x128xf32>
    %c0_70 = arith.constant 0 : index
    %c0_71 = arith.constant 0 : index
    %126 = vector.load %arg22[%c0_70, %c0_71] : memref<1x128xf32, #tpu.memory_space<vmem>>, vector<1x128xf32>
    %127 = vector.broadcast %126 : vector<1x128xf32> to vector<128x128xf32>
    %128 = arith.addf %125, %127 : vector<128x128xf32>
    %129 = arith.truncf %128 : vector<128x128xf32> to vector<128x128xbf16>
    %cst_72 = arith.constant dense<0.000000e+00> : vector<16x128xf32>
    %130 = tpu.matmul %3, %129, %cst_72 {dimension_numbers = #tpu.dot_dimension_numbers<[1], [0], [0], [1], [0, 0, 1, 1], [], []>} : vector<16x128xbf16>, vector<128x128xbf16>, vector<16x128xf32> -> vector<16x128xf32>
    %c0_73 = arith.constant 0 : index
    %c0_74 = arith.constant 0 : index
    %131 = vector.load %arg26[%c0_73, %c0_74] : memref<1x128xf32, #tpu.memory_space<vmem>>, vector<1x128xf32>
    %132 = arith.truncf %48 : vector<16x128xf32> to vector<16x128xbf16>
    %c0_75 = arith.constant 0 : index
    %c0_76 = arith.constant 0 : index
    %133 = vector.load %arg23[%c0_75, %c0_76] : memref<128x128xbf16, #tpu.memory_space<vmem>>, vector<128x128xbf16>
    %cst_77 = arith.constant dense<0.000000e+00> : vector<16x128xf32>
    %134 = tpu.matmul %132, %133, %cst_77 {dimension_numbers = #tpu.dot_dimension_numbers<[1], [0], [0], [1], [0, 0, 1, 1], [], []>} : vector<16x128xbf16>, vector<128x128xbf16>, vector<16x128xf32> -> vector<16x128xf32>
    %135 = vector.broadcast %131 : vector<1x128xf32> to vector<16x128xf32>
    %136 = arith.addf %135, %134 : vector<16x128xf32>
    %137 = arith.truncf %89 : vector<16x128xf32> to vector<16x128xbf16>
    %c0_78 = arith.constant 0 : index
    %c0_79 = arith.constant 0 : index
    %138 = vector.load %arg24[%c0_78, %c0_79] : memref<128x128xbf16, #tpu.memory_space<vmem>>, vector<128x128xbf16>
    %cst_80 = arith.constant dense<0.000000e+00> : vector<16x128xf32>
    %139 = tpu.matmul %137, %138, %cst_80 {dimension_numbers = #tpu.dot_dimension_numbers<[1], [0], [0], [1], [0, 0, 1, 1], [], []>} : vector<16x128xbf16>, vector<128x128xbf16>, vector<16x128xf32> -> vector<16x128xf32>
    %140 = arith.addf %136, %139 : vector<16x128xf32>
    %141 = arith.truncf %130 : vector<16x128xf32> to vector<16x128xbf16>
    %c0_81 = arith.constant 0 : index
    %c0_82 = arith.constant 0 : index
    %142 = vector.load %arg25[%c0_81, %c0_82] : memref<128x128xbf16, #tpu.memory_space<vmem>>, vector<128x128xbf16>
    %cst_83 = arith.constant dense<0.000000e+00> : vector<16x128xf32>
    %143 = tpu.matmul %141, %142, %cst_83 {dimension_numbers = #tpu.dot_dimension_numbers<[1], [0], [0], [1], [0, 0, 1, 1], [], []>} : vector<16x128xbf16>, vector<128x128xbf16>, vector<16x128xf32> -> vector<16x128xf32>
    %144 = arith.addf %140, %143 : vector<16x128xf32>
    %cst_84 = arith.constant 0.000000e+00 : f32
    %145 = vector.broadcast %cst_84 : f32 to vector<16x128xf32>
    %146 = arith.maximumf %144, %145 : vector<16x128xf32>
    %147 = arith.truncf %146 : vector<16x128xf32> to vector<16x128xbf16>
    %c0_85 = arith.constant 0 : index
    %c0_86 = arith.constant 0 : index
    %148 = vector.load %arg27[%c0_85, %c0_86] : memref<128x128xbf16, #tpu.memory_space<vmem>>, vector<128x128xbf16>
    %cst_87 = arith.constant dense<0.000000e+00> : vector<16x128xf32>
    %149 = tpu.matmul %147, %148, %cst_87 {dimension_numbers = #tpu.dot_dimension_numbers<[1], [0], [0], [1], [0, 0, 1, 1], [], []>} : vector<16x128xbf16>, vector<128x128xbf16>, vector<16x128xf32> -> vector<16x128xf32>
    %c0_88 = arith.constant 0 : index
    %c0_89 = arith.constant 0 : index
    %150 = vector.load %arg28[%c0_88, %c0_89] : memref<1x128xf32, #tpu.memory_space<vmem>>, vector<1x128xf32>
    %151 = vector.broadcast %150 : vector<1x128xf32> to vector<16x128xf32>
    %152 = arith.addf %149, %151 : vector<16x128xf32>
    %c0_90 = arith.constant 0 : index
    %c0_91 = arith.constant 0 : index
    %c0_92 = arith.constant 0 : index
    %153 = vector.load %arg29[%c0_90, %c0_91, %c0_92] : memref<1x16x128xf32, #tpu.memory_space<vmem>>, vector<1x16x128xf32>
    %154 = vector.shape_cast %153 : vector<1x16x128xf32> to vector<16x128xf32>
    %155 = vector.shape_cast %152 : vector<16x128xf32> to vector<1x16x128xf32>
    tpu.vector_store %arg29[%c0_90, %c0_91, %c0_92], %155 {strides = array<i32>} : memref<1x16x128xf32, #tpu.memory_space<vmem>>, vector<1x16x128xf32>,
    return
  }
  func.func @transform_0(%arg0: i32) -> (i32, i32, i32) {
    %c0_i32 = arith.constant 0 : i32
    %c0_i32_0 = arith.constant 0 : i32
    %c0_i32_1 = arith.constant 0 : i32
    return %arg0, %c0_i32, %c0_i32_0 : i32, i32, i32
  }
  func.func @transform_1(%arg0: i32) -> (i32, i32, i32) {
    %c0_i32 = arith.constant 0 : i32
    %c0_i32_0 = arith.constant 0 : i32
    %c0_i32_1 = arith.constant 0 : i32
    return %arg0, %c0_i32, %c0_i32_0 : i32, i32, i32
  }
  func.func @transform_2(%arg0: i32) -> (i32, i32, i32) {
    %c0_i32 = arith.constant 0 : i32
    %c0_i32_0 = arith.constant 0 : i32
    %c0_i32_1 = arith.constant 0 : i32
    return %arg0, %c0_i32, %c0_i32_0 : i32, i32, i32
  }
  func.func @transform_3(%arg0: i32) -> (i32, i32, i32) {
    %c0_i32 = arith.constant 0 : i32
    %c0_i32_0 = arith.constant 0 : i32
    %c0_i32_1 = arith.constant 0 : i32
    return %arg0, %c0_i32, %c0_i32_0 : i32, i32, i32
  }
  func.func @transform_4(%arg0: i32) -> (i32, i32) {
    %c0_i32 = arith.constant 0 : i32
    %c0_i32_0 = arith.constant 0 : i32
    %c0_i32_1 = arith.constant 0 : i32
    return %c0_i32, %c0_i32_0 : i32, i32
  }
  func.func @transform_5(%arg0: i32) -> (i32, i32) {
    %c0_i32 = arith.constant 0 : i32
    %c0_i32_0 = arith.constant 0 : i32
    %c0_i32_1 = arith.constant 0 : i32
    return %c0_i32, %c0_i32_0 : i32, i32
  }
  func.func @transform_6(%arg0: i32) -> (i32, i32) {
    %c0_i32 = arith.constant 0 : i32
    %c0_i32_0 = arith.constant 0 : i32
    %c0_i32_1 = arith.constant 0 : i32
    return %c0_i32, %c0_i32_0 : i32, i32
  }
  func.func @transform_7(%arg0: i32) -> (i32, i32) {
    %c0_i32 = arith.constant 0 : i32
    %c0_i32_0 = arith.constant 0 : i32
    %c0_i32_1 = arith.constant 0 : i32
    return %c0_i32, %c0_i32_0 : i32, i32
  }
  func.func @transform_8(%arg0: i32) -> (i32, i32) {
    %c0_i32 = arith.constant 0 : i32
    %c0_i32_0 = arith.constant 0 : i32
    %c0_i32_1 = arith.constant 0 : i32
    return %c0_i32, %c0_i32_0 : i32, i32
  }
  func.func @transform_9(%arg0: i32) -> (i32, i32) {
    %c0_i32 = arith.constant 0 : i32
    %c0_i32_0 = arith.constant 0 : i32
    %c0_i32_1 = arith.constant 0 : i32
    return %c0_i32, %c0_i32_0 : i32, i32
  }
  func.func @transform_10(%arg0: i32) -> (i32, i32) {
    %c0_i32 = arith.constant 0 : i32
    %c0_i32_0 = arith.constant 0 : i32
    %c0_i32_1 = arith.constant 0 : i32
    return %c0_i32, %c0_i32_0 : i32, i32
  }
  func.func @transform_11(%arg0: i32) -> (i32, i32) {
    %c0_i32 = arith.constant 0 : i32
    %c0_i32_0 = arith.constant 0 : i32
    %c0_i32_1 = arith.constant 0 : i32
    return %c0_i32, %c0_i32_0 : i32, i32
  }
  func.func @transform_12(%arg0: i32) -> (i32, i32) {
    %c0_i32 = arith.constant 0 : i32
    %c0_i32_0 = arith.constant 0 : i32
    %c0_i32_1 = arith.constant 0 : i32
    return %c0_i32, %c0_i32_0 : i32, i32
  }
  func.func @transform_13(%arg0: i32) -> (i32, i32) {
    %c0_i32 = arith.constant 0 : i32
    %c0_i32_0 = arith.constant 0 : i32
    %c0_i32_1 = arith.constant 0 : i32
    return %c0_i32, %c0_i32_0 : i32, i32
  }
  func.func @transform_14(%arg0: i32) -> (i32, i32) {
    %c0_i32 = arith.constant 0 : i32
    %c0_i32_0 = arith.constant 0 : i32
    %c0_i32_1 = arith.constant 0 : i32
    return %c0_i32, %c0_i32_0 : i32, i32
  }
  func.func @transform_15(%arg0: i32) -> (i32, i32) {
    %c0_i32 = arith.constant 0 : i32
    %c0_i32_0 = arith.constant 0 : i32
    %c0_i32_1 = arith.constant 0 : i32
    return %c0_i32, %c0_i32_0 : i32, i32
  }
  func.func @transform_16(%arg0: i32) -> (i32, i32) {
    %c0_i32 = arith.constant 0 : i32
    %c0_i32_0 = arith.constant 0 : i32
    %c0_i32_1 = arith.constant 0 : i32
    return %c0_i32, %c0_i32_0 : i32, i32
  }
  func.func @transform_17(%arg0: i32) -> (i32, i32) {
    %c0_i32 = arith.constant 0 : i32
    %c0_i32_0 = arith.constant 0 : i32
    %c0_i32_1 = arith.constant 0 : i32
    return %c0_i32, %c0_i32_0 : i32, i32
  }
  func.func @transform_18(%arg0: i32) -> (i32, i32) {
    %c0_i32 = arith.constant 0 : i32
    %c0_i32_0 = arith.constant 0 : i32
    %c0_i32_1 = arith.constant 0 : i32
    return %c0_i32, %c0_i32_0 : i32, i32
  }
  func.func @transform_19(%arg0: i32) -> (i32, i32) {
    %c0_i32 = arith.constant 0 : i32
    %c0_i32_0 = arith.constant 0 : i32
    %c0_i32_1 = arith.constant 0 : i32
    return %c0_i32, %c0_i32_0 : i32, i32
  }
  func.func @transform_20(%arg0: i32) -> (i32, i32) {
    %c0_i32 = arith.constant 0 : i32
    %c0_i32_0 = arith.constant 0 : i32
    %c0_i32_1 = arith.constant 0 : i32
    return %c0_i32, %c0_i32_0 : i32, i32
  }
  func.func @transform_21(%arg0: i32) -> (i32, i32) {
    %c0_i32 = arith.constant 0 : i32
    %c0_i32_0 = arith.constant 0 : i32
    %c0_i32_1 = arith.constant 0 : i32
    return %c0_i32, %c0_i32_0 : i32, i32
  }
  func.func @transform_22(%arg0: i32) -> (i32, i32) {
    %c0_i32 = arith.constant 0 : i32
    %c0_i32_0 = arith.constant 0 : i32
    %c0_i32_1 = arith.constant 0 : i32
    return %c0_i32, %c0_i32_0 : i32, i32
  }
  func.func @transform_23(%arg0: i32) -> (i32, i32) {
    %c0_i32 = arith.constant 0 : i32
    %c0_i32_0 = arith.constant 0 : i32
    %c0_i32_1 = arith.constant 0 : i32
    return %c0_i32, %c0_i32_0 : i32, i32
  }
  func.func @transform_24(%arg0: i32) -> (i32, i32) {
    %c0_i32 = arith.constant 0 : i32
    %c0_i32_0 = arith.constant 0 : i32
    %c0_i32_1 = arith.constant 0 : i32
    return %c0_i32, %c0_i32_0 : i32, i32
  }
  func.func @transform_25(%arg0: i32) -> (i32, i32) {
    %c0_i32 = arith.constant 0 : i32
    %c0_i32_0 = arith.constant 0 : i32
    %c0_i32_1 = arith.constant 0 : i32
    return %c0_i32, %c0_i32_0 : i32, i32
  }
  func.func @transform_26(%arg0: i32) -> (i32, i32) {
    %c0_i32 = arith.constant 0 : i32
    %c0_i32_0 = arith.constant 0 : i32
    %c0_i32_1 = arith.constant 0 : i32
    return %c0_i32, %c0_i32_0 : i32, i32
  }
  func.func @transform_27(%arg0: i32) -> (i32, i32) {
    %c0_i32 = arith.constant 0 : i32
    %c0_i32_0 = arith.constant 0 : i32
    %c0_i32_1 = arith.constant 0 : i32
    return %c0_i32, %c0_i32_0 : i32, i32
  }
  func.func @transform_28(%arg0: i32) -> (i32, i32, i32) {
    %c0_i32 = arith.constant 0 : i32
    %c0_i32_0 = arith.constant 0 : i32
    %c0_i32_1 = arith.constant 0 : i32
    return %arg0, %c0_i32, %c0_i32_0 : i32, i32, i32
  }
}

</mosaic_0001>

<bundles_post_ra>
// kernel: tpu_custom_call.1
= control target key start
LH: loop header
LB: loop body
LE: loop exit
PB: predicated region body
PF: predicated region fallthrough
CT: control target
= control target key end

     0   :  { %s7484_s0 = inlined_call_operand.vmem [shape: bf16[2,128,128], index: 0, kind: input, shape index: {}]   ;;  %s7485_s1 = inlined_call_operand.vmem [shape: bf16[2,128,128], index: 1, kind: input, shape index: {}]   ;;  %s7486_s2 = inlined_call_operand.hbm [shape: bf16[2,16,128], index: 2, kind: input, shape index: {}]   ;;  %s7487_s3 = inlined_call_operand.vmem [shape: f32[2,128,1], index: 3, kind: input, shape index: {}]   ;;  %s7488_s4 = inlined_call_operand.hbm [shape: bf16[128,128], index: 4, kind: input, shape index: {}]   ;;  %s7489_s5 = inlined_call_operand.vmem [shape: f32[1,128], index: 5, kind: input, shape index: {}]   ;;  %s7490_s6 = inlined_call_operand.hbm [shape: bf16[128,128], index: 6, kind: input, shape index: {}]   ;;  %s7491_s7 = inlined_call_operand.vmem [shape: f32[1,128], index: 7, kind: input, shape index: {}]   ;;  %s7492_s8 = inlined_call_operand.hbm [shape: f32[1,128], index: 8, kind: input, shape index: {}]   ;;  %s7493_s9 = inlined_call_operand.hbm [shape: f32[1,128], index: 9, kind: input, shape index: {}]   ;;  %s7494_s10 = inlined_call_operand.hbm [shape: bf16[128,128], index: 10, kind: input, shape index: {}]   ;;  %s7495_s11 = inlined_call_operand.hbm [shape: f32[1,128], index: 11, kind: input, shape index: {}]   ;;  %s7496_s12 = inlined_call_operand.hbm [shape: bf16[128,128], index: 12, kind: input, shape index: {}]   ;;  %s7497_s13 = inlined_call_operand.hbm [shape: f32[1,128], index: 13, kind: input, shape index: {}]   ;;  %s7498_s14 = inlined_call_operand.hbm [shape: f32[1,128], index: 14, kind: input, shape index: {}]   ;;  %s7499_s15 = inlined_call_operand.hbm [shape: f32[1,128], index: 15, kind: input, shape index: {}]   ;;  %s7500_s16 = inlined_call_operand.hbm [shape: bf16[128,128], index: 16, kind: input, shape index: {}]   ;;  %s7501_s17 = inlined_call_operand.hbm [shape: f32[1,128], index: 17, kind: input, shape index: {}]   ;;  %s7502_s18 = inlined_call_operand.vmem [shape: bf16[128,128], index: 18, kind: input, shape index: {}]   ;;  %s7503_s19 = inlined_call_operand.vmem [shape: f32[1,128], index: 19, kind: input, shape index: {}]   ;;  %s7504_s20 = inlined_call_operand.vmem [shape: f32[1,128], index: 20, kind: input, shape index: {}]   ;;  %s7505_s21 = inlined_call_operand.vmem [shape: f32[1,128], index: 21, kind: input, shape index: {}]   ;;  %s7506_s22 = inlined_call_operand.hbm [shape: bf16[128,128], index: 22, kind: input, shape index: {}]   ;;  %s7507_s23 = inlined_call_operand.hbm [shape: bf16[128,128], index: 23, kind: input, shape index: {}]   ;;  %s7508_s24 = inlined_call_operand.hbm [shape: bf16[128,128], index: 24, kind: input, shape index: {}]   ;;  %s7509_s25 = inlined_call_operand.vmem [shape: f32[1,128], index: 25, kind: input, shape index: {}]   ;;  %s7510_s26 = inlined_call_operand.hbm [shape: bf16[128,128], index: 26, kind: input, shape index: {}]   ;;  %s7511_s27 = inlined_call_operand.vmem [shape: f32[1,128], index: 27, kind: input, shape index: {}]   ;;  %s7512_s28 = inlined_call_operand.hbm [shape: f32[2,16,128], index: 28, kind: output, shape index: {}]  }
   0x1   :  { %7544 = sst [smem:[#allocation43_spill]] %s7484_s0 }
   0x2   :  { %7545 = sst [smem:[#allocation44_spill]] %s7485_s1 }
   0x3   :  { %7546 = sst [smem:[#allocation45_spill]] %s7486_s2 }
   0x4   :  { %7547 = sst [smem:[#allocation46_spill]] %s7487_s3 }
   0x5   :  { %7548 = sst [smem:[#allocation47_spill]] %s7488_s4 }
   0x6   :  { %7549 = sst [smem:[#allocation48_spill]] %s7489_s5 }
   0x7   :  { %7550 = sst [smem:[#allocation49_spill]] %s7490_s6 }
   0x8   :  { %7551 = sst [smem:[#allocation50_spill]] %s7491_s7 }
   0x9   :  { %7552 = sst [smem:[#allocation51_spill]] %s7492_s8 }
   0xa   :  { %7553 = sst [smem:[#allocation52_spill]] %s7493_s9 }
   0xb   :  { %7554 = sst [smem:[#allocation53_spill]] %s7494_s10 }
   0xc   :  { %7555 = sst [smem:[#allocation54_spill]] %s7495_s11 }
   0xd   :  { %7556 = sst [smem:[#allocation55_spill]] %s7496_s12 }
   0xe   :  { %7557 = sst [smem:[#allocation56_spill]] %s7498_s14 }
   0xf   :  { %7558 = sst [smem:[#allocation57_spill]] %s7502_s18 }
  0x10   :  { %7559 = sst [smem:[#allocation58_spill]] %s7503_s19 }
  0x11   :  { %7560 = sst [smem:[#allocation59_spill]] %s7504_s20 }
  0x12   :  { %7561 = sst [smem:[#allocation60_spill]] %s7505_s21 }
  0x13   :  { %7562 = sst [smem:[#allocation61_spill]] %s7509_s25 }
  0x14   :  { %7563 = sst [smem:[#allocation62_spill]] %s7511_s27 }
  0x15   :  { %7564 = sst [smem:[#allocation63_spill]] %s7512_s28 }
  0x16   :  { %33 = vsyncpa [#allocation3], 0 }
  0x17   :  { %35 = vsyncpa [#allocation3 + $0x1], 0 }
  0x18   :  { %36 = vsyncpa [#allocation6], 0 }
  0x19   :  { %37 = vsyncpa [#allocation9], 0 }
  0x1a   :  { %38 = vsyncpa [#allocation12], 0 }
  0x1b   :  { %39 = vsyncpa [#allocation15], 0 }
  0x1c   :  { %40 = vsyncpa [#allocation18], 0 }
  0x1d   :  { %41 = vsyncpa [#allocation21], 0 }
  0x1e   :  { %42 = vsyncpa [#allocation24], 0 }
  0x1f   :  { %43 = vsyncpa [#allocation27], 0 }
  0x20   :  { %44 = vsyncpa [#allocation4], 0 }
  0x21   :  { %46 = vsyncpa [#allocation4 + $0x1], 0  ;;  %s6087_s8 = smov 0   ;;  %s6089_s5 = smov 0  }
  0x22   :  { %s6091_s9 = smov 0   ;;  %s6093_s30 = smov 0  }
  0x23 LB: > { %7565 = sst [smem:[#allocation40_spill]] %s5903_s8  ;;  %s5917_s3 = smov [#allocation5]   ;;  %s5915_s30 = sphi %s6093_s30, %s7633_s30   ;;  %s5911_s9 = sphi %s6091_s9, %s7632_s9   ;;  %s5907_s5 = sphi %s6089_s5, %s7631_s5   ;;  %s5903_s8 = sphi %s6087_s8, %s7630_s8  }
  0x24   : > { %s703_s6 = sshll.u32 %s5917_s3, 4  ;;  %s6108_s10 = sadd.s32 4294967295, %s5915_s30   ;;  %s6113_s6 = int_to_ptr.vmem [resolvable:$true] %s703_s6 }
  0x25   : > { %7566 = sst [smem:[#allocation41_spill]] %s6108_s10  ;;  %p4199_p0 = scmp.ge.s32.totalorder %s5915_s30, 1 }
  0x26   : > { %p7529_p1 = scmp.eq.s32.totalorder %s6108_s10, 0  ;;  %p691_p2 = scmp.lt.s32.totalorder %s5915_s30, 3 }
  0x27   : > { %s5918_s11 = smov [#allocation8]   ;;  %s5919_s7 = smov [#allocation11]  }
  0x28   : > { %p6115_p3 = pnand %p4199_p0, %p691_p2  ;;  %s736_s29 = sshll.u32 %s5918_s11, 4  ;;  %s6128_s29 = int_to_ptr.vmem [resolvable:$true] %s736_s29 }
  0x29   : > { %s757_s12 = sshll.u32 %s5919_s7, 4  ;;  %s7570_s3 = sld [smem:[#allocation47_spill]]  ;;  %s6130_s12 = int_to_ptr.vmem [resolvable:$true] %s757_s12 }
  0x2a   : > { %s7567_s0 = scalar_select %p6115_p3, 1, 0 }
  0x2b   : > { %p5079_p5 = pneg %p6115_p3 }
  0x2c   : > { %7568 = sst [smem:[#allocation42_spill]] %s7567_s0 }
  0x2d   : > { %p6124_p6 = pnand %p5079_p5, %p7529_p1 }
  0x2f   : > { %s5339_s28 = scalar_lea.hbm %s7570_s3, 1024  ;;  %p6140_p8 = pneg %p6124_p6 }
  0x30   : > { %p5340_p7 = scmp.ne.s32.totalorder %s7570_s3, %s5339_s28  ;;  %p5346_p11 = scmp.lt.u32.totalorder %s5339_s28, %s7570_s3 }
  0x32   : > { %p5342_p9 = pnand %p6140_p8, %p5340_p7 }
  0x34   : > { %p5343_p10 = pneg %p5342_p9 }
  0x36   : > { %p5348_p12 = pnand %p5346_p11, %p5343_p10 }
  0x38   : > { %5351 = shalt.err (!%p5348_p12)
}
  0x39   : > { %s5352_s25 = scalar_lea.vmem %s6113_s6, 1024  ;;  %p5360_p5 = scmp.lt.s32.totalorder %s6113_s6, %s6113_s6 }
  0x3a   : > { %p5353_p13 = scmp.ne.s32.totalorder %s6113_s6, %s5352_s25  ;;  %p5361_p4 = scmp.lt.s32.totalorder %s5352_s25, %s5352_s25 }
  0x3c   : > { %p5355_p0 = pnand %p5353_p13, %p6140_p8  ;;  %p5362_p7 = por %p5361_p4, %p5360_p5 }
  0x3e   : > { %p5356_p2 = pneg %p5355_p0 }
  0x40   : > { %p5363_p9 = pnand %p5362_p7, %p5356_p2 }
  0x42   : > { %5366 = shalt.err (!%p5363_p9)
}
  0x43   : > { %s7532_s27 = smov 64   ;;  %s7534_s21 = smov 4  }
  0x44   : > { %5082 = dma.hbm_to_vmem [thread:$0]  (!%p6124_p6), %s7570_s3, 1024, %s6113_s6, [#allocation6], %s7532_s27, %s7532_s27, %s7534_s21  }
  0x45   : > { %s7572_s20 = sld [smem:[#allocation51_spill]] }
  0x4b   : > { %s5367_s25 = scalar_lea.hbm %s7572_s20, 16 }
  0x4c   : > { %p5368_p4 = scmp.ne.s32.totalorder %s7572_s20, %s5367_s25  ;;  %p5374_p12 = scmp.lt.u32.totalorder %s5367_s25, %s7572_s20 }
  0x4e   : > { %p5370_p10 = pnand %p5368_p4, %p6140_p8 }
  0x50   : > { %p5371_p11 = pneg %p5370_p10 }
  0x52   : > { %p5376_p13 = pnand %p5374_p12, %p5371_p11 }
  0x54   : > { %5379 = shalt.err (!%p5376_p13)
}
  0x55   : > { %s5380_s6 = scalar_lea.vmem %s6128_s29, 16  ;;  %s5387_s18 = scalar_lea.vmem %s6128_s29, 32 }
  0x56   : > { %p5381_p0 = scmp.ne.s32.totalorder %s6128_s29, %s5380_s6  ;;  %p5388_p7 = scmp.lt.s32.totalorder %s6128_s29, %s6128_s29 }
  0x57   : > { %p5389_p9 = scmp.lt.s32.totalorder %s5387_s18, %s5380_s6 }
  0x58   : > { %p5383_p2 = pnand %p5381_p0, %p6140_p8 }
  0x59   : > { %p5390_p4 = por %p5389_p9, %p5388_p7 }
  0x5a   : > { %p5384_p5 = pneg %p5383_p2 }
  0x5c   : > { %p5391_p10 = pnand %p5390_p4, %p5384_p5 }
  0x5e   : > { %5394 = shalt.err (!%p5391_p10)
}
  0x5f   : > { %5088 = dma.hbm_to_vmem [thread:$0]  (!%p6124_p6), %s7572_s20, 16, %s6128_s29, [#allocation9]  }
  0x60   : > { %s7573_s1 = sld [smem:[#allocation53_spill]] }
  0x66   : > { %s5395_s4 = scalar_lea.hbm %s7573_s1, 1024 }
  0x67   : > { %p5396_p11 = scmp.ne.s32.totalorder %s7573_s1, %s5395_s4  ;;  %p5402_p0 = scmp.lt.u32.totalorder %s5395_s4, %s7573_s1 }
  0x69   : > { %p5398_p12 = pnand %p5396_p11, %p6140_p8 }
  0x6b   : > { %p5399_p13 = pneg %p5398_p12 }
  0x6d   : > { %p5404_p2 = pnand %p5402_p0, %p5399_p13 }
  0x6f   : > { %5407 = shalt.err (!%p5404_p2)
}
  0x70   : > { %s5408_s29 = scalar_lea.vmem %s6130_s12, 1024  ;;  %p5416_p4 = scmp.lt.s32.totalorder %s6130_s12, %s6130_s12 }
  0x71   : > { %p5409_p5 = scmp.ne.s32.totalorder %s6130_s12, %s5408_s29  ;;  %p5417_p10 = scmp.lt.s32.totalorder %s5408_s29, %s5408_s29 }
  0x73   : > { %p5411_p7 = pnand %p5409_p5, %p6140_p8  ;;  %p5418_p11 = por %p5417_p10, %p5416_p4 }
  0x75   : > { %p5412_p9 = pneg %p5411_p7 }
  0x77   : > { %p5419_p12 = pnand %p5418_p11, %p5412_p9 }
  0x79   : > { %5422 = shalt.err (!%p5419_p12)
}
  0x7a   : > { %5094 = dma.hbm_to_vmem [thread:$0]  (!%p6124_p6), %s7573_s1, 1024, %s6130_s12, [#allocation12], %s7532_s27, %s7532_s27, %s7534_s21  }
  0x7b   : > { %s5922_s0 = smov [#allocation14]   ;;  %s5923_s4 = smov [#allocation17]  }
  0x7c   : > { %s781_s28 = sshll.u32 %s5922_s0, 4  ;;  %s806_s7 = sshll.u32 %s5923_s4, 4  ;;  %s782_s28 = int_to_ptr.vmem [resolvable:$true] %s781_s28  ;;  %s807_s7 = int_to_ptr.vmem [resolvable:$true] %s806_s7 }
  0x7d   : > { %s7574_s18 = sld [smem:[#allocation55_spill]] }
  0x83   : > { %s5423_s29 = scalar_lea.hbm %s7574_s18, 1024 }
  0x84   : > { %p5424_p13 = scmp.ne.s32.totalorder %s7574_s18, %s5423_s29  ;;  %p5430_p5 = scmp.lt.u32.totalorder %s5423_s29, %s7574_s18 }
  0x86   : > { %p5426_p0 = pnand %p5424_p13, %p6140_p8 }
  0x88   : > { %p5427_p2 = pneg %p5426_p0 }
  0x8a   : > { %p5432_p7 = pnand %p5430_p5, %p5427_p2 }
  0x8c   : > { %5435 = shalt.err (!%p5432_p7)
}
  0x8d   : > { %s5436_s12 = scalar_lea.vmem %s782_s28, 1024  ;;  %p5444_p11 = scmp.lt.s32.totalorder %s782_s28, %s782_s28 }
  0x8e   : > { %p5437_p9 = scmp.ne.s32.totalorder %s782_s28, %s5436_s12  ;;  %p5445_p12 = scmp.lt.s32.totalorder %s5436_s12, %s5436_s12 }
  0x90   : > { %p5439_p4 = pnand %p5437_p9, %p6140_p8  ;;  %p5446_p1 = por %p5445_p12, %p5444_p11 }
  0x92   : > { %p5440_p10 = pneg %p5439_p4 }
  0x94   : > { %p5447_p3 = pnand %p5446_p1, %p5440_p10 }
  0x96   : > { %5450 = shalt.err (!%p5447_p3)
}
  0x97   : > { %5100 = dma.hbm_to_vmem [thread:$0]  (!%p6124_p6), %s7574_s18, 1024, %s782_s28, [#allocation15], %s7532_s27, %s7532_s27, %s7534_s21  }
  0x98   : > { %s7575_s14 = sld [smem:[#allocation56_spill]] }
  0x9e   : > { %s5451_s0 = scalar_lea.hbm %s7575_s14, 16 }
  0x9f   : > { %p5452_p1 = scmp.ne.s32.totalorder %s7575_s14, %s5451_s0  ;;  %p5458_p0 = scmp.lt.u32.totalorder %s5451_s0, %s7575_s14 }
  0xa1   : > { %p5454_p3 = pnand %p5452_p1, %p6140_p8 }
  0xa3   : > { %p5455_p13 = pneg %p5454_p3 }
  0xa5   : > { %p5460_p2 = pnand %p5458_p0, %p5455_p13 }
  0xa7   : > { %5463 = shalt.err (!%p5460_p2)
}
  0xa8   : > { %s5464_s19 = scalar_lea.vmem %s807_s7, 16  ;;  %s5471_s28 = scalar_lea.vmem %s807_s7, 32 }
  0xa9   : > { %p5465_p5 = scmp.ne.s32.totalorder %s807_s7, %s5464_s19  ;;  %p5472_p4 = scmp.lt.s32.totalorder %s807_s7, %s807_s7 }
  0xaa   : > { %p5473_p10 = scmp.lt.s32.totalorder %s5471_s28, %s5464_s19 }
  0xab   : > { %p5467_p7 = pnand %p5465_p5, %p6140_p8 }
  0xac   : > { %p5474_p11 = por %p5473_p10, %p5472_p4 }
  0xad   : > { %p5468_p9 = pneg %p5467_p7 }
  0xaf   : > { %p5475_p12 = pnand %p5474_p11, %p5468_p9 }
  0xb1   : > { %5478 = shalt.err (!%p5475_p12)
}
  0xb2   : > { %5106 = dma.hbm_to_vmem [thread:$0]  (!%p6124_p6), %s7575_s14, 16, %s807_s7, [#allocation18]  }
  0xb3   : > { %s5924_s8 = smov [#allocation20]   ;;  %s5925_s10 = smov [#allocation23]  }
  0xb4   : > { %s827_s3 = sshll.u32 %s5924_s8, 4  ;;  %s863_s0 = sshll.u32 %s5925_s10, 4  ;;  %s828_s3 = int_to_ptr.vmem [resolvable:$true] %s827_s3  ;;  %s864_s0 = int_to_ptr.vmem [resolvable:$true] %s863_s0 }
  0xb5   : > { %s5479_s6 = scalar_lea.hbm %s7500_s16, 1024 }
  0xb6   : > { %p5480_p1 = scmp.ne.s32.totalorder %s7500_s16, %s5479_s6  ;;  %p5486_p0 = scmp.lt.u32.totalorder %s5479_s6, %s7500_s16 }
  0xb8   : > { %p5482_p3 = pnand %p5480_p1, %p6140_p8 }
  0xba   : > { %p5483_p13 = pneg %p5482_p3 }
  0xbc   : > { %p5488_p2 = pnand %p5486_p0, %p5483_p13 }
  0xbe   : > { %5491 = shalt.err (!%p5488_p2)
}
  0xbf   : > { %s5492_s7 = scalar_lea.vmem %s828_s3, 1024  ;;  %p5500_p4 = scmp.lt.s32.totalorder %s828_s3, %s828_s3 }
  0xc0   : > { %p5493_p5 = scmp.ne.s32.totalorder %s828_s3, %s5492_s7  ;;  %p5501_p10 = scmp.lt.s32.totalorder %s5492_s7, %s5492_s7 }
  0xc2   : > { %p5495_p7 = pnand %p5493_p5, %p6140_p8  ;;  %p5502_p11 = por %p5501_p10, %p5500_p4 }
  0xc4   : > { %p5496_p9 = pneg %p5495_p7 }
  0xc6   : > { %p5503_p12 = pnand %p5502_p11, %p5496_p9 }
  0xc8   : > { %5506 = shalt.err (!%p5503_p12)
}
  0xc9   : > { %5112 = dma.hbm_to_vmem [thread:$0]  (!%p6124_p6), %s7500_s16, 1024, %s828_s3, [#allocation21], %s7532_s27, %s7532_s27, %s7534_s21  }
  0xca   : > { %s5507_s25 = scalar_lea.hbm %s7506_s22, 1024 }
  0xcb   : > { %p5508_p1 = scmp.ne.s32.totalorder %s7506_s22, %s5507_s25  ;;  %p5514_p0 = scmp.lt.u32.totalorder %s5507_s25, %s7506_s22 }
  0xcd   : > { %p5510_p3 = pnand %p5508_p1, %p6140_p8 }
  0xcf   : > { %p5511_p13 = pneg %p5510_p3 }
  0xd1   : > { %p5516_p2 = pnand %p5514_p0, %p5511_p13 }
  0xd3   : > { %5519 = shalt.err (!%p5516_p2)
}
  0xd4   : > { %s5520_s12 = scalar_lea.vmem %s864_s0, 1024  ;;  %p5528_p4 = scmp.lt.s32.totalorder %s864_s0, %s864_s0 }
  0xd5   : > { %p5521_p5 = scmp.ne.s32.totalorder %s864_s0, %s5520_s12  ;;  %p5529_p10 = scmp.lt.s32.totalorder %s5520_s12, %s5520_s12 }
  0xd7   : > { %p5523_p7 = pnand %p5521_p5, %p6140_p8  ;;  %p5530_p11 = por %p5529_p10, %p5528_p4 }
  0xd9   : > { %p5524_p9 = pneg %p5523_p7 }
  0xdb   : > { %p5531_p12 = pnand %p5530_p11, %p5524_p9 }
  0xdd   : > { %5534 = shalt.err (!%p5531_p12)
}
  0xde   : > { %5118 = dma.hbm_to_vmem [thread:$0]  (!%p6124_p6), %s7506_s22, 1024, %s864_s0, [#allocation24], %s7532_s27, %s7532_s27, %s7534_s21  }
  0xdf   : > { %s5926_s20 = smov [#allocation26]   ;;  %s5927_s10 = smov [#allocation7]  }
  0xe0   : > { %s889_s8 = sshll.u32 %s5926_s20, 4  ;;  %s719_s4 = sshll.u32 %s5927_s10, 4  ;;  %s890_s8 = int_to_ptr.vmem [resolvable:$true] %s889_s8  ;;  %s720_s4 = int_to_ptr.vmem [resolvable:$true] %s719_s4 }
  0xe1   : > { %s5535_s29 = scalar_lea.hbm %s7508_s24, 1024 }
  0xe2   : > { %p5536_p1 = scmp.ne.s32.totalorder %s7508_s24, %s5535_s29  ;;  %p5542_p0 = scmp.lt.u32.totalorder %s5535_s29, %s7508_s24 }
  0xe4   : > { %p5538_p3 = pnand %p5536_p1, %p6140_p8 }
  0xe6   : > { %p5539_p13 = pneg %p5538_p3 }
  0xe8   : > { %p5544_p2 = pnand %p5542_p0, %p5539_p13 }
  0xea   : > { %5547 = shalt.err (!%p5544_p2)
}
  0xeb   : > { %s5548_s0 = scalar_lea.vmem %s890_s8, 1024  ;;  %p5556_p4 = scmp.lt.s32.totalorder %s890_s8, %s890_s8 }
  0xec   : > { %p5549_p5 = scmp.ne.s32.totalorder %s890_s8, %s5548_s0  ;;  %p5557_p10 = scmp.lt.s32.totalorder %s5548_s0, %s5548_s0 }
  0xee   : > { %p5551_p7 = pnand %p5549_p5, %p6140_p8  ;;  %p5558_p11 = por %p5557_p10, %p5556_p4 }
  0xf0   : > { %p5552_p9 = pneg %p5551_p7 }
  0xf2   : > { %p5559_p12 = pnand %p5558_p11, %p5552_p9 }
  0xf4   : > { %5562 = shalt.err (!%p5559_p12)
}
  0xf5   : > { %5124 = dma.hbm_to_vmem [thread:$0]  (!%p6124_p6), %s7508_s24, 1024, %s890_s8, [#allocation27], %s7532_s27, %s7532_s27, %s7534_s21  }
  0xf6   : > { %s7576_s6 = sld [smem:[#allocation49_spill]] }
  0xfc   : > { %s5563_s29 = scalar_lea.hbm %s7576_s6, 1024 }
  0xfd   : > { %p5564_p1 = scmp.ne.s32.totalorder %s7576_s6, %s5563_s29  ;;  %p5570_p0 = scmp.lt.u32.totalorder %s5563_s29, %s7576_s6 }
  0xff   : > { %p5566_p3 = pnand %p5564_p1, %p6140_p8 }
 0x101   : > { %p5567_p13 = pneg %p5566_p3 }
 0x103   : > { %p5572_p2 = pnand %p5570_p0, %p5567_p13 }
 0x105   : > { %5575 = shalt.err (!%p5572_p2)
}
 0x106   : > { %s5576_s0 = scalar_lea.vmem %s720_s4, 1024  ;;  %p5584_p4 = scmp.lt.s32.totalorder %s720_s4, %s720_s4 }
 0x107   : > { %p5577_p5 = scmp.ne.s32.totalorder %s720_s4, %s5576_s0  ;;  %p5585_p10 = scmp.lt.s32.totalorder %s5576_s0, %s5576_s0 }
 0x109   : > { %p5579_p7 = pnand %p5577_p5, %p6140_p8  ;;  %p5586_p11 = por %p5585_p10, %p5584_p4 }
 0x10b   : > { %p5580_p9 = pneg %p5579_p7 }
 0x10d   : > { %p5587_p12 = pnand %p5586_p11, %p5580_p9 }
 0x10f   : > { %5590 = shalt.err (!%p5587_p12)
}
 0x110   : > { %5085 = dma.hbm_to_vmem [thread:$0]  (!%p6124_p6), %s7576_s6, 1024, %s720_s4, [#allocation6], %s7532_s27, %s7532_s27, %s7534_s21  }
 0x111   : > { %s5928_s20 = smov [#allocation10]   ;;  %s5929_s25 = smov [#allocation13]  }
 0x112   : > { %s747_s10 = sshll.u32 %s5928_s20, 4  ;;  %s771_s29 = sshll.u32 %s5929_s25, 4  ;;  %s748_s10 = int_to_ptr.vmem [resolvable:$true] %s747_s10  ;;  %s772_s29 = int_to_ptr.vmem [resolvable:$true] %s771_s29 }
 0x113   : > { %s7577_s12 = sld [smem:[#allocation52_spill]] }
 0x119   : > { %s5591_s3 = scalar_lea.hbm %s7577_s12, 16 }
 0x11a   : > { %p5592_p1 = scmp.ne.s32.totalorder %s7577_s12, %s5591_s3  ;;  %p5598_p0 = scmp.lt.u32.totalorder %s5591_s3, %s7577_s12 }
 0x11c   : > { %p5594_p3 = pnand %p5592_p1, %p6140_p8 }
 0x11e   : > { %p5595_p13 = pneg %p5594_p3 }
 0x120   : > { %p5600_p2 = pnand %p5598_p0, %p5595_p13 }
 0x122   : > { %5603 = shalt.err (!%p5600_p2)
}
 0x123   : > { %s5604_s4 = scalar_lea.vmem %s748_s10, 16  ;;  %s5611_s7 = scalar_lea.vmem %s748_s10, 32 }
 0x124   : > { %p5605_p5 = scmp.ne.s32.totalorder %s748_s10, %s5604_s4  ;;  %p5612_p4 = scmp.lt.s32.totalorder %s748_s10, %s748_s10 }
 0x125   : > { %p5613_p10 = scmp.lt.s32.totalorder %s5611_s7, %s5604_s4 }
 0x126   : > { %p5607_p7 = pnand %p5605_p5, %p6140_p8 }
 0x127   : > { %p5614_p11 = por %p5613_p10, %p5612_p4 }
 0x128   : > { %p5608_p9 = pneg %p5607_p7 }
 0x12a   : > { %p5615_p12 = pnand %p5614_p11, %p5608_p9 }
 0x12c   : > { %5618 = shalt.err (!%p5615_p12)
}
 0x12d   : > { %5091 = dma.hbm_to_vmem [thread:$0]  (!%p6124_p6), %s7577_s12, 16, %s748_s10, [#allocation9]  }
 0x12e   : > { %s7578_s19 = sld [smem:[#allocation54_spill]] }
 0x134   : > { %s5619_s28 = scalar_lea.hbm %s7578_s19, 16 }
 0x135   : > { %p5620_p1 = scmp.ne.s32.totalorder %s7578_s19, %s5619_s28  ;;  %p5626_p0 = scmp.lt.u32.totalorder %s5619_s28, %s7578_s19 }
 0x137   : > { %p5622_p3 = pnand %p5620_p1, %p6140_p8 }
 0x139   : > { %p5623_p13 = pneg %p5622_p3 }
 0x13b   : > { %p5628_p2 = pnand %p5626_p0, %p5623_p13 }
 0x13d   : > { %5631 = shalt.err (!%p5628_p2)
}
 0x13e   : > { %s5632_s7 = scalar_lea.vmem %s772_s29, 16  ;;  %s5639_s10 = scalar_lea.vmem %s772_s29, 32 }
 0x13f   : > { %p5633_p5 = scmp.ne.s32.totalorder %s772_s29, %s5632_s7  ;;  %p5640_p4 = scmp.lt.s32.totalorder %s772_s29, %s772_s29 }
 0x140   : > { %p5641_p10 = scmp.lt.s32.totalorder %s5639_s10, %s5632_s7 }
 0x141   : > { %p5635_p7 = pnand %p5633_p5, %p6140_p8 }
 0x142   : > { %p5642_p11 = por %p5641_p10, %p5640_p4 }
 0x143   : > { %p5636_p9 = pneg %p5635_p7 }
 0x145   : > { %p5643_p12 = pnand %p5642_p11, %p5636_p9 }
 0x147   : > { %5646 = shalt.err (!%p5643_p12)
}
 0x148   : > { %5097 = dma.hbm_to_vmem [thread:$0]  (!%p6124_p6), %s7578_s19, 16, %s772_s29, [#allocation12]  }
 0x149   : > { %s5930_s14 = smov [#allocation16]   ;;  %s5931_s28 = smov [#allocation19]  }
 0x14a   : > { %s795_s25 = sshll.u32 %s5930_s14, 4  ;;  %s817_s3 = sshll.u32 %s5931_s28, 4  ;;  %s796_s25 = int_to_ptr.vmem [resolvable:$true] %s795_s25  ;;  %s818_s3 = int_to_ptr.vmem [resolvable:$true] %s817_s3 }
 0x14b   : > { %s5647_s4 = scalar_lea.hbm %s7497_s13, 16 }
 0x14c   : > { %p5648_p1 = scmp.ne.s32.totalorder %s7497_s13, %s5647_s4  ;;  %p5654_p0 = scmp.lt.u32.totalorder %s5647_s4, %s7497_s13 }
 0x14e   : > { %p5650_p3 = pnand %p5648_p1, %p6140_p8 }
 0x150   : > { %p5651_p13 = pneg %p5650_p3 }
 0x152   : > { %p5656_p2 = pnand %p5654_p0, %p5651_p13 }
 0x154   : > { %5659 = shalt.err (!%p5656_p2)
}
 0x155   : > { %s5660_s29 = scalar_lea.vmem %s796_s25, 16  ;;  %s5667_s20 = scalar_lea.vmem %s796_s25, 32 }
 0x156   : > { %p5661_p5 = scmp.ne.s32.totalorder %s796_s25, %s5660_s29  ;;  %p5668_p4 = scmp.lt.s32.totalorder %s796_s25, %s796_s25 }
 0x157   : > { %p5669_p10 = scmp.lt.s32.totalorder %s5667_s20, %s5660_s29 }
 0x158   : > { %p5663_p7 = pnand %p5661_p5, %p6140_p8 }
 0x159   : > { %p5670_p11 = por %p5669_p10, %p5668_p4 }
 0x15a   : > { %p5664_p9 = pneg %p5663_p7 }
 0x15c   : > { %p5671_p12 = pnand %p5670_p11, %p5664_p9 }
 0x15e   : > { %5674 = shalt.err (!%p5671_p12)
}
 0x15f   : > { %5103 = dma.hbm_to_vmem [thread:$0]  (!%p6124_p6), %s7497_s13, 16, %s796_s25, [#allocation15]  }
 0x160   : > { %s5675_s8 = scalar_lea.hbm %s7499_s15, 16 }
 0x161   : > { %p5676_p1 = scmp.ne.s32.totalorder %s7499_s15, %s5675_s8  ;;  %p5682_p0 = scmp.lt.u32.totalorder %s5675_s8, %s7499_s15 }
 0x163   : > { %p5678_p3 = pnand %p5676_p1, %p6140_p8 }
 0x165   : > { %p5679_p13 = pneg %p5678_p3 }
 0x167   : > { %p5684_p2 = pnand %p5682_p0, %p5679_p13 }
 0x169   : > { %5687 = shalt.err (!%p5684_p2)
}
 0x16a   : > { %s5688_s29 = scalar_lea.vmem %s818_s3, 16  ;;  %s5695_s25 = scalar_lea.vmem %s818_s3, 32 }
 0x16b   : > { %p5689_p5 = scmp.ne.s32.totalorder %s818_s3, %s5688_s29  ;;  %p5696_p4 = scmp.lt.s32.totalorder %s818_s3, %s818_s3 }
 0x16c   : > { %p5697_p10 = scmp.lt.s32.totalorder %s5695_s25, %s5688_s29 }
 0x16d   : > { %p5691_p7 = pnand %p5689_p5, %p6140_p8 }
 0x16e   : > { %p5698_p11 = por %p5697_p10, %p5696_p4 }
 0x16f   : > { %p5692_p9 = pneg %p5691_p7 }
 0x171   : > { %p5699_p12 = pnand %p5698_p11, %p5692_p9 }
 0x173   : > { %5702 = shalt.err (!%p5699_p12)
}
 0x174   : > { %5109 = dma.hbm_to_vmem [thread:$0]  (!%p6124_p6), %s7499_s15, 16, %s818_s3, [#allocation18]  }
 0x175   : > { %s5932_s28 = smov [#allocation22]   ;;  %s5933_s0 = smov [#allocation25]  }
 0x176   : > { %s841_s27 = sshll.u32 %s5932_s28, 4  ;;  %s876_s8 = sshll.u32 %s5933_s0, 4  ;;  %s842_s27 = int_to_ptr.vmem [resolvable:$true] %s841_s27  ;;  %s877_s8 = int_to_ptr.vmem [resolvable:$true] %s876_s8 }
 0x177   : > { %s5703_s10 = scalar_lea.hbm %s7501_s17, 16 }
 0x178   : > { %p5704_p1 = scmp.ne.s32.totalorder %s7501_s17, %s5703_s10  ;;  %p5710_p0 = scmp.lt.u32.totalorder %s5703_s10, %s7501_s17 }
 0x17a   : > { %p5706_p3 = pnand %p5704_p1, %p6140_p8 }
 0x17c   : > { %p5707_p13 = pneg %p5706_p3 }
 0x17e   : > { %p5712_p2 = pnand %p5710_p0, %p5707_p13 }
 0x180   : > { %5715 = shalt.err (!%p5712_p2)
}
 0x181   : > { %s5716_s3 = scalar_lea.vmem %s842_s27, 16  ;;  %s5723_s14 = scalar_lea.vmem %s842_s27, 32 }
 0x182   : > { %p5717_p5 = scmp.ne.s32.totalorder %s842_s27, %s5716_s3  ;;  %p5724_p4 = scmp.lt.s32.totalorder %s842_s27, %s842_s27 }
 0x183   : > { %p5725_p10 = scmp.lt.s32.totalorder %s5723_s14, %s5716_s3 }
 0x184   : > { %p5719_p7 = pnand %p5717_p5, %p6140_p8 }
 0x185   : > { %p5726_p11 = por %p5725_p10, %p5724_p4 }
 0x186   : > { %p5720_p9 = pneg %p5719_p7 }
 0x188   : > { %p5727_p12 = pnand %p5726_p11, %p5720_p9 }
 0x18a   : > { %5730 = shalt.err (!%p5727_p12)
}
 0x18b   : > { %5115 = dma.hbm_to_vmem [thread:$0]  (!%p6124_p6), %s7501_s17, 16, %s842_s27, [#allocation21]  }
 0x18c   : > { %s5731_s10 = scalar_lea.hbm %s7507_s23, 1024 }
 0x18d   : > { %p5732_p1 = scmp.ne.s32.totalorder %s7507_s23, %s5731_s10  ;;  %p5738_p0 = scmp.lt.u32.totalorder %s5731_s10, %s7507_s23 }
 0x18f   : > { %p5734_p3 = pnand %p5732_p1, %p6140_p8 }
 0x191   : > { %p5735_p13 = pneg %p5734_p3 }
 0x193   : > { %p5740_p2 = pnand %p5738_p0, %p5735_p13 }
 0x195   : > { %5743 = shalt.err (!%p5740_p2)
}
 0x196   : > { %s5744_s3 = scalar_lea.vmem %s877_s8, 1024  ;;  %p5752_p4 = scmp.lt.s32.totalorder %s877_s8, %s877_s8 }
 0x197   : > { %p5745_p5 = scmp.ne.s32.totalorder %s877_s8, %s5744_s3  ;;  %p5753_p10 = scmp.lt.s32.totalorder %s5744_s3, %s5744_s3 }
 0x199   : > { %p5747_p7 = pnand %p5745_p5, %p6140_p8  ;;  %p5754_p11 = por %p5753_p10, %p5752_p4 }
 0x19b   : > { %p5748_p9 = pneg %p5747_p7 }
 0x19d   : > { %p5755_p12 = pnand %p5754_p11, %p5748_p9 }
 0x19f   : > { %5758 = shalt.err (!%p5755_p12)
}
 0x1a0   : > { %s7579_s27 = smov 64   ;;  %s5934_s0 = smov [#allocation28]  }
 0x1a1   : > { %5121 = dma.hbm_to_vmem [thread:$0]  (!%p6124_p6), %s7507_s23, 1024, %s877_s8, [#allocation24], %s7579_s27, %s7579_s27, %s7534_s21  }
 0x1a2   : > { %s905_s4 = sshll.u32 %s5934_s0, 4  ;;  %s5759_s1 = scalar_lea.hbm %s7510_s26, 1024  ;;  %s906_s4 = int_to_ptr.vmem [resolvable:$true] %s905_s4 }
 0x1a3   : > { %p5760_p1 = scmp.ne.s32.totalorder %s7510_s26, %s5759_s1  ;;  %p5766_p0 = scmp.lt.u32.totalorder %s5759_s1, %s7510_s26 }
 0x1a5   : > { %p5762_p3 = pnand %p5760_p1, %p6140_p8 }
 0x1a7   : > { %p5763_p13 = pneg %p5762_p3 }
 0x1a9   : > { %p5768_p2 = pnand %p5766_p0, %p5763_p13 }
 0x1ab   : > { %5771 = shalt.err (!%p5768_p2)
}
 0x1ac   : > { %s5772_s8 = scalar_lea.vmem %s906_s4, 1024  ;;  %p5780_p4 = scmp.lt.s32.totalorder %s906_s4, %s906_s4 }
 0x1ad   : > { %p5773_p5 = scmp.ne.s32.totalorder %s906_s4, %s5772_s8  ;;  %p5781_p10 = scmp.lt.s32.totalorder %s5772_s8, %s5772_s8 }
 0x1af   : > { %p5775_p7 = pnand %p5773_p5, %p6140_p8  ;;  %p5782_p11 = por %p5781_p10, %p5780_p4 }
 0x1b1   : > { %p5776_p9 = pneg %p5775_p7 }
 0x1b3   : > { %p5783_p12 = pnand %p5782_p11, %p5776_p9 }
 0x1b5   : > { %5786 = shalt.err (!%p5783_p12)
}
 0x1b6   : > { %s7580_s11 = sld [smem:[#allocation40_spill]]  ;;  %s7581_s0 = sld [smem:[#allocation41_spill]] }
 0x1b7   : > { %5127 = dma.hbm_to_vmem [thread:$0]  (!%p6124_p6), %s7510_s26, 1024, %s906_s4, [#allocation27], %s7579_s27, %s7579_s27, %s7534_s21  }
 0x1b8   : > { %s4198_s2 = sadd.s32 4294967294, %s5915_s30   ;;  %s6471_s7 = sadd.s32 1, %s5915_s30  }
 0x1b9   : > { %s108_s10 = ssub.s32 %s5915_s30, %s6471_s7  ;;  %s111_s1 = sadd.s32 1, %s5911_s9 }
 0x1ba   : > { %p109_p8 = scmp.eq.s32.totalorder %s108_s10, 0  ;;  %p118_p1 = scmp.ne.s32.totalorder %s5911_s9, %s5907_s5 }
 0x1bb   : > { %p119_p3 = scmp.eq.s32.totalorder %s5915_s30, 0  ;;  %p684_p7 = scmp.eq.s32.totalorder %s4198_s2, 1 }
 0x1bc   : > { %p124_p13 = scmp.ne.s32.totalorder %s5907_s5, %s7580_s11  ;;  %p7583_p2 = scmp.eq.s32.totalorder %s7581_s0, 0 }
 0x1bd   : > { %s6482_s29 = scalar_select %p109_p8, %s5911_s9, %s111_s1  }
 0x1be   : > { %p6484_p0 = por %p119_p3, %p118_p1  ;;  %p6490_p6 = por %p7583_p2, %p124_p13 }
 0x1bf   : > { %p678_p5 = scmp.eq.s32.totalorder %s7581_s0, 1  ;;  %p5152_p9 = scmp.lt.s32.totalorder %s5915_s30, 2 }
 0x1c0   : > { %s938_s20 = sand.u32 1, %s5911_s9   ;;  %p6501_p10 = por %p684_p7, %p124_p13 }
 0x1c1   : > { %p6497_p4 = por %p678_p5, %p118_p1  ;;  %s4217_s14 = sshll.u32 %s938_s20, 3 }
 0x1c2   : > { %s7586_s8 = scalar_select %p6501_p10, 1, 0 }
 0x1c3   : > { %s7585_s3 = scalar_select %p6497_p4, 1, 0 }
 0x1c4   : > { %s4361_s28 = sshll.u32 %s5915_s30, 7  ;;  %s7587_s1 = sld [smem:[#allocation45_spill]] }
 0x1c5   : > { %s942_s0 = scalar_lea.vmem [#allocation2], %s4217_s14  ;;  %p6515_p11 = pnand %p5152_p9, %p6484_p0 }
 0x1c6   : > { %s949_s2 = sshll.u32 %s942_s0, 4  ;;  %s6519_s12 = scalar_lea.sflag [#allocation3], %s938_s20  ;;  %s6511_s2 = int_to_ptr.vmem [resolvable:$true] %s949_s2 }
 0x1c7   : > { %p5789_p8 = pneg %p6515_p11 }
 0x1ca   : > { %s6509_s21 = scalar_lea.hbm %s7587_s1, %s4361_s28  ;;  %s5792_s25 = scalar_lea.hbm %s7587_s1, 256 }
 0x1cb   : > { %s5787_s11 = scalar_lea.hbm %s6509_s21, 128  ;;  %p5793_p13 = scmp.lt.u32.totalorder %s6509_s21, %s7587_s1 }
 0x1cc   : > { %p5788_p12 = scmp.ne.s32.totalorder %s6509_s21, %s5787_s11  ;;  %p5794_p0 = scmp.lt.u32.totalorder %s5792_s25, %s5787_s11 }
 0x1cd   : > { %p5796_p5 = scmp.lt.u32.totalorder %s5787_s11, %s6509_s21 }
 0x1ce   : > { %p5790_p1 = pnand %p5789_p8, %p5788_p12  ;;  %p5795_p2 = por %p5794_p0, %p5793_p13 }
 0x1d0   : > { %p5791_p3 = pneg %p5790_p1  ;;  %p5797_p7 = por %p5796_p5, %p5795_p2 }
 0x1d2   : > { %p5798_p9 = pnand %p5797_p7, %p5791_p3 }
 0x1d4   : > { %5801 = shalt.err (!%p5798_p9)
}
 0x1d5   : > { %s5802_s20 = scalar_lea.vmem %s6511_s2, 128  ;;  %s5935_s14 = smov [#allocation2]  }
 0x1d6   : > { %p5803_p12 = scmp.ne.s32.totalorder %s6511_s2, %s5802_s20  ;;  %s5807_s28 = sshll.u32 %s5935_s14, 4  ;;  %s5808_s28 = int_to_ptr.vmem [resolvable:$false] %s5807_s28 }
 0x1d7   : > { %s5809_s10 = scalar_lea.vmem %s5808_s28, 256  ;;  %p5810_p4 = scmp.lt.s32.totalorder %s6511_s2, %s5808_s28 }
 0x1d8   : > { %p5805_p1 = pnand %p5803_p12, %p5789_p8  ;;  %p5811_p13 = scmp.lt.s32.totalorder %s5809_s10, %s5802_s20 }
 0x1da   : > { %p5806_p10 = pneg %p5805_p1  ;;  %p5812_p0 = por %p5811_p13, %p5810_p4 }
 0x1dc   : > { %p5813_p2 = pnand %p5812_p0, %p5806_p10 }
 0x1de   : > { %5816 = shalt.err (!%p5813_p2)
}
 0x1df   : > { %s7589_s11 = smov 4   ;;  %s7590_s25 = sld [smem:[#allocation42_spill]] }
 0x1e0   : > { %5131 = dma.hbm_to_vmem [thread:$0]  (!%p6515_p11), %s6509_s21, 128, %s6511_s2, %s6519_s12, %s7579_s27, %s7579_s27, %s7589_s11  }
 0x1e5   : > { %p7591_p8 = scmp.ne.s32.totalorder %s7590_s25, 0 }
 0x1e6   : > { %s6553_s0 = sand.u32 (!%p7591_p8), 1, %s5907_s5  }
 0x1e7   : > { %969 = sbr.rel (%p7591_p8) target bundleno = 3650 (0xe42), region = 132  ;;  %s4221_s20 = sshll.u32 (!%p7591_p8), %s6553_s0, 3 }
 0x1e8   : > { %s972_s14 = scalar_lea.sflag (!%p7591_p8), [#allocation3], %s6553_s0  ;;  %s6557_s28 = scalar_lea.vmem (!%p7591_p8), [#allocation2], %s4221_s20 }
 0x1ee   : > { %5862 = dma.done.wait (%p6490_p6), %s972_s14, 128  }
 0x1ef   : > { %5864 = vsyncadd (%p6490_p6), %s972_s14, 4294967168  ;;  %s7592_s6 = sld [smem:[#allocation41_spill]] }
 0x1f5   : > { %p7593_p4 = scmp.eq.s32.totalorder %s7592_s6, 0 }
 0x1f7   : > { %5866 = dma.done.wait (%p7593_p4), [#allocation6], 2048   ;;  %p7594_p10 = pmov %p7593_p4 }
 0x1f8   : > { %p7595_p11 = pmov %p7593_p4 }
 0x1f9   : > { %5868 = vsyncadd (%p7594_p10), [#allocation6], 4294965248 }
 0x1fa   : > { %5870 = dma.done.wait (%p7595_p11), [#allocation9], 32   ;;  %p7596_p3 = pmov %p7593_p4 }
 0x1fc   : > { %5872 = vsyncadd (%p7596_p3), [#allocation9], 4294967264  ;;  %p7597_p5 = pmov %p7596_p3 }
 0x1fd   : > { %p7598_p7 = pmov %p7596_p3 }
 0x1fe   : > { %5874 = dma.done.wait (%p7597_p5), [#allocation12], 1040  }
 0x1ff   : > { %5876 = vsyncadd (%p7598_p7), [#allocation12], 4294966256  ;;  %p7599_p6 = pmov %p7596_p3 }
 0x200   : > { %p7600_p9 = pmov %p7596_p3 }
 0x201   : > { %5878 = dma.done.wait (%p7599_p6), [#allocation15], 1040  }
 0x202   : > { %5880 = vsyncadd (%p7600_p9), [#allocation15], 4294966256  ;;  %p7601_p12 = pmov %p7596_p3 }
 0x203   : > { %p7602_p1 = pmov %p7596_p3 }
 0x204   : > { %5882 = dma.done.wait (%p7601_p12), [#allocation18], 32  }
 0x205   : > { %5884 = vsyncadd (%p7602_p1), [#allocation18], 4294967264  ;;  %p7603_p13 = pmov %p7602_p1 }
 0x206   : > { %p7604_p0 = pmov %p7602_p1 }
 0x207   : > { %5886 = dma.done.wait (%p7603_p13), [#allocation21], 1040  }
 0x208   : > { %5888 = vsyncadd (%p7604_p0), [#allocation21], 4294966256  ;;  %p7605_p2 = pmov %p7604_p0 }
 0x209   : > { %p7606_p8 = pmov %p7604_p0 }
 0x20a   : > { %5890 = dma.done.wait (%p7605_p2), [#allocation24], 2048  }
 0x20b   : > { %5892 = vsyncadd (%p7606_p8), [#allocation24], 4294965248  ;;  %p7607_p4 = pmov %p7604_p0 }
 0x20c   : > { %p7608_p10 = pmov %p7604_p0 }
 0x20d   : > { %5894 = dma.done.wait (%p7607_p4), [#allocation27], 2048  }
 0x20e   : > { %5896 = vsyncadd (%p7608_p10), [#allocation27], 4294965248  ;;  %p1127_p11 = scmp.lt.s32.totalorder %s7592_s6, 1  ;;  %s7609_s2 = sld [smem:[#allocation43_spill]]  ;;  %v5243_v9 = vld [vmem:[#allocation5] sm:$0xff]   ;;  %v5244_v12 = vld [vmem:[#allocation5 + $0x8] sm:$0xff]  }
 0x20f   : > { %s7610_s20 = sld [smem:[#allocation44_spill]]  ;;  %v5245_v13 = vld [vmem:[#allocation5 + $0x10] sm:$0xff]   ;;  %v5246_v16 = vld [vmem:[#allocation5 + $0x18] sm:$0xff]   ;;  %v5247_v17 = vld [vmem:[#allocation5 + $0x20] sm:$0xff]   ;;  %v5936_v56 = vmov 0   ;;  %s7612_s25 = sld [smem:[#allocation48_spill]] }
 0x210   : > { %s6597_s21 = scalar_select %p1127_p11, %s7592_s6, 1  ;;  %v5248_v20 = vld [vmem:[#allocation5 + $0x28] sm:$0xff]   ;;  %v5249_v21 = vld [vmem:[#allocation5 + $0x30] sm:$0xff]   ;;  %v5250_v23 = vld [vmem:[#allocation5 + $0x38] sm:$0xff]   ;;  %5225 = vset.pattern.permute.xlu0 %v5936_v56  ;;  %5226 = vset.pattern.permute.xlu1 %v5936_v56  ;;  %vm5938_vm0 = vmmov 0  }
 0x211   : > { %v5251_v24 = vld [vmem:[#allocation7] sm:$0xff]   ;;  %v5252_v25 = vld [vmem:[#allocation7 + $0x8] sm:$0xff]   ;;  %v5253_v26 = vld [vmem:[#allocation7 + $0x10] sm:$0xff]   ;;  %s7613_s27 = sld [smem:[#allocation50_spill]]  ;;  %p7626_p5 = scmp.ne.s32.totalorder %s7585_s3, 0 }
 0x212   : > { %s4362_s12 = sshll.u32 %s6597_s21, 6  ;;  %4637 = vmatprep.subr.bf16.mxu0 %v5251_v24  ;;  %v5254_v27 = vld [vmem:[#allocation7 + $0x18] sm:$0xff]   ;;  %v5255_v28 = vld [vmem:[#allocation7 + $0x20] sm:$0xff]   ;;  %v5256_v29 = vld [vmem:[#allocation7 + $0x28] sm:$0xff]   ;;  %s5939_s4 = smov [#allocation29]  }
 0x213   : > { %4638 = vmatpush3.bf16.msra.mxu0 %v5251_v24  ;;  %v5257_v54 = vld [vmem:[#allocation7 + $0x30] sm:$0xff]   ;;  %v5258_v55 = vld [vmem:[#allocation7 + $0x38] sm:$0xff]  }
 0x214   : > { %s1131_s10 = scalar_lea.vmem %s7609_s2, %s4362_s12  ;;  %4639 = vmatprep.subr.bf16.mxu0 %v5252_v25  ;;  %s7611_s2 = sld [smem:[#allocation46_spill]] }
 0x215   : > { %v5227_v0 = vld [vmem:[%s1131_s10] sm:$0xff]   ;;  %v5228_v1 = vld [vmem:[%s1131_s10 + $0x8] sm:$0xff]   ;;  %v5229_v2 = vld [vmem:[%s1131_s10 + $0x10] sm:$0xff]   ;;  %s6606_s14 = scalar_lea.vmem %s7610_s20, %s4362_s12  ;;  %s4364_s12 = sshll.u32 %s6597_s21, 7 }
 0x216   : > { %4573 = vmatprep.subr.bf16.mxu1 %v5227_v0  ;;  %v5230_v3 = vld [vmem:[%s1131_s10 + $0x18] sm:$0xff]   ;;  %v6609_v4 = vld [vmem:[%s6606_s14] sm:$0xff]   ;;  %v5232_v6 = vld [vmem:[%s1131_s10 + $0x28] sm:$0xff]   ;;  %s7621_s21 = sld [smem:[#allocation59_spill]]  ;;  %s7622_s20 = sld [smem:[#allocation60_spill]] }
 0x217   : > { %4574 = vmatpush3.bf16.msra.mxu1 %v5227_v0  ;;  %4589 = vmatprep.mubr.bf16.mxu1 %v6609_v4  ;;  %v5231_v5 = vld [vmem:[%s1131_s10 + $0x20] sm:$0xff]   ;;  %v5233_v7 = vld [vmem:[%s1131_s10 + $0x30] sm:$0xff]   ;;  %v5234_v8 = vld [vmem:[%s1131_s10 + $0x38] sm:$0xff]  }
 0x218   : > { %4575 = vmatprep.subr.bf16.mxu1 %v5228_v1  ;;  %v5236_v10 = vld [vmem:[%s6606_s14 + $0x8] sm:$0xff]   ;;  %v5237_v11 = vld [vmem:[%s6606_s14 + $0x10] sm:$0xff]   ;;  %v5238_v14 = vld [vmem:[%s6606_s14 + $0x18] sm:$0xff]   ;;  %4640 = vmatpush3.bf16.msra.mxu0 %v5252_v25 }
 0x219   : > { %v5239_v15 = vld [vmem:[%s6606_s14 + $0x20] sm:$0xff]   ;;  %v5240_v18 = vld [vmem:[%s6606_s14 + $0x28] sm:$0xff]   ;;  %v5241_v19 = vld [vmem:[%s6606_s14 + $0x30] sm:$0xff]   ;;  %4641 = vmatprep.subr.bf16.mxu0 %v5253_v26 }
 0x21a   : > { %v5242_v22 = vld [vmem:[%s6606_s14 + $0x38] sm:$0xff]   ;;  %s6623_s10 = scalar_lea.vmem %s7611_s2, %s4364_s12  ;;  %s7618_s2 = sld [smem:[#allocation57_spill]] }
 0x21b   : > { %4576 = vmatpush3.bf16.msra.mxu1 %v5228_v1  ;;  %v1161_v57 = vld [vmem:[%s6623_s10] sm:$0xff]  ;;  %v1163_v58 = vld [vmem:[%s6623_s10 + $0x10] sm:$0xff]  ;;  %v1162_v59 = vld [vmem:[%s6623_s10 + $0x8] sm:$0xff] }
 0x21c   : > { %4577 = vmatprep.subr.bf16.mxu1 %v5229_v2  ;;  %4642 = vmatpush3.bf16.msra.mxu0 %v5253_v26  ;;  %v1164_v60 = vld [vmem:[%s6623_s10 + $0x18] sm:$0xff]  ;;  %v1165_v61 = vld [vmem:[%s6623_s10 + $0x20] sm:$0xff]  ;;  %v1166_v62 = vld [vmem:[%s6623_s10 + $0x28] sm:$0xff] }
 0x21d   : > { %4643 = vmatprep.subr.bf16.mxu0 %v5254_v27  ;;  %1772 = vperm.xlu0 %5225, %v1161_v57   ;;  %v1167_v63 = vld [vmem:[%s6623_s10 + $0x30] sm:$0xff]  ;;  %v1168_v0 = vld [vmem:[%s6623_s10 + $0x38] sm:$0xff]  ;;  %v1169_v1 = vld [vmem:[%s6623_s10 + $0x40] sm:$0xff] }
 0x21e   : > { %1782 = vperm.xlu1 %5226, %v1163_v58  }
 0x21f   : > { %4578 = vmatpush3.bf16.msra.mxu1 %v5229_v2  ;;  %v1170_v2 = vld [vmem:[%s6623_s10 + $0x48] sm:$0xff] }
 0x220   : > { %4579 = vmatprep.subr.bf16.mxu1 %v5230_v3  ;;  %4644 = vmatpush3.bf16.msra.mxu0 %v5254_v27 }
 0x221   : > { %4645 = vmatprep.subr.bf16.mxu0 %v5255_v28  ;;  %1777 = vperm.xlu0 %5225, %v1162_v59  }
 0x222   : > { %1787 = vperm.xlu1 %5226, %v1164_v60  }
 0x223   : > { %4580 = vmatpush3.bf16.msra.mxu1 %v5230_v3  ;;  %v1171_v3 = vld [vmem:[%s6623_s10 + $0x50] sm:$0xff] }
 0x224   : > { %4581 = vmatprep.subr.bf16.mxu1 %v5231_v5  ;;  %4646 = vmatpush3.bf16.msra.mxu0 %v5255_v28 }
 0x225   : > { %4647 = vmatprep.subr.bf16.mxu0 %v5256_v29  ;;  %1792 = vperm.xlu0 %5225, %v1165_v61  }
 0x226   : > { %1797 = vperm.xlu1 %5226, %v1166_v62  }
 0x227   : > { %4582 = vmatpush3.bf16.msra.mxu1 %v5231_v5  ;;  %v1172_v5 = vld [vmem:[%s6623_s10 + $0x58] sm:$0xff] }
 0x228   : > { %4583 = vmatprep.subr.bf16.mxu1 %v5232_v6  ;;  %4648 = vmatpush3.bf16.msra.mxu0 %v5256_v29 }
 0x229   : > { %4649 = vmatprep.subr.bf16.mxu0 %v5257_v54  ;;  %1802 = vperm.xlu0 %5225, %v1167_v63  }
 0x22a   : > { %1807 = vperm.xlu1 %5226, %v1168_v0  }
 0x22b   : > { %4584 = vmatpush3.bf16.msra.mxu1 %v5232_v6  ;;  %v1173_v6 = vld [vmem:[%s6623_s10 + $0x60] sm:$0xff] }
 0x22c   : > { %4585 = vmatprep.subr.bf16.mxu1 %v5233_v7  ;;  %4650 = vmatpush3.bf16.msra.mxu0 %v5257_v54 }
 0x22d   : > { %4651 = vmatprep.subr.bf16.mxu0 %v5258_v55  ;;  %1812 = vperm.xlu0 %5225, %v1169_v1  }
 0x22e   : > { %1817 = vperm.xlu1 %5226, %v1170_v2  }
 0x22f   : > { %4586 = vmatpush3.bf16.msra.mxu1 %v5233_v7  ;;  %v1174_v7 = vld [vmem:[%s6623_s10 + $0x68] sm:$0xff] }
 0x230   : > { %4587 = vmatprep.subr.bf16.mxu1 %v5234_v8  ;;  %4652 = vmatpush3.bf16.msra.mxu0 %v5258_v55 }
 0x231   : > { %1822 = vperm.xlu0 %5225, %v1171_v3  }
 0x232   : > { %1827 = vperm.xlu1 %5226, %v1172_v5  }
 0x233   : > { %4588 = vmatpush3.bf16.msra.mxu1 %v5234_v8  ;;  %v1175_v8 = vld [vmem:[%s6623_s10 + $0x70] sm:$0xff] }
 0x234   : > { %4605 = vmatprep.subr.bf16.mxu1 %v5243_v9 }
 0x235   : > { %1832 = vperm.xlu0 %5225, %v1173_v6   ;;  %v7538_v6 = vmov 0.0  }
 0x236   : > { %4590 = vmatmul.mubr.bf16.vlgmr.msra.gmra.mrb[0].mxu1 %v5236_v10  ;;  %1837 = vperm.xlu1 %5226, %v1174_v7   ;;  %v4261_v10 = vld [vmem:[%s7612_s25] ss:$0 sm:$0xff] }
 0x237   : > { %4593 = vmatprep.mubr.bf16.mxu1 %v5237_v11  ;;  %4606 = vmatpush3.bf16.msra.mxu1 %v5243_v9  ;;  %v1176_v9 = vld [vmem:[%s6623_s10 + $0x78] sm:$0xff]  ;;  %s5821_s10 = sshll.u32 %s5939_s4, 4  ;;  %s5822_s10 = int_to_ptr.vmem [resolvable:$false] %s5821_s10 }
 0x238   : > { %4607 = vmatprep.subr.bf16.mxu1 %v5244_v12 }
 0x239   : > { %1842 = vperm.xlu0 %5225, %v1175_v8  }
 0x23a   : > { %1847 = vperm.xlu1 %5226, %v1176_v9   ;;  %v6657_v9 = vld [vmem:[%s7613_s27] ss:$0 sm:$0xff]  ;;  %s7623_s27 = sld [smem:[#allocation61_spill]] }
 0x23b   : > { %4608 = vmatpush3.bf16.msra.mxu1 %v5244_v12 }
 0x23c   : > { %4609 = vmatprep.subr.bf16.mxu1 %v5245_v13 }
 0x23e   : > { %4594 = vmatmul.mubr.bf16.gmra.mrb[4].mxu1 %v5238_v14 }
 0x23f   : > { %4597 = vmatprep.mubr.bf16.mxu1 %v5239_v15  ;;  %4610 = vmatpush3.bf16.msra.mxu1 %v5245_v13 }
 0x240   : > { %4611 = vmatprep.subr.bf16.mxu1 %v5246_v16 }
 0x243   : > { %4612 = vmatpush3.bf16.msra.mxu1 %v5246_v16 }
 0x244   : > { %4613 = vmatprep.subr.bf16.mxu1 %v5247_v17 }
 0x246   : > { %4598 = vmatmul.mubr.bf16.gmra.mrb[8].mxu1 %v5240_v18 }
 0x247   : > { %4601 = vmatprep.mubr.bf16.mxu1 %v5241_v19  ;;  %4614 = vmatpush3.bf16.msra.mxu1 %v5247_v17 }
 0x248   : > { %4615 = vmatprep.subr.bf16.mxu1 %v5248_v20 }
 0x24b   : > { %4616 = vmatpush3.bf16.msra.mxu1 %v5248_v20 }
 0x24c   : > { %4617 = vmatprep.subr.bf16.mxu1 %v5249_v21 }
 0x24e   : > { %4602 = vmatmul.mubr.bf16.gmra.mrb[12].mxu1 %v5242_v22 }
 0x24f   : > { %4618 = vmatpush3.bf16.msra.mxu1 %v5249_v21 }
 0x250   : > { %4619 = vmatprep.subr.bf16.mxu1 %v5250_v23 }
 0x253   : > { %4620 = vmatpush3.bf16.msra.mxu1 %v5250_v23 }
 0x254   : > { %4669 = vmatprep.subr.bf16.mxu1 %v7538_v6 }
 0x29c   : > { %v6645_v3 = vpop.permute.xlu0 %1772 }
 0x29d   : > { %v6647_v5 = vpop.permute.xlu1 %1782 }
 0x2a0   : > { %v6650_v7 = vpop.permute.xlu0 %1777 }
 0x2a1   : > { %v6652_v8 = vpop.permute.xlu1 %1787 }
 0x309   : > { %v4591_v30 = vpop.f32.mrb[0].mxu1 }
 0x30a   : > { %v1323_v31 = vpop.f32.mrb[1].mxu1 }
 0x30b   : > { %v4592_v32 = vpop.f32.mrb[2].mxu1 }
 0x30c   : > { %v1387_v33 = vpack.c.bf16 %v4592_v32, %v4591_v30  ;;  %v1326_v34 = vpop.f32.mrb[3].mxu1 }
 0x30d   : > { %v1386_v35 = vpack.c.bf16 %v1326_v34, %v1323_v31 }
 0x30f   : > { %4621 = vmatprep.mubr.bf16.mxu1 %v1386_v35 }
 0x310   : > { %4622 = vmatmul.mubr.bf16.vlgmr.msra.gmra.mrb[16].mxu1 %v1387_v33 }
 0x311   : > { %v4595_v36 = vpop.f32.mrb[4].mxu1 }
 0x312   : > { %v1339_v37 = vpop.f32.mrb[5].mxu1 }
 0x313   : > { %v4596_v38 = vpop.f32.mrb[6].mxu1 }
 0x314   : > { %v1389_v39 = vpack.c.bf16 %v4596_v38, %v4595_v36  ;;  %v1342_v40 = vpop.f32.mrb[7].mxu1 }
 0x315   : > { %v1388_v41 = vpack.c.bf16 %v1342_v40, %v1339_v37 }
 0x317   : > { %4625 = vmatprep.mubr.bf16.mxu1 %v1388_v41 }
 0x318   : > { %4626 = vmatmul.mubr.bf16.gmra.mrb[20].mxu1 %v1389_v39 }
 0x319   : > { %v4599_v42 = vpop.f32.mrb[8].mxu1 }
 0x31a   : > { %v1355_v43 = vpop.f32.mrb[9].mxu1 }
 0x31b   : > { %v4600_v44 = vpop.f32.mrb[10].mxu1 }
 0x31c   : > { %v1391_v45 = vpack.c.bf16 %v4600_v44, %v4599_v42  ;;  %v1358_v46 = vpop.f32.mrb[11].mxu1 }
 0x31d   : > { %v1390_v47 = vpack.c.bf16 %v1358_v46, %v1355_v43 }
 0x31f   : > { %4629 = vmatprep.mubr.bf16.mxu1 %v1390_v47 }
 0x320   : > { %4630 = vmatmul.mubr.bf16.gmra.mrb[24].mxu1 %v1391_v45 }
 0x321   : > { %v4603_v48 = vpop.f32.mrb[12].mxu1 }
 0x322   : > { %v1371_v49 = vpop.f32.mrb[13].mxu1 }
 0x323   : > { %v4604_v50 = vpop.f32.mrb[14].mxu1 }
 0x324   : > { %v1393_v51 = vpack.c.bf16 %v4604_v50, %v4603_v48  ;;  %v1374_v52 = vpop.f32.mrb[15].mxu1 }
 0x325   : > { %v1392_v53 = vpack.c.bf16 %v1374_v52, %v1371_v49 }
 0x327   : > { %4633 = vmatprep.mubr.bf16.mxu1 %v1392_v53 }
 0x328   : > { %4634 = vmatmul.mubr.bf16.gmra.mrb[28].mxu1 %v1393_v51 }
 0x329   : > { %4685 = vmatprep.mubr.msk.bf16.mxu1 %vm5938_vm0, %v7538_v6 }
 0x3e3   : > { %v4623_v11 = vpop.f32.mrb[16].mxu1 }
 0x3e4   : > { %v1508_v12 = vadd.f32 %v4623_v11, %v4261_v10  ;;  %v1499_v13 = vpop.f32.mrb[17].mxu1 }
 0x3e5   : > { %v1500_v14 = vadd.f32 %v4261_v10, %v1499_v13  ;;  %v4624_v15 = vpop.f32.mrb[18].mxu1 }
 0x3e6   : > { %v1511_v16 = vadd.f32 %v4624_v15, %v4261_v10  ;;  %v1502_v17 = vpop.f32.mrb[19].mxu1  ;;  %v1564_v19 = vmax.f32 %v1508_v12, 0.0 }
 0x3e7   : > { %v1503_v18 = vadd.f32 %v4261_v10, %v1502_v17  ;;  %v1562_v21 = vmax.f32 %v1500_v14, 0.0  ;;  %v6665_v14 = vpop.permute.xlu0 %1792 }
 0x3e8   : > { %v1565_v20 = vmax.f32 %v1511_v16, 0.0 }
 0x3e9   : > { %v1563_v22 = vmax.f32 %v1503_v18, 0.0 }
 0x3ea   : > { %v1579_v23 = vpack.c.bf16 %v1565_v20, %v1564_v19  ;;  %v6674_v19 = vpop.permute.xlu1 %1797 }
 0x3eb   : > { %v4627_v24 = vpop.f32.mrb[20].mxu1  ;;  %v1578_v25 = vpack.c.bf16 %v1563_v22, %v1562_v21 }
 0x3ec   : > { %v1524_v26 = vadd.f32 %v4627_v24, %v4261_v10  ;;  %v1515_v27 = vpop.f32.mrb[21].mxu1 }
 0x3ed   : > { %v1516_v28 = vadd.f32 %v4261_v10, %v1515_v27  ;;  %v4628_v29 = vpop.f32.mrb[22].mxu1  ;;  %4653 = vmatprep.mubr.bf16.mxu0 %v1578_v25 }
 0x3ee   : > { %v1527_v30 = vadd.f32 %v4628_v29, %v4261_v10  ;;  %v1518_v31 = vpop.f32.mrb[23].mxu1  ;;  %4654 = vmatmul.mubr.bf16.vlgmr.msra.gmra.mrb[0].mxu0 %v1579_v23  ;;  %v1568_v33 = vmax.f32 %v1524_v26, 0.0  ;;  %v6685_v26 = vpop.permute.xlu0 %1802 }
 0x3ef   : > { %v1519_v32 = vadd.f32 %v4261_v10, %v1518_v31  ;;  %v1566_v35 = vmax.f32 %v1516_v28, 0.0 }
 0x3f0   : > { %v1569_v34 = vmax.f32 %v1527_v30, 0.0 }
 0x3f1   : > { %v1567_v36 = vmax.f32 %v1519_v32, 0.0 }
 0x3f2   : > { %v1581_v37 = vpack.c.bf16 %v1569_v34, %v1568_v33  ;;  %v6696_v33 = vpop.permute.xlu1 %1807 }
 0x3f3   : > { %v1580_v38 = vpack.c.bf16 %v1567_v36, %v1566_v35  ;;  %v4631_v39 = vpop.f32.mrb[24].mxu1 }
 0x3f4   : > { %v1540_v40 = vadd.f32 %v4631_v39, %v4261_v10  ;;  %v1531_v41 = vpop.f32.mrb[25].mxu1 }
 0x3f5   : > { %v1532_v42 = vadd.f32 %v4261_v10, %v1531_v41  ;;  %v4632_v43 = vpop.f32.mrb[26].mxu1  ;;  %4657 = vmatprep.mubr.bf16.mxu0 %v1580_v38 }
 0x3f6   : > { %v1543_v44 = vadd.f32 %v4632_v43, %v4261_v10  ;;  %v1534_v45 = vpop.f32.mrb[27].mxu1  ;;  %4658 = vmatmul.mubr.bf16.gmra.mrb[4].mxu0 %v1581_v37  ;;  %v1572_v47 = vmax.f32 %v1540_v40, 0.0 }
 0x3f7   : > { %v1535_v46 = vadd.f32 %v4261_v10, %v1534_v45  ;;  %v1570_v49 = vmax.f32 %v1532_v42, 0.0 }
 0x3f8   : > { %v1573_v48 = vmax.f32 %v1543_v44, 0.0  ;;  %v6713_v44 = vpop.permute.xlu0 %1812 }
 0x3f9   : > { %v1571_v50 = vmax.f32 %v1535_v46, 0.0 }
 0x3fa   : > { %v1583_v51 = vpack.c.bf16 %v1573_v48, %v1572_v47 }
 0x3fb   : > { %v1582_v52 = vpack.c.bf16 %v1571_v50, %v1570_v49  ;;  %v4635_v53 = vpop.f32.mrb[28].mxu1  ;;  %v6719_v49 = vpop.permute.xlu1 %1817 }
 0x3fc   : > { %v1556_v54 = vadd.f32 %v4635_v53, %v4261_v10  ;;  %v1547_v55 = vpop.f32.mrb[29].mxu1 }
 0x3fd   : > { %v1548_v56 = vadd.f32 %v4261_v10, %v1547_v55  ;;  %v4636_v57 = vpop.f32.mrb[30].mxu1  ;;  %4661 = vmatprep.mubr.bf16.mxu0 %v1582_v52 }
 0x3fe   : > { %v1559_v58 = vadd.f32 %v4636_v57, %v4261_v10  ;;  %v1550_v59 = vpop.f32.mrb[31].mxu1  ;;  %4662 = vmatmul.mubr.bf16.gmra.mrb[8].mxu0 %v1583_v51  ;;  %v1576_v61 = vmax.f32 %v1556_v54, 0.0 }
 0x3ff   : > { %v1551_v60 = vadd.f32 %v4261_v10, %v1550_v59  ;;  %v1574_v63 = vmax.f32 %v1548_v56, 0.0 }
 0x400   : > { %v1577_v62 = vmax.f32 %v1559_v58, 0.0 }
 0x401   : > { %v1575_v0 = vmax.f32 %v1551_v60, 0.0 }
 0x402   : > { %v1585_v1 = vpack.c.bf16 %v1577_v62, %v1576_v61  ;;  %v6733_v62 = vpop.permute.xlu0 %1822 }
 0x403   : > { %v1584_v2 = vpack.c.bf16 %v1575_v0, %v1574_v63 }
 0x405   : > { %4665 = vmatprep.mubr.bf16.mxu0 %v1584_v2 }
 0x406   : > { %4666 = vmatmul.mubr.bf16.gmra.mrb[12].mxu0 %v1585_v1 }
 0x407   : > { %4705 = vmatprep.mubr.bf16.mxu0 %v6609_v4 }
 0x4c1   : > { %v4655_v10 = vpop.f32.mrb[0].mxu0 }
 0x4c2   : > { %v1691_v11 = vpop.f32.mrb[1].mxu0  ;;  %v6660_v4 = vadd.f32 %v4655_v10, %v6657_v9  ;;  %v6737_v10 = vpop.permute.xlu1 %1827 }
 0x4c3   : > { %v6663_v12 = vadd.f32 %v6657_v9, %v1691_v11  ;;  %v4656_v13 = vpop.f32.mrb[2].mxu0 }
 0x4c4   : > { %v6668_v15 = vadd.f32 %v4656_v13, %v6657_v9  ;;  %v1694_v16 = vpop.f32.mrb[3].mxu0  ;;  %v1756_v20 = vmax.f32 %v6660_v4, 0.0 }
 0x4c5   : > { %v1754_v17 = vmax.f32 %v6663_v12, 0.0  ;;  %v6672_v18 = vadd.f32 %v6657_v9, %v1694_v16 }
 0x4c6   : > { %v1757_v22 = vmax.f32 %v6668_v15, 0.0  ;;  %v1852_v28 = vmul.f32 %v6647_v5, %v1756_v20 }
 0x4c7   : > { %v1755_v21 = vmax.f32 %v6672_v18, 0.0  ;;  %v1850_v23 = vmul.f32 %v6645_v3, %v1754_v17 }
 0x4c8   : > { %v1853_v34 = vmul.f32 %v6652_v8, %v1757_v22 }
 0x4c9   : > { %v1851_v24 = vmul.f32 %v6650_v7, %v1755_v21  ;;  %v4659_v25 = vpop.f32.mrb[4].mxu0 }
 0x4ca   : > { %v1707_v27 = vpop.f32.mrb[5].mxu0  ;;  %v6691_v30 = vadd.f32 %v4659_v25, %v6657_v9 }
 0x4cb   : > { %v1866_v29 = vadd.f32 %v1851_v24, %v1850_v23  ;;  %v6694_v31 = vadd.f32 %v6657_v9, %v1707_v27  ;;  %v4660_v32 = vpop.f32.mrb[6].mxu0 }
 0x4cc   : > { %v1710_v35 = vpop.f32.mrb[7].mxu0  ;;  %v6703_v38 = vadd.f32 %v4660_v32, %v6657_v9  ;;  %v1760_v40 = vmax.f32 %v6691_v30, 0.0 }
 0x4cd   : > { %v1867_v36 = vadd.f32 %v1866_v29, %v1852_v28  ;;  %v1758_v37 = vmax.f32 %v6694_v31, 0.0  ;;  %v6706_v39 = vadd.f32 %v6657_v9, %v1710_v35 }
 0x4ce   : > { %v1761_v46 = vmax.f32 %v6703_v38, 0.0  ;;  %v1856_v51 = vmul.f32 %v6685_v26, %v1760_v40 }
 0x4cf   : > { %v1854_v41 = vmul.f32 %v6665_v14, %v1758_v37  ;;  %v1868_v42 = vadd.f32 %v1867_v36, %v1853_v34  ;;  %v1759_v43 = vmax.f32 %v6706_v39, 0.0  ;;  %v6743_v34 = vpop.permute.xlu0 %1832 }
 0x4d0   : > { %v1857_v58 = vmul.f32 %v6696_v33, %v1761_v46 }
 0x4d1   : > { %v1869_v45 = vadd.f32 %v1868_v42, %v1854_v41  ;;  %v1855_v47 = vmul.f32 %v6674_v19, %v1759_v43  ;;  %v4663_v48 = vpop.f32.mrb[8].mxu0 }
 0x4d2   : > { %v1723_v50 = vpop.f32.mrb[9].mxu0  ;;  %v6725_v53 = vadd.f32 %v4663_v48, %v6657_v9  ;;  %v6748_v48 = vpop.permute.xlu1 %1837 }
 0x4d3   : > { %v1870_v52 = vadd.f32 %v1869_v45, %v1855_v47  ;;  %v1724_v54 = vadd.f32 %v6657_v9, %v1723_v50  ;;  %v4664_v55 = vpop.f32.mrb[10].mxu0 }
 0x4d4   : > { %v1735_v56 = vadd.f32 %v4664_v55, %v6657_v9  ;;  %v1726_v57 = vpop.f32.mrb[11].mxu0  ;;  %v1764_v63 = vmax.f32 %v6725_v53, 0.0 }
 0x4d5   : > { %v1871_v59 = vadd.f32 %v1870_v52, %v1856_v51  ;;  %v1762_v60 = vmax.f32 %v1724_v54, 0.0  ;;  %v1727_v61 = vadd.f32 %v6657_v9, %v1726_v57  ;;  %v6752_v57 = vpop.permute.xlu0 %1842 }
 0x4d6   : > { %v1765_v11 = vmax.f32 %v1735_v56, 0.0  ;;  %v1860_v25 = vmul.f32 %v6733_v62, %v1764_v63 }
 0x4d7   : > { %v1858_v0 = vmul.f32 %v6713_v44, %v1762_v60  ;;  %v1872_v1 = vadd.f32 %v1871_v59, %v1857_v58  ;;  %v1763_v2 = vmax.f32 %v1727_v61, 0.0  ;;  %v6755_v61 = vpop.permute.xlu1 %1847 }
 0x4d8   : > { %v1861_v35 = vmul.f32 %v6737_v10, %v1765_v11 }
 0x4d9   : > { %v1873_v13 = vadd.f32 %v1872_v1, %v1858_v0  ;;  %v1859_v16 = vmul.f32 %v6719_v49, %v1763_v2  ;;  %v4667_v23 = vpop.f32.mrb[12].mxu0 }
 0x4da   : > { %v1739_v24 = vpop.f32.mrb[13].mxu0  ;;  %v1748_v28 = vadd.f32 %v4667_v23, %v6657_v9 }
 0x4db   : > { %v1874_v27 = vadd.f32 %v1873_v13, %v1859_v16  ;;  %v1740_v29 = vadd.f32 %v6657_v9, %v1739_v24  ;;  %v4668_v32 = vpop.f32.mrb[14].mxu0 }
 0x4dc   : > { %v1742_v36 = vpop.f32.mrb[15].mxu0  ;;  %v1751_v45 = vadd.f32 %v4668_v32, %v6657_v9  ;;  %v1768_v50 = vmax.f32 %v1748_v28, 0.0 }
 0x4dd   : > { %v1875_v41 = vadd.f32 %v1874_v27, %v1860_v25  ;;  %v1766_v42 = vmax.f32 %v1740_v29, 0.0  ;;  %v1743_v47 = vadd.f32 %v6657_v9, %v1742_v36 }
 0x4de   : > { %v1769_v55 = vmax.f32 %v1751_v45, 0.0  ;;  %v1864_v58 = vmul.f32 %v6752_v57, %v1768_v50 }
 0x4df   : > { %v1862_v51 = vmul.f32 %v6743_v34, %v1766_v42  ;;  %v1876_v52 = vadd.f32 %v1875_v41, %v1861_v35  ;;  %v1767_v53 = vmax.f32 %v1743_v47, 0.0 }
 0x4e0   : > { %v1865_v9 = vmul.f32 %v6755_v61, %v1769_v55 }
 0x4e1   : > { %v1877_v54 = vadd.f32 %v1876_v52, %v1862_v51  ;;  %v1863_v56 = vmul.f32 %v6748_v48, %v1767_v53 }
 0x4e3   : > { %v1878_v59 = vadd.f32 %v1877_v54, %v1863_v56 }
 0x4e5   : > { %v1879_v0 = vadd.f32 %v1878_v59, %v1864_v58 }
 0x4e7   : > { %v1880_v1 = vadd.f32 %v1879_v0, %v1865_v9 }
 0x4e9   : > { %v1881_v13 = vrot.slane %v1880_v1, 4 }
 0x4eb   : > { %v1882_v16 = vadd.f32 %v1881_v13, %v1880_v1 }
 0x4ed   : > { %v1883_v23 = vrot.slane %v1882_v16, 2 }
 0x4ef   : > { %v1884_v24 = vadd.f32 %v1883_v23, %v1882_v16 }
 0x4f1   : > { %v1885_v25 = vrot.slane %v1884_v24, 1 }
 0x4f3   : > { %v1886_v27 = vadd.f32 %v1885_v25, %v1884_v24 }
 0x4f5   : > { %v6760_v28 = vsub.f32 %v1754_v17, %v1886_v27  ;;  %v6764_v29 = vsub.f32 %v1755_v21, %v1886_v27  ;;  %v6768_v32 = vsub.f32 %v1756_v20, %v1886_v27  ;;  %v6772_v35 = vsub.f32 %v1757_v22, %v1886_v27 }
 0x4f6   : > { %v6776_v36 = vsub.f32 %v1758_v37, %v1886_v27  ;;  %v6780_v12 = vsub.f32 %v1759_v43, %v1886_v27  ;;  %v6784_v17 = vsub.f32 %v1760_v40, %v1886_v27  ;;  %v6788_v4 = vsub.f32 %v1761_v46, %v1886_v27 }
 0x4f7   : > { %v6790_v18 = vsub.f32 %v1762_v60, %v1886_v27  ;;  %v6792_v15 = vsub.f32 %v1763_v2, %v1886_v27  ;;  %v6794_v20 = vsub.f32 %v1764_v63, %v1886_v27  ;;  %v6796_v21 = vsub.f32 %v1765_v11, %v1886_v27 }
 0x4f8   : > { %v6798_v22 = vsub.f32 %v1766_v42, %v1886_v27  ;;  %v1900_v31 = vsub.f32 %v1767_v53, %v1886_v27  ;;  %v6800_v37 = vsub.f32 %v1768_v50, %v1886_v27  ;;  %v6802_v30 = vsub.f32 %v1769_v55, %v1886_v27 }
 0x4f9   : > { %v1903_v38 = vmul.f32 %v6760_v28, %v6760_v28  ;;  %v1904_v39 = vmul.f32 %v6764_v29, %v6764_v29  ;;  %v1905_v40 = vmul.f32 %v6768_v32, %v6768_v32  ;;  %v1906_v60 = vmul.f32 %v6772_v35, %v6772_v35 }
 0x4fa   : > { %v1907_v63 = vmul.f32 %v6776_v36, %v6776_v36  ;;  %v1908_v41 = vmul.f32 %v6780_v12, %v6780_v12  ;;  %v1909_v47 = vmul.f32 %v6784_v17, %v6784_v17  ;;  %v1910_v52 = vmul.f32 %v6788_v4, %v6788_v4 }
 0x4fb   : > { %v1919_v43 = vmul.f32 %v1903_v38, %v6645_v3  ;;  %v1920_v46 = vmul.f32 %v1904_v39, %v6650_v7  ;;  %v1921_v2 = vmul.f32 %v1905_v40, %v6647_v5  ;;  %v1922_v42 = vmul.f32 %v1906_v60, %v6652_v8 }
 0x4fc   : > { %v1923_v50 = vmul.f32 %v1907_v63, %v6665_v14  ;;  %v1924_v53 = vmul.f32 %v1908_v41, %v6674_v19  ;;  %v1911_v55 = vmul.f32 %v6790_v18, %v6790_v18  ;;  %v1925_v56 = vmul.f32 %v1909_v47, %v6685_v26 }
 0x4fd   : > { %v1935_v11 = vadd.f32 %v1920_v46, %v1919_v43  ;;  %v1912_v59 = vmul.f32 %v6792_v15, %v6792_v15  ;;  %v1926_v9 = vmul.f32 %v1910_v52, %v6696_v33  ;;  %v1913_v1 = vmul.f32 %v6794_v20, %v6794_v20 }
 0x4fe   : > { %v1927_v13 = vmul.f32 %v1911_v55, %v6713_v44  ;;  %v1914_v23 = vmul.f32 %v6796_v21, %v6796_v21  ;;  %v1915_v27 = vmul.f32 %v6798_v22, %v6798_v22  ;;  %v1916_v40 = vmul.f32 %v1900_v31, %v1900_v31 }
 0x4ff   : > { %v1936_v45 = vadd.f32 %v1935_v11, %v1921_v2  ;;  %v1928_v24 = vmul.f32 %v1912_v59, %v6719_v49  ;;  %v1929_v38 = vmul.f32 %v1913_v1, %v6733_v62  ;;  %v1917_v60 = vmul.f32 %v6800_v37, %v6800_v37  ;;  %v4279_v1 = vld [vmem:[#allocation8] ss:$0 sm:$0xff] }
 0x500   : > { %v1930_v43 = vmul.f32 %v1914_v23, %v6737_v10  ;;  %v1931_v63 = vmul.f32 %v1915_v27, %v6743_v34  ;;  %v1918_v11 = vmul.f32 %v6802_v30, %v6802_v30  ;;  %v1932_v41 = vmul.f32 %v1916_v40, %v6748_v48 }
 0x501   : > { %v1937_v51 = vadd.f32 %v1936_v45, %v1922_v42  ;;  %v1933_v45 = vmul.f32 %v1917_v60, %v6752_v57 }
 0x503   : > { %v1938_v54 = vadd.f32 %v1937_v51, %v1923_v50  ;;  %v1934_v50 = vmul.f32 %v1918_v11, %v6755_v61 }
 0x505   : > { %v1939_v58 = vadd.f32 %v1938_v54, %v1924_v53 }
 0x507   : > { %v1940_v0 = vadd.f32 %v1939_v58, %v1925_v56 }
 0x509   : > { %v1941_v16 = vadd.f32 %v1940_v0, %v1926_v9 }
 0x50b   : > { %v1942_v25 = vadd.f32 %v1941_v16, %v1927_v13 }
 0x50d   : > { %v1943_v39 = vadd.f32 %v1942_v25, %v1928_v24  ;;  %v4280_v25 = vld [vmem:[#allocation10] ss:$0 sm:$0xff] }
 0x50f   : > { %v1944_v46 = vadd.f32 %v1943_v39, %v1929_v38 }
 0x511   : > { %v1945_v2 = vadd.f32 %v1944_v46, %v1930_v43 }
 0x513   : > { %v1946_v42 = vadd.f32 %v1945_v2, %v1931_v63 }
 0x515   : > { %v1947_v47 = vadd.f32 %v1946_v42, %v1932_v41 }
 0x517   : > { %v1948_v51 = vadd.f32 %v1947_v47, %v1933_v45 }
 0x519   : > { %v1949_v52 = vadd.f32 %v1948_v51, %v1934_v50 }
 0x51b   : > { %v1950_v53 = vrot.slane %v1949_v52, 4 }
 0x51d   : > { %v1951_v54 = vadd.f32 %v1950_v53, %v1949_v52 }
 0x51f   : > { %v1952_v55 = vrot.slane %v1951_v54, 2 }
 0x521   : > { %v1953_v56 = vadd.f32 %v1952_v55, %v1951_v54 }
 0x523   : > { %v1954_v58 = vrot.slane %v1953_v56, 1 }
 0x525   : > { %v1955_v59 = vadd.f32 %v1954_v58, %v1953_v56 }
 0x527   : > { %v1956_v9 = vadd.f32 1e-05, %v1955_v59 }
 0x529   : > { %5324 = vrsqrt.f32 %v1956_v9 }
 0x533   : > { %v5325_v0 = vpop.eup %5324 }
 0x534   : > { %v1971_v13 = vmul.f32 %v5325_v0, %v1900_v31  ;;  %v1958_v16 = vmul.f32 %v5325_v0, %v6760_v28  ;;  %v1959_v23 = vmul.f32 %v5325_v0, %v6764_v29  ;;  %v1960_v24 = vmul.f32 %v5325_v0, %v6768_v32 }
 0x535   : > { %v1961_v27 = vmul.f32 %v5325_v0, %v6772_v35  ;;  %v1962_v38 = vmul.f32 %v5325_v0, %v6776_v36  ;;  %v1963_v39 = vmul.f32 %v5325_v0, %v6780_v12  ;;  %v1964_v40 = vmul.f32 %v5325_v0, %v6784_v17 }
 0x536   : > { %v1994_v43 = vmul.f32 %v4279_v1, %v1971_v13  ;;  %v1981_v46 = vmul.f32 %v4279_v1, %v1958_v16  ;;  %v1982_v60 = vmul.f32 %v4279_v1, %v1959_v23  ;;  %v1983_v63 = vmul.f32 %v4279_v1, %v1960_v24 }
 0x537   : > { %v1984_v31 = vmul.f32 %v4279_v1, %v1961_v27  ;;  %v1985_v2 = vmul.f32 %v4279_v1, %v1962_v38  ;;  %v1986_v28 = vmul.f32 %v4279_v1, %v1963_v39  ;;  %v1965_v29 = vmul.f32 %v5325_v0, %v6788_v4 }
 0x538   : > { %v2004_v11 = vadd.f32 %v4280_v25, %v1981_v46  ;;  %v2005_v32 = vadd.f32 %v4280_v25, %v1982_v60  ;;  %v2006_v41 = vadd.f32 %v4280_v25, %v1983_v63  ;;  %v1987_v42 = vmul.f32 %v4279_v1, %v1964_v40 }
 0x539   : > { %v2007_v35 = vadd.f32 %v4280_v25, %v1984_v31  ;;  %v2008_v45 = vadd.f32 %v4280_v25, %v1985_v2  ;;  %v2009_v36 = vadd.f32 %v4280_v25, %v1986_v28  ;;  %v1988_v47 = vmul.f32 %v4279_v1, %v1965_v29  ;;  %v6883_v2 = vld [vmem:[%s6606_s14 + $0x10] sm:$0xff]   ;;  %v5262_v28 = vld [vmem:[#allocation11 + $0x10] sm:$0xff]  }
 0x53a   : > { %v2020_v12 = vpack.c.bf16 %v2005_v32, %v2004_v11  ;;  %v2010_v50 = vadd.f32 %v4280_v25, %v1987_v42  ;;  %v1966_v17 = vmul.f32 %v5325_v0, %v6790_v18  ;;  %v1967_v51 = vmul.f32 %v5325_v0, %v6792_v15  ;;  %v5263_v29 = vld [vmem:[#allocation11 + $0x18] sm:$0xff]   ;;  %v6887_v11 = vld [vmem:[%s6606_s14 + $0x18] sm:$0xff]   ;;  %v6891_v32 = vld [vmem:[%s6606_s14 + $0x20] sm:$0xff]  }
 0x53b   : > { %v2021_v52 = vpack.c.bf16 %v2007_v35, %v2006_v41  ;;  %v2022_v53 = vpack.c.bf16 %v2009_v36, %v2008_v45  ;;  %v2011_v54 = vadd.f32 %v4280_v25, %v1988_v47  ;;  %v1968_v55 = vmul.f32 %v5325_v0, %v6794_v20  ;;  %v5264_v41 = vld [vmem:[#allocation11 + $0x20] sm:$0xff]   ;;  %v5265_v42 = vld [vmem:[#allocation11 + $0x28] sm:$0xff]   ;;  %v6895_v35 = vld [vmem:[%s6606_s14 + $0x28] sm:$0xff]  }
 0x53c   : > { %4670 = vmatpush3.bf16.msra.mxu1 %v2020_v12  ;;  %4689 = vmatprep.subr.bf16.mxu0 %v2020_v12  ;;  %v1989_v4 = vmul.f32 %v4279_v1, %v1966_v17  ;;  %v1990_v56 = vmul.f32 %v4279_v1, %v1967_v51  ;;  %v1969_v58 = vmul.f32 %v5325_v0, %v6796_v21  ;;  %v6899_v45 = vld [vmem:[%s6606_s14 + $0x30] sm:$0xff]   ;;  %v5266_v36 = vld [vmem:[#allocation11 + $0x30] sm:$0xff]   ;;  %v6903_v47 = vld [vmem:[%s6606_s14 + $0x38] sm:$0xff]  }
 0x53d   : > { %4690 = vmatpush3.bf16.msra.mxu0 %v2020_v12  ;;  %4671 = vmatprep.subr.bf16.mxu1 %v7538_v6  ;;  %v2023_v59 = vpack.c.bf16 %v2011_v54, %v2010_v50  ;;  %v1991_v9 = vmul.f32 %v4279_v1, %v1968_v55  ;;  %v1970_v18 = vmul.f32 %v5325_v0, %v6798_v22  ;;  %v5267_v12 = vld [vmem:[#allocation11 + $0x38] sm:$0xff]   ;;  %v5268_v50 = vld [vmem:[#allocation14] sm:$0xff]   ;;  %v5269_v17 = vld [vmem:[#allocation14 + $0x8] sm:$0xff]  }
 0x53e   : > { %4691 = vmatprep.subr.bf16.mxu0 %v2021_v52  ;;  %v2012_v15 = vadd.f32 %v4280_v25, %v1989_v4  ;;  %v2013_v13 = vadd.f32 %v4280_v25, %v1990_v56  ;;  %v1992_v16 = vmul.f32 %v4279_v1, %v1969_v58  ;;  %v2017_v23 = vadd.f32 %v4280_v25, %v1994_v43  ;;  %v5270_v51 = vld [vmem:[#allocation14 + $0x10] sm:$0xff]   ;;  %v5273_v54 = vld [vmem:[#allocation14 + $0x28] sm:$0xff]  }
 0x53f   : > { %v2014_v24 = vadd.f32 %v4280_v25, %v1991_v9  ;;  %v1993_v20 = vmul.f32 %v4279_v1, %v1970_v18  ;;  %v1972_v27 = vmul.f32 %v5325_v0, %v6800_v37  ;;  %v1973_v38 = vmul.f32 %v5325_v0, %v6802_v30  ;;  %v5260_v30 = vld [vmem:[#allocation11] sm:$0xff]   ;;  %v6875_v0 = vld [vmem:[%s6557_s28] sm:$0xff]  }
 0x540   : > { %4672 = vmatpush3.bf16.msra.mxu1 %v2021_v52  ;;  %v2024_v21 = vpack.c.bf16 %v2013_v13, %v2012_v15  ;;  %v2015_v39 = vadd.f32 %v4280_v25, %v1992_v16 }
 0x541   : > { %4692 = vmatpush3.bf16.msra.mxu0 %v2021_v52  ;;  %4673 = vmatprep.subr.bf16.mxu1 %v7538_v6  ;;  %v2016_v40 = vadd.f32 %v4280_v25, %v1993_v20  ;;  %v1995_v46 = vmul.f32 %v4279_v1, %v1972_v27  ;;  %v1996_v22 = vmul.f32 %v4279_v1, %v1973_v38  ;;  %v5261_v1 = vld [vmem:[#allocation11 + $0x8] sm:$0xff]   ;;  %v5271_v52 = vld [vmem:[#allocation14 + $0x18] sm:$0xff]  }
 0x542   : > { %4693 = vmatprep.subr.bf16.mxu0 %v2022_v53  ;;  %v2025_v60 = vpack.c.bf16 %v2015_v39, %v2014_v24 }
 0x543   : > { %v2026_v63 = vpack.c.bf16 %v2017_v23, %v2016_v40  ;;  %v2018_v31 = vadd.f32 %v4280_v25, %v1995_v46  ;;  %v2019_v43 = vadd.f32 %v4280_v25, %v1996_v22  ;;  %v6879_v25 = vld [vmem:[%s6606_s14 + $0x8] sm:$0xff]  }
 0x544   : > { %4674 = vmatpush3.bf16.msra.mxu1 %v2022_v53 }
 0x545   : > { %4694 = vmatpush3.bf16.msra.mxu0 %v2022_v53  ;;  %4675 = vmatprep.subr.bf16.mxu1 %v7538_v6  ;;  %v2027_v37 = vpack.c.bf16 %v2019_v43, %v2018_v31  ;;  %v5272_v53 = vld [vmem:[#allocation14 + $0x20] sm:$0xff]  }
 0x546   : > { %4695 = vmatprep.subr.bf16.mxu0 %v2023_v59 }
 0x548   : > { %4676 = vmatpush3.bf16.msra.mxu1 %v2023_v59 }
 0x549   : > { %4696 = vmatpush3.bf16.msra.mxu0 %v2023_v59  ;;  %4677 = vmatprep.subr.bf16.mxu1 %v7538_v6 }
 0x54a   : > { %4697 = vmatprep.subr.bf16.mxu0 %v2024_v21 }
 0x54c   : > { %4678 = vmatpush3.bf16.msra.mxu1 %v2024_v21 }
 0x54d   : > { %4698 = vmatpush3.bf16.msra.mxu0 %v2024_v21  ;;  %4679 = vmatprep.subr.bf16.mxu1 %v7538_v6 }
 0x54e   : > { %4699 = vmatprep.subr.bf16.mxu0 %v2025_v60 }
 0x550   : > { %4680 = vmatpush3.bf16.msra.mxu1 %v2025_v60 }
 0x551   : > { %4700 = vmatpush3.bf16.msra.mxu0 %v2025_v60  ;;  %4681 = vmatprep.subr.bf16.mxu1 %v7538_v6 }
 0x552   : > { %4701 = vmatprep.subr.bf16.mxu0 %v2026_v63 }
 0x554   : > { %4682 = vmatpush3.bf16.msra.mxu1 %v2026_v63 }
 0x555   : > { %4702 = vmatpush3.bf16.msra.mxu0 %v2026_v63  ;;  %4683 = vmatprep.subr.bf16.mxu1 %v7538_v6 }
 0x556   : > { %4703 = vmatprep.subr.bf16.mxu0 %v2027_v37 }
 0x558   : > { %4684 = vmatpush3.bf16.msra.mxu1 %v2027_v37 }
 0x559   : > { %4704 = vmatpush3.bf16.msra.mxu0 %v2027_v37  ;;  %4721 = vmatprep.subr.bf16.mxu1 %v5260_v30 }
 0x55a   : > { %4753 = vmatprep.subr.bf16.mxu0 %v5268_v50 }
 0x55b   : > { %4686 = vmatmul.mubr.bf16.vlgmr.msra.gmra.mrb[32].mxu1 %v6875_v0 }
 0x55c   : > { %4706 = vmatmul.mubr.bf16.vlgmr.msra.gmra.mrb[16].mxu0 %v6879_v25  ;;  %4722 = vmatpush3.bf16.msra.mxu1 %v5260_v30 }
 0x55d   : > { %4709 = vmatprep.mubr.bf16.mxu0 %v6883_v2  ;;  %4723 = vmatprep.subr.bf16.mxu1 %v5261_v1 }
 0x55e   : > { %4754 = vmatpush3.bf16.msra.mxu0 %v5268_v50 }
 0x55f   : > { %4755 = vmatprep.subr.bf16.mxu0 %v5269_v17 }
 0x560   : > { %4724 = vmatpush3.bf16.msra.mxu1 %v5261_v1 }
 0x561   : > { %4725 = vmatprep.subr.bf16.mxu1 %v5262_v28 }
 0x562   : > { %4756 = vmatpush3.bf16.msra.mxu0 %v5269_v17 }
 0x563   : > { %4757 = vmatprep.subr.bf16.mxu0 %v5270_v51 }
 0x564   : > { %4710 = vmatmul.mubr.bf16.gmra.mrb[20].mxu0 %v6887_v11  ;;  %4726 = vmatpush3.bf16.msra.mxu1 %v5262_v28 }
 0x565   : > { %4713 = vmatprep.mubr.bf16.mxu0 %v6891_v32  ;;  %4727 = vmatprep.subr.bf16.mxu1 %v5263_v29 }
 0x566   : > { %4758 = vmatpush3.bf16.msra.mxu0 %v5270_v51 }
 0x567   : > { %4759 = vmatprep.subr.bf16.mxu0 %v5271_v52 }
 0x568   : > { %4728 = vmatpush3.bf16.msra.mxu1 %v5263_v29 }
 0x569   : > { %4729 = vmatprep.subr.bf16.mxu1 %v5264_v41 }
 0x56a   : > { %4760 = vmatpush3.bf16.msra.mxu0 %v5271_v52 }
 0x56b   : > { %4761 = vmatprep.subr.bf16.mxu0 %v5272_v53 }
 0x56c   : > { %4714 = vmatmul.mubr.bf16.gmra.mrb[24].mxu0 %v6895_v35  ;;  %4730 = vmatpush3.bf16.msra.mxu1 %v5264_v41  ;;  %v5274_v41 = vld [vmem:[#allocation14 + $0x30] sm:$0xff]  }
 0x56d   : > { %4717 = vmatprep.mubr.bf16.mxu0 %v6899_v45  ;;  %4731 = vmatprep.subr.bf16.mxu1 %v5265_v42 }
 0x56e   : > { %4762 = vmatpush3.bf16.msra.mxu0 %v5272_v53 }
 0x56f   : > { %4763 = vmatprep.subr.bf16.mxu0 %v5273_v54 }
 0x570   : > { %4732 = vmatpush3.bf16.msra.mxu1 %v5265_v42  ;;  %v5275_v42 = vld [vmem:[#allocation14 + $0x38] sm:$0xff]  }
 0x571   : > { %4733 = vmatprep.subr.bf16.mxu1 %v5266_v36 }
 0x572   : > { %4764 = vmatpush3.bf16.msra.mxu0 %v5273_v54 }
 0x573   : > { %4765 = vmatprep.subr.bf16.mxu0 %v5274_v41 }
 0x574   : > { %4718 = vmatmul.mubr.bf16.gmra.mrb[28].mxu0 %v6903_v47  ;;  %4734 = vmatpush3.bf16.msra.mxu1 %v5266_v36  ;;  %v4282_v36 = vld [vmem:[#allocation13] ss:$0 sm:$0xff] }
 0x575   : > { %4735 = vmatprep.subr.bf16.mxu1 %v5267_v12 }
 0x576   : > { %4766 = vmatpush3.bf16.msra.mxu0 %v5274_v41 }
 0x577   : > { %4767 = vmatprep.subr.bf16.mxu0 %v5275_v42 }
 0x578   : > { %4736 = vmatpush3.bf16.msra.mxu1 %v5267_v12 }
 0x579   : > { %4785 = vmatprep.subr.bf16.mxu1 %v7538_v6 }
 0x57a   : > { %4768 = vmatpush3.bf16.msra.mxu0 %v5275_v42 }
 0x62e   : > { %v6907_v55 = vpop.f32.mrb[32].mxu1 }
 0x62f   : > { %v4707_v4 = vpop.f32.mrb[16].mxu0  ;;  %v4687_v56 = vpop.f32.mrb[33].mxu1 }
 0x630   : > { %v2109_v58 = vpop.f32.mrb[17].mxu0  ;;  %v6909_v59 = vpop.f32.mrb[34].mxu1 }
 0x631   : > { %v4708_v9 = vpop.f32.mrb[18].mxu0  ;;  %v4688_v15 = vpop.f32.mrb[35].mxu1 }
 0x632   : > { %v2173_v13 = vpack.c.bf16 %v4708_v9, %v4707_v4  ;;  %v2112_v16 = vpop.f32.mrb[19].mxu0 }
 0x633   : > { %v2172_v23 = vpack.c.bf16 %v2112_v16, %v2109_v58 }
 0x635   : > { %4737 = vmatprep.mubr.bf16.mxu1 %v2172_v23 }
 0x636   : > { %4738 = vmatmul.mubr.bf16.vlgmr.msra.gmra.mrb[36].mxu1 %v2173_v13 }
 0x637   : > { %v4711_v24 = vpop.f32.mrb[20].mxu0 }
 0x638   : > { %v2125_v20 = vpop.f32.mrb[21].mxu0 }
 0x639   : > { %v4712_v27 = vpop.f32.mrb[22].mxu0 }
 0x63a   : > { %v2175_v38 = vpack.c.bf16 %v4712_v27, %v4711_v24  ;;  %v2128_v21 = vpop.f32.mrb[23].mxu0 }
 0x63b   : > { %v2174_v39 = vpack.c.bf16 %v2128_v21, %v2125_v20 }
 0x63d   : > { %4741 = vmatprep.mubr.bf16.mxu1 %v2174_v39 }
 0x63e   : > { %4742 = vmatmul.mubr.bf16.gmra.mrb[40].mxu1 %v2175_v38 }
 0x63f   : > { %v4715_v40 = vpop.f32.mrb[24].mxu0 }
 0x640   : > { %v2141_v46 = vpop.f32.mrb[25].mxu0 }
 0x641   : > { %v4716_v22 = vpop.f32.mrb[26].mxu0 }
 0x642   : > { %v2177_v60 = vpack.c.bf16 %v4716_v22, %v4715_v40  ;;  %v2144_v63 = vpop.f32.mrb[27].mxu0 }
 0x643   : > { %v2176_v31 = vpack.c.bf16 %v2144_v63, %v2141_v46 }
 0x645   : > { %4745 = vmatprep.mubr.bf16.mxu1 %v2176_v31 }
 0x646   : > { %4746 = vmatmul.mubr.bf16.gmra.mrb[44].mxu1 %v2177_v60 }
 0x647   : > { %v4719_v43 = vpop.f32.mrb[28].mxu0 }
 0x648   : > { %v2157_v37 = vpop.f32.mrb[29].mxu0 }
 0x649   : > { %v4720_v30 = vpop.f32.mrb[30].mxu0 }
 0x64a   : > { %v2179_v1 = vpack.c.bf16 %v4720_v30, %v4719_v43  ;;  %v2160_v28 = vpop.f32.mrb[31].mxu0 }
 0x64b   : > { %v2178_v29 = vpack.c.bf16 %v2160_v28, %v2157_v37 }
 0x64d   : > { %4749 = vmatprep.mubr.bf16.mxu1 %v2178_v29 }
 0x64e   : > { %4750 = vmatmul.mubr.bf16.gmra.mrb[48].mxu1 %v2179_v1 }
 0x64f   : > { %4801 = vmatprep.mubr.msk.bf16.mxu1 %vm5938_vm0, %v7538_v6 }
 0x709   : > { %v4739_v12 = vpop.f32.mrb[36].mxu1 }
 0x70a   : > { %v2294_v50 = vadd.f32 %v4739_v12, %v4282_v36  ;;  %v2285_v17 = vpop.f32.mrb[37].mxu1 }
 0x70b   : > { %v2286_v51 = vadd.f32 %v4282_v36, %v2285_v17  ;;  %v4740_v52 = vpop.f32.mrb[38].mxu1 }
 0x70c   : > { %v2297_v53 = vadd.f32 %v4740_v52, %v4282_v36  ;;  %v2288_v54 = vpop.f32.mrb[39].mxu1  ;;  %v2350_v56 = vmax.f32 %v2294_v50, 0.0 }
 0x70d   : > { %v2289_v4 = vadd.f32 %v4282_v36, %v2288_v54  ;;  %v2348_v9 = vmax.f32 %v2286_v51, 0.0 }
 0x70e   : > { %v2351_v58 = vmax.f32 %v2297_v53, 0.0 }
 0x70f   : > { %v2349_v15 = vmax.f32 %v2289_v4, 0.0 }
 0x710   : > { %v2365_v13 = vpack.c.bf16 %v2351_v58, %v2350_v56 }
 0x711   : > { %v2364_v16 = vpack.c.bf16 %v2349_v15, %v2348_v9  ;;  %v4743_v23 = vpop.f32.mrb[40].mxu1 }
 0x712   : > { %v2310_v24 = vadd.f32 %v4743_v23, %v4282_v36  ;;  %v2301_v20 = vpop.f32.mrb[41].mxu1 }
 0x713   : > { %v2302_v27 = vadd.f32 %v4282_v36, %v2301_v20  ;;  %v4744_v38 = vpop.f32.mrb[42].mxu1  ;;  %4769 = vmatprep.mubr.bf16.mxu0 %v2364_v16 }
 0x714   : > { %v2313_v21 = vadd.f32 %v4744_v38, %v4282_v36  ;;  %v2304_v39 = vpop.f32.mrb[43].mxu1  ;;  %4770 = vmatmul.mubr.bf16.vlgmr.msra.gmra.mrb[32].mxu0 %v2365_v13  ;;  %v2354_v46 = vmax.f32 %v2310_v24, 0.0 }
 0x715   : > { %v2305_v40 = vadd.f32 %v4282_v36, %v2304_v39  ;;  %v2352_v60 = vmax.f32 %v2302_v27, 0.0 }
 0x716   : > { %v2355_v22 = vmax.f32 %v2313_v21, 0.0 }
 0x717   : > { %v2353_v63 = vmax.f32 %v2305_v40, 0.0  ;;  %v5337_v40 = vld [vmem:[%s6606_s14] sm:$0xff]   ;;  %s7620_s14 = sld [smem:[#allocation58_spill]] }
 0x718   : > { %v2367_v31 = vpack.c.bf16 %v2355_v22, %v2354_v46  ;;  %v6916_v46 = vld [vmem:[#allocation16] ss:$0 sm:$0xff] }
 0x719   : > { %v2366_v43 = vpack.c.bf16 %v2353_v63, %v2352_v60  ;;  %v4747_v37 = vpop.f32.mrb[44].mxu1 }
 0x71a   : > { %v2326_v30 = vadd.f32 %v4747_v37, %v4282_v36  ;;  %v2317_v1 = vpop.f32.mrb[45].mxu1 }
 0x71b   : > { %v2318_v28 = vadd.f32 %v4282_v36, %v2317_v1  ;;  %v4748_v29 = vpop.f32.mrb[46].mxu1  ;;  %4773 = vmatprep.mubr.bf16.mxu0 %v2366_v43 }
 0x71c   : > { %v2329_v41 = vadd.f32 %v4748_v29, %v4282_v36  ;;  %v2320_v42 = vpop.f32.mrb[47].mxu1  ;;  %4774 = vmatmul.mubr.bf16.gmra.mrb[36].mxu0 %v2367_v31  ;;  %v2358_v50 = vmax.f32 %v2326_v30, 0.0 }
 0x71d   : > { %v2321_v12 = vadd.f32 %v4282_v36, %v2320_v42  ;;  %v2356_v51 = vmax.f32 %v2318_v28, 0.0 }
 0x71e   : > { %v2359_v17 = vmax.f32 %v2329_v41, 0.0 }
 0x71f   : > { %v2357_v52 = vmax.f32 %v2321_v12, 0.0 }
 0x720   : > { %v2369_v53 = vpack.c.bf16 %v2359_v17, %v2358_v50 }
 0x721   : > { %v2368_v54 = vpack.c.bf16 %v2357_v52, %v2356_v51  ;;  %v4751_v4 = vpop.f32.mrb[48].mxu1 }
 0x722   : > { %v2342_v56 = vadd.f32 %v4751_v4, %v4282_v36  ;;  %v2333_v58 = vpop.f32.mrb[49].mxu1 }
 0x723   : > { %v2334_v9 = vadd.f32 %v4282_v36, %v2333_v58  ;;  %v4752_v15 = vpop.f32.mrb[50].mxu1  ;;  %4777 = vmatprep.mubr.bf16.mxu0 %v2368_v54 }
 0x724   : > { %v2345_v13 = vadd.f32 %v4752_v15, %v4282_v36  ;;  %v2336_v16 = vpop.f32.mrb[51].mxu1  ;;  %4778 = vmatmul.mubr.bf16.gmra.mrb[40].mxu0 %v2369_v53  ;;  %v2362_v24 = vmax.f32 %v2342_v56, 0.0 }
 0x725   : > { %v2337_v23 = vadd.f32 %v4282_v36, %v2336_v16  ;;  %v2360_v27 = vmax.f32 %v2334_v9, 0.0 }
 0x726   : > { %v2363_v20 = vmax.f32 %v2345_v13, 0.0 }
 0x727   : > { %v2361_v38 = vmax.f32 %v2337_v23, 0.0 }
 0x728   : > { %v2371_v21 = vpack.c.bf16 %v2363_v20, %v2362_v24 }
 0x729   : > { %v2370_v39 = vpack.c.bf16 %v2361_v38, %v2360_v27 }
 0x72b   : > { %4781 = vmatprep.mubr.bf16.mxu0 %v2370_v39 }
 0x72c   : > { %4782 = vmatmul.mubr.bf16.gmra.mrb[44].mxu0 %v2371_v21 }
 0x72d   : > { %4821 = vmatprep.mubr.bf16.mxu0 %v5337_v40 }
 0x7e7   : > { %v4771_v22 = vpop.f32.mrb[32].mxu0 }
 0x7e8   : > { %v2477_v60 = vpop.f32.mrb[33].mxu0  ;;  %v6919_v63 = vadd.f32 %v4771_v22, %v6916_v46 }
 0x7e9   : > { %v6922_v31 = vadd.f32 %v6916_v46, %v2477_v60  ;;  %v4772_v36 = vpop.f32.mrb[34].mxu0 }
 0x7ea   : > { %v6925_v43 = vadd.f32 %v4772_v36, %v6916_v46  ;;  %v2480_v37 = vpop.f32.mrb[35].mxu0  ;;  %v2542_v28 = vmax.f32 %v6919_v63, 0.0 }
 0x7eb   : > { %v2540_v30 = vmax.f32 %v6922_v31, 0.0  ;;  %v6929_v1 = vadd.f32 %v6916_v46, %v2480_v37 }
 0x7ec   : > { %v7542_v41 = vmax.f32 %v6925_v43, 0.0  ;;  %v2558_v51 = vmul.f32 %v2542_v28, %v6647_v5 }
 0x7ed   : > { %v2541_v29 = vmax.f32 %v6929_v1, 0.0  ;;  %v2556_v42 = vmul.f32 %v2540_v30, %v6645_v3 }
 0x7ee   : > { %v2559_v56 = vmul.f32 %v7542_v41, %v6652_v8 }
 0x7ef   : > { %v2557_v12 = vmul.f32 %v2541_v29, %v6650_v7  ;;  %v4775_v50 = vpop.f32.mrb[36].mxu0 }
 0x7f0   : > { %v2493_v17 = vpop.f32.mrb[37].mxu0  ;;  %v6944_v53 = vadd.f32 %v4775_v50, %v6916_v46 }
 0x7f1   : > { %v2572_v52 = vadd.f32 %v2557_v12, %v2556_v42  ;;  %v6947_v54 = vadd.f32 %v6916_v46, %v2493_v17  ;;  %v4776_v4 = vpop.f32.mrb[38].mxu0 }
 0x7f2   : > { %v2496_v58 = vpop.f32.mrb[39].mxu0  ;;  %v6954_v13 = vadd.f32 %v4776_v4, %v6916_v46  ;;  %v7540_v23 = vmax.f32 %v6944_v53, 0.0  ;;  %v7616_v31 = vmax.f32 %v6944_v53, 0.0 }
 0x7f3   : > { %v2573_v9 = vadd.f32 %v2572_v52, %v2558_v51  ;;  %v7541_v15 = vmax.f32 %v6947_v54, 0.0  ;;  %v6957_v16 = vadd.f32 %v6916_v46, %v2496_v58 }
 0x7f4   : > { %v2547_v21 = vmax.f32 %v6954_v13, 0.0  ;;  %v2562_v60 = vmul.f32 %v7540_v23, %v6685_v26 }
 0x7f5   : > { %v2560_v24 = vmul.f32 %v7541_v15, %v6665_v14  ;;  %v2574_v20 = vadd.f32 %v2573_v9, %v2559_v56  ;;  %v2545_v27 = vmax.f32 %v6957_v16, 0.0 }
 0x7f6   : > { %v2563_v51 = vmul.f32 %v2547_v21, %v6696_v33 }
 0x7f7   : > { %v2575_v38 = vadd.f32 %v2574_v20, %v2560_v24  ;;  %v2561_v39 = vmul.f32 %v2545_v27, %v6674_v19  ;;  %v4779_v40 = vpop.f32.mrb[40].mxu0 }
 0x7f8   : > { %v2509_v22 = vpop.f32.mrb[41].mxu0  ;;  %v2518_v37 = vadd.f32 %v4779_v40, %v6916_v46 }
 0x7f9   : > { %v2576_v36 = vadd.f32 %v2575_v38, %v2561_v39  ;;  %v2510_v42 = vadd.f32 %v6916_v46, %v2509_v22  ;;  %v4780_v12 = vpop.f32.mrb[42].mxu0 }
 0x7fa   : > { %v2521_v50 = vadd.f32 %v4780_v12, %v6916_v46  ;;  %v2512_v17 = vpop.f32.mrb[43].mxu0  ;;  %v2550_v58 = vmax.f32 %v2518_v37, 0.0 }
 0x7fb   : > { %v2577_v52 = vadd.f32 %v2576_v36, %v2562_v60  ;;  %v2548_v4 = vmax.f32 %v2510_v42, 0.0  ;;  %v2513_v56 = vadd.f32 %v6916_v46, %v2512_v17 }
 0x7fc   : > { %v2551_v24 = vmax.f32 %v2521_v50, 0.0  ;;  %v2566_v22 = vmul.f32 %v2550_v58, %v6733_v62 }
 0x7fd   : > { %v2564_v9 = vmul.f32 %v2548_v4, %v6713_v44  ;;  %v2578_v13 = vadd.f32 %v2577_v52, %v2563_v51  ;;  %v2549_v16 = vmax.f32 %v2513_v56, 0.0 }
 0x7fe   : > { %v2567_v37 = vmul.f32 %v2551_v24, %v6737_v10 }
 0x7ff   : > { %v2579_v20 = vadd.f32 %v2578_v13, %v2564_v9  ;;  %v2565_v38 = vmul.f32 %v2549_v16, %v6719_v49  ;;  %v4783_v39 = vpop.f32.mrb[44].mxu0 }
 0x800   : > { %v2525_v40 = vpop.f32.mrb[45].mxu0  ;;  %v2534_v18 = vadd.f32 %v4783_v39, %v6916_v46 }
 0x801   : > { %v2580_v12 = vadd.f32 %v2579_v20, %v2565_v38  ;;  %v2526_v60 = vadd.f32 %v6916_v46, %v2525_v40  ;;  %v4784_v36 = vpop.f32.mrb[46].mxu0 }
 0x802   : > { %v2528_v42 = vpop.f32.mrb[47].mxu0  ;;  %v2537_v50 = vadd.f32 %v4784_v36, %v6916_v46  ;;  %v2554_v56 = vmax.f32 %v2534_v18, 0.0 }
 0x803   : > { %v2581_v17 = vadd.f32 %v2580_v12, %v2566_v22  ;;  %v2552_v51 = vmax.f32 %v2526_v60, 0.0  ;;  %v2529_v52 = vadd.f32 %v6916_v46, %v2528_v42 }
 0x804   : > { %v2555_v38 = vmax.f32 %v2537_v50, 0.0  ;;  %v2570_v40 = vmul.f32 %v2554_v56, %v6752_v57 }
 0x805   : > { %v2568_v9 = vmul.f32 %v2552_v51, %v6743_v34  ;;  %v2582_v13 = vadd.f32 %v2581_v17, %v2567_v37  ;;  %v2553_v6 = vmax.f32 %v2529_v52, 0.0 }
 0x806   : > { %v2571_v15 = vmul.f32 %v2555_v38, %v6755_v61 }
 0x807   : > { %v2583_v20 = vadd.f32 %v2582_v13, %v2568_v9  ;;  %v2569_v39 = vmul.f32 %v2553_v6, %v6748_v48 }
 0x809   : > { %v2584_v23 = vadd.f32 %v2583_v20, %v2569_v39 }
 0x80b   : > { %v2585_v22 = vadd.f32 %v2584_v23, %v2570_v40 }
 0x80d   : > { %v2586_v12 = vadd.f32 %v2585_v22, %v2571_v15  ;;  %v7614_v15 = vmax.f32 %v6925_v43, 0.0 }
 0x80f   : > { %v2587_v60 = vrot.slane %v2586_v12, 4 }
 0x811   : > { %v2588_v36 = vadd.f32 %v2587_v60, %v2586_v12 }
 0x813   : > { %v2589_v41 = vrot.slane %v2588_v36, 2 }
 0x815   : > { %v2590_v46 = vadd.f32 %v2589_v41, %v2588_v36  ;;  %v7615_v41 = vmax.f32 %v6947_v54, 0.0 }
 0x817   : > { %v2591_v18 = vrot.slane %v2590_v46, 1 }
 0x819   : > { %v2592_v42 = vadd.f32 %v2591_v18, %v2590_v46 }
 0x81b   : > { %v6988_v37 = vsub.f32 %v2540_v30, %v2592_v42  ;;  %v6992_v17 = vsub.f32 %v2541_v29, %v2592_v42  ;;  %v6996_v50 = vsub.f32 %v2542_v28, %v2592_v42  ;;  %v7000_v23 = vsub.f32 %v7614_v15, %v2592_v42 }
 0x81c   : > { %v7004_v52 = vsub.f32 %v7615_v41, %v2592_v42  ;;  %v7006_v9 = vsub.f32 %v2545_v27, %v2592_v42  ;;  %v7010_v30 = vsub.f32 %v7616_v31, %v2592_v42  ;;  %v7012_v1 = vsub.f32 %v2547_v21, %v2592_v42 }
 0x81d   : > { %v7014_v29 = vsub.f32 %v2548_v4, %v2592_v42  ;;  %v7016_v63 = vsub.f32 %v2549_v16, %v2592_v42  ;;  %v7018_v28 = vsub.f32 %v2550_v58, %v2592_v42  ;;  %v7020_v43 = vsub.f32 %v2551_v24, %v2592_v42 }
 0x81e   : > { %v7022_v13 = vsub.f32 %v2552_v51, %v2592_v42  ;;  %v2606_v54 = vsub.f32 %v2553_v6, %v2592_v42  ;;  %v7024_v20 = vsub.f32 %v2554_v56, %v2592_v42  ;;  %v7026_v27 = vsub.f32 %v2555_v38, %v2592_v42 }
 0x81f   : > { %v2609_v53 = vmul.f32 %v6988_v37, %v6988_v37  ;;  %v2610_v21 = vmul.f32 %v6992_v17, %v6992_v17  ;;  %v2611_v4 = vmul.f32 %v6996_v50, %v6996_v50  ;;  %v2612_v6 = vmul.f32 %v7000_v23, %v7000_v23 }
 0x820   : > { %v2613_v24 = vmul.f32 %v7004_v52, %v7004_v52  ;;  %v2614_v38 = vmul.f32 %v7006_v9, %v7006_v9  ;;  %v2615_v22 = vmul.f32 %v7010_v30, %v7010_v30  ;;  %v2616_v36 = vmul.f32 %v7012_v1, %v7012_v1 }
 0x821   : > { %v2625_v58 = vmul.f32 %v2609_v53, %v6645_v3  ;;  %v2626_v16 = vmul.f32 %v2610_v21, %v6650_v7  ;;  %v2627_v51 = vmul.f32 %v2611_v4, %v6647_v5  ;;  %v2628_v39 = vmul.f32 %v2612_v6, %v6652_v8 }
 0x822   : > { %v2629_v12 = vmul.f32 %v2613_v24, %v6665_v14  ;;  %v2630_v46 = vmul.f32 %v2614_v38, %v6674_v19  ;;  %v2617_v42 = vmul.f32 %v7014_v29, %v7014_v29  ;;  %v2631_v15 = vmul.f32 %v2615_v22, %v6685_v26 }
 0x823   : > { %v2641_v56 = vadd.f32 %v2626_v16, %v2625_v58  ;;  %v2618_v31 = vmul.f32 %v7016_v63, %v7016_v63  ;;  %v2632_v53 = vmul.f32 %v2616_v36, %v6696_v33  ;;  %v2619_v4 = vmul.f32 %v7018_v28, %v7018_v28 }
 0x824   : > { %v2633_v58 = vmul.f32 %v2617_v42, %v6713_v44  ;;  %v2620_v6 = vmul.f32 %v7020_v43, %v7020_v43 }
 0x825   : > { %v2642_v40 = vadd.f32 %v2641_v56, %v2627_v51  ;;  %v2634_v24 = vmul.f32 %v2618_v31, %v6719_v49  ;;  %v2621_v56 = vmul.f32 %v7022_v13, %v7022_v13  ;;  %v2635_v38 = vmul.f32 %v2619_v4, %v6733_v62 }
 0x826   : > { %v2636_v22 = vmul.f32 %v2620_v6, %v6737_v10 }
 0x827   : > { %v2643_v60 = vadd.f32 %v2642_v40, %v2628_v39  ;;  %v2622_v40 = vmul.f32 %v2606_v54, %v2606_v54  ;;  %v2637_v36 = vmul.f32 %v2621_v56, %v6743_v34 }
 0x829   : > { %v2644_v18 = vadd.f32 %v2643_v60, %v2629_v12  ;;  %v2623_v60 = vmul.f32 %v7024_v20, %v7024_v20  ;;  %v2638_v42 = vmul.f32 %v2622_v40, %v6748_v48 }
 0x82b   : > { %v2645_v41 = vadd.f32 %v2644_v18, %v2630_v46  ;;  %v2624_v18 = vmul.f32 %v7026_v27, %v7026_v27 }
 0x82d   : > { %v2646_v21 = vadd.f32 %v2645_v41, %v2631_v15  ;;  %v2639_v41 = vmul.f32 %v2623_v60, %v6752_v57 }
 0x82f   : > { %v2647_v16 = vadd.f32 %v2646_v21, %v2632_v53  ;;  %v2640_v53 = vmul.f32 %v2624_v18, %v6755_v61 }
 0x831   : > { %v2648_v51 = vadd.f32 %v2647_v16, %v2633_v58 }
 0x833   : > { %v2649_v39 = vadd.f32 %v2648_v51, %v2634_v24 }
 0x835   : > { %v2650_v12 = vadd.f32 %v2649_v39, %v2635_v38 }
 0x837   : > { %v2651_v46 = vadd.f32 %v2650_v12, %v2636_v22  ;;  %v4300_v22 = vld [vmem:[#allocation17] ss:$0 sm:$0xff] }
 0x839   : > { %v2652_v15 = vadd.f32 %v2651_v46, %v2637_v36  ;;  %v4301_v46 = vld [vmem:[#allocation19] ss:$0 sm:$0xff] }
 0x83b   : > { %v2653_v31 = vadd.f32 %v2652_v15, %v2638_v42 }
 0x83d   : > { %v2654_v21 = vadd.f32 %v2653_v31, %v2639_v41 }
 0x83f   : > { %v2655_v4 = vadd.f32 %v2654_v21, %v2640_v53 }
 0x841   : > { %v2656_v58 = vrot.slane %v2655_v4, 4 }
 0x843   : > { %v2657_v16 = vadd.f32 %v2656_v58, %v2655_v4 }
 0x845   : > { %v2658_v6 = vrot.slane %v2657_v16, 2 }
 0x847   : > { %v2659_v24 = vadd.f32 %v2658_v6, %v2657_v16 }
 0x849   : > { %v2660_v51 = vrot.slane %v2659_v24, 1 }
 0x84b   : > { %v2661_v56 = vadd.f32 %v2660_v51, %v2659_v24 }
 0x84d   : > { %v2662_v38 = vadd.f32 1e-05, %v2661_v56 }
 0x84f   : > { %5326 = vrsqrt.f32 %v2662_v38 }
 0x859   : > { %v5327_v39 = vpop.eup %5326 }
 0x85a   : > { %v2677_v12 = vmul.f32 %v5327_v39, %v2606_v54  ;;  %v2664_v40 = vmul.f32 %v5327_v39, %v6988_v37  ;;  %v2665_v60 = vmul.f32 %v5327_v39, %v6992_v17  ;;  %v2666_v36 = vmul.f32 %v5327_v39, %v6996_v50 }
 0x85b   : > { %v2667_v18 = vmul.f32 %v5327_v39, %v7000_v23  ;;  %v2668_v42 = vmul.f32 %v5327_v39, %v7004_v52  ;;  %v2669_v15 = vmul.f32 %v5327_v39, %v7006_v9  ;;  %v2670_v41 = vmul.f32 %v5327_v39, %v7010_v30 }
 0x85c   : > { %v2700_v31 = vmul.f32 %v4300_v22, %v2677_v12  ;;  %v2687_v53 = vmul.f32 %v4300_v22, %v2664_v40  ;;  %v2688_v21 = vmul.f32 %v4300_v22, %v2665_v60  ;;  %v2689_v4 = vmul.f32 %v4300_v22, %v2666_v36 }
 0x85d   : > { %v2690_v54 = vmul.f32 %v4300_v22, %v2667_v18  ;;  %v2691_v58 = vmul.f32 %v4300_v22, %v2668_v42  ;;  %v2692_v37 = vmul.f32 %v4300_v22, %v2669_v15  ;;  %v2671_v17 = vmul.f32 %v5327_v39, %v7012_v1 }
 0x85e   : > { %v2710_v16 = vadd.f32 %v4301_v46, %v2687_v53  ;;  %v2711_v50 = vadd.f32 %v4301_v46, %v2688_v21  ;;  %v2712_v6 = vadd.f32 %v4301_v46, %v2689_v4  ;;  %v2693_v24 = vmul.f32 %v4300_v22, %v2670_v41 }
 0x85f   : > { %v2713_v23 = vadd.f32 %v4301_v46, %v2690_v54  ;;  %v2714_v51 = vadd.f32 %v4301_v46, %v2691_v58  ;;  %v2715_v52 = vadd.f32 %v4301_v46, %v2692_v37  ;;  %v2694_v56 = vmul.f32 %v4300_v22, %v2671_v17 }
 0x860   : > { %v2726_v9 = vpack.c.bf16 %v2711_v50, %v2710_v16  ;;  %v2716_v38 = vadd.f32 %v4301_v46, %v2693_v24  ;;  %v2672_v30 = vmul.f32 %v5327_v39, %v7014_v29  ;;  %v2673_v12 = vmul.f32 %v5327_v39, %v7016_v63 }
 0x861   : > { %v2727_v40 = vpack.c.bf16 %v2713_v23, %v2712_v6  ;;  %v2728_v60 = vpack.c.bf16 %v2715_v52, %v2714_v51  ;;  %v2717_v36 = vadd.f32 %v4301_v46, %v2694_v56  ;;  %v2674_v18 = vmul.f32 %v5327_v39, %v7018_v28  ;;  %v5280_v56 = vld [vmem:[#allocation20 + $0x20] sm:$0xff]  }
 0x862   : > { %4786 = vmatpush3.bf16.msra.mxu1 %v2726_v9  ;;  %4805 = vmatprep.subr.bf16.mxu0 %v2726_v9  ;;  %v2695_v1 = vmul.f32 %v4300_v22, %v2672_v30  ;;  %v2696_v42 = vmul.f32 %v4300_v22, %v2673_v12  ;;  %v2675_v15 = vmul.f32 %v5327_v39, %v7020_v43  ;;  %v7617_v41 = vmov 0.0  }
 0x863   : > { %4806 = vmatpush3.bf16.msra.mxu0 %v2726_v9  ;;  %4787 = vmatprep.subr.bf16.mxu1 %v7617_v41  ;;  %v2729_v53 = vpack.c.bf16 %v2717_v36, %v2716_v38  ;;  %v2697_v21 = vmul.f32 %v4300_v22, %v2674_v18  ;;  %v2676_v29 = vmul.f32 %v5327_v39, %v7022_v13  ;;  %v5289_v9 = vld [vmem:[%s7618_s2 + $0x28] sm:$0xff]  }
 0x864   : > { %4807 = vmatprep.subr.bf16.mxu0 %v2727_v40  ;;  %v2718_v63 = vadd.f32 %v4301_v46, %v2695_v1  ;;  %v2719_v4 = vadd.f32 %v4301_v46, %v2696_v42  ;;  %v2698_v54 = vmul.f32 %v4300_v22, %v2675_v15  ;;  %v2723_v58 = vadd.f32 %v4301_v46, %v2700_v31 }
 0x865   : > { %v2720_v37 = vadd.f32 %v4301_v46, %v2697_v21  ;;  %v2699_v28 = vmul.f32 %v4300_v22, %v2676_v29  ;;  %v2678_v17 = vmul.f32 %v5327_v39, %v7024_v20  ;;  %v2679_v16 = vmul.f32 %v5327_v39, %v7026_v27  ;;  %v5276_v27 = vld [vmem:[#allocation20] sm:$0xff]   ;;  %v5277_v39 = vld [vmem:[#allocation20 + $0x8] sm:$0xff]  }
 0x866   : > { %4788 = vmatpush3.bf16.msra.mxu1 %v2727_v40  ;;  %v2730_v43 = vpack.c.bf16 %v2719_v4, %v2718_v63  ;;  %v2721_v50 = vadd.f32 %v4301_v46, %v2698_v54 }
 0x867   : > { %4808 = vmatpush3.bf16.msra.mxu0 %v2727_v40  ;;  %4789 = vmatprep.subr.bf16.mxu1 %v7617_v41  ;;  %v2722_v6 = vadd.f32 %v4301_v46, %v2699_v28  ;;  %v2701_v24 = vmul.f32 %v4300_v22, %v2678_v17  ;;  %v2702_v13 = vmul.f32 %v4300_v22, %v2679_v16  ;;  %v5278_v22 = vld [vmem:[#allocation20 + $0x10] sm:$0xff]  }
 0x868   : > { %4809 = vmatprep.subr.bf16.mxu0 %v2728_v60  ;;  %v2731_v23 = vpack.c.bf16 %v2721_v50, %v2720_v37 }
 0x869   : > { %v2732_v51 = vpack.c.bf16 %v2723_v58, %v2722_v6  ;;  %v2724_v52 = vadd.f32 %v4301_v46, %v2701_v24  ;;  %v2725_v31 = vadd.f32 %v4301_v46, %v2702_v13  ;;  %v5279_v46 = vld [vmem:[#allocation20 + $0x18] sm:$0xff]  }
 0x86a   : > { %4790 = vmatpush3.bf16.msra.mxu1 %v2728_v60 }
 0x86b   : > { %4810 = vmatpush3.bf16.msra.mxu0 %v2728_v60  ;;  %4791 = vmatprep.subr.bf16.mxu1 %v7617_v41  ;;  %v2733_v20 = vpack.c.bf16 %v2725_v31, %v2724_v52  ;;  %v5290_v31 = vld [vmem:[%s7618_s2 + $0x30] sm:$0xff]  }
 0x86c   : > { %4811 = vmatprep.subr.bf16.mxu0 %v2729_v53 }
 0x86e   : > { %4792 = vmatpush3.bf16.msra.mxu1 %v2729_v53 }
 0x86f   : > { %4812 = vmatpush3.bf16.msra.mxu0 %v2729_v53  ;;  %4793 = vmatprep.subr.bf16.mxu1 %v7617_v41 }
 0x870   : > { %4813 = vmatprep.subr.bf16.mxu0 %v2730_v43 }
 0x872   : > { %4794 = vmatpush3.bf16.msra.mxu1 %v2730_v43 }
 0x873   : > { %4814 = vmatpush3.bf16.msra.mxu0 %v2730_v43  ;;  %4795 = vmatprep.subr.bf16.mxu1 %v7617_v41 }
 0x874   : > { %4815 = vmatprep.subr.bf16.mxu0 %v2731_v23 }
 0x876   : > { %4796 = vmatpush3.bf16.msra.mxu1 %v2731_v23 }
 0x877   : > { %4816 = vmatpush3.bf16.msra.mxu0 %v2731_v23  ;;  %4797 = vmatprep.subr.bf16.mxu1 %v7617_v41 }
 0x878   : > { %4817 = vmatprep.subr.bf16.mxu0 %v2732_v51 }
 0x87a   : > { %4798 = vmatpush3.bf16.msra.mxu1 %v2732_v51 }
 0x87b   : > { %4818 = vmatpush3.bf16.msra.mxu0 %v2732_v51  ;;  %4799 = vmatprep.subr.bf16.mxu1 %v7617_v41 }
 0x87c   : > { %4819 = vmatprep.subr.bf16.mxu0 %v2733_v20 }
 0x87e   : > { %4800 = vmatpush3.bf16.msra.mxu1 %v2733_v20 }
 0x87f   : > { %4820 = vmatpush3.bf16.msra.mxu0 %v2733_v20  ;;  %4837 = vmatprep.subr.bf16.mxu1 %v5276_v27  ;;  %v5291_v20 = vld [vmem:[%s7618_s2 + $0x38] sm:$0xff]  }
 0x881   : > { %4802 = vmatmul.mubr.bf16.vlgmr.msra.gmra.mrb[52].mxu1 %v6875_v0  ;;  %v5281_v0 = vld [vmem:[#allocation20 + $0x28] sm:$0xff]  }
 0x882   : > { %4822 = vmatmul.mubr.bf16.vlgmr.msra.gmra.mrb[48].mxu0 %v6879_v25  ;;  %4838 = vmatpush3.bf16.msra.mxu1 %v5276_v27  ;;  %v5282_v25 = vld [vmem:[#allocation20 + $0x30] sm:$0xff]   ;;  %v7138_v27 = vld [vmem:[#allocation22] ss:$0 sm:$0xff] }
 0x883   : > { %4825 = vmatprep.mubr.bf16.mxu0 %v6883_v2  ;;  %4839 = vmatprep.subr.bf16.mxu1 %v5277_v39  ;;  %v5283_v2 = vld [vmem:[#allocation20 + $0x38] sm:$0xff]  }
 0x886   : > { %4840 = vmatpush3.bf16.msra.mxu1 %v5277_v39 }
 0x887   : > { %4841 = vmatprep.subr.bf16.mxu1 %v5278_v22 }
 0x88a   : > { %4826 = vmatmul.mubr.bf16.gmra.mrb[52].mxu0 %v6887_v11  ;;  %4842 = vmatpush3.bf16.msra.mxu1 %v5278_v22  ;;  %v5284_v11 = vld [vmem:[%s7618_s2] sm:$0xff]  }
 0x88b   : > { %4829 = vmatprep.mubr.bf16.mxu0 %v6891_v32  ;;  %4843 = vmatprep.subr.bf16.mxu1 %v5279_v46  ;;  %v5285_v32 = vld [vmem:[%s7618_s2 + $0x8] sm:$0xff]  }
 0x88c   : > { %4869 = vmatprep.subr.bf16.mxu0 %v5284_v11 }
 0x88d   : > { %4870 = vmatpush3.bf16.msra.mxu0 %v5284_v11 }
 0x88e   : > { %4844 = vmatpush3.bf16.msra.mxu1 %v5279_v46  ;;  %4871 = vmatprep.subr.bf16.mxu0 %v5285_v32 }
 0x88f   : > { %4845 = vmatprep.subr.bf16.mxu1 %v5280_v56 }
 0x891   : > { %4872 = vmatpush3.bf16.msra.mxu0 %v5285_v32 }
 0x892   : > { %4830 = vmatmul.mubr.bf16.gmra.mrb[56].mxu0 %v6895_v35  ;;  %4846 = vmatpush3.bf16.msra.mxu1 %v5280_v56  ;;  %v5286_v35 = vld [vmem:[%s7618_s2 + $0x10] sm:$0xff]  }
 0x893   : > { %4833 = vmatprep.mubr.bf16.mxu0 %v6899_v45  ;;  %4847 = vmatprep.subr.bf16.mxu1 %v5281_v0  ;;  %v5287_v45 = vld [vmem:[%s7618_s2 + $0x18] sm:$0xff]  }
 0x894   : > { %4873 = vmatprep.subr.bf16.mxu0 %v5286_v35 }
 0x895   : > { %4874 = vmatpush3.bf16.msra.mxu0 %v5286_v35 }
 0x896   : > { %4848 = vmatpush3.bf16.msra.mxu1 %v5281_v0  ;;  %4875 = vmatprep.subr.bf16.mxu0 %v5287_v45 }
 0x897   : > { %4849 = vmatprep.subr.bf16.mxu1 %v5282_v25 }
 0x899   : > { %4876 = vmatpush3.bf16.msra.mxu0 %v5287_v45 }
 0x89a   : > { %4834 = vmatmul.mubr.bf16.gmra.mrb[60].mxu0 %v6903_v47  ;;  %4850 = vmatpush3.bf16.msra.mxu1 %v5282_v25  ;;  %v5288_v47 = vld [vmem:[%s7618_s2 + $0x20] sm:$0xff]  }
 0x89b   : > { %4851 = vmatprep.subr.bf16.mxu1 %v5283_v2  ;;  %4877 = vmatprep.subr.bf16.mxu0 %v5288_v47 }
 0x89d   : > { %4878 = vmatpush3.bf16.msra.mxu0 %v5288_v47 }
 0x89e   : > { %4852 = vmatpush3.bf16.msra.mxu1 %v5283_v2  ;;  %4879 = vmatprep.subr.bf16.mxu0 %v5289_v9 }
 0x89f   : > { %4901 = vmatprep.subr.bf16.mxu1 %v7617_v41 }
 0x8a1   : > { %4880 = vmatpush3.bf16.msra.mxu0 %v5289_v9 }
 0x8a2   : > { %4881 = vmatprep.subr.bf16.mxu0 %v5290_v31 }
 0x8a5   : > { %4882 = vmatpush3.bf16.msra.mxu0 %v5290_v31  ;;  %v5295_v31 = vld [vmem:[#allocation23 + $0x18] sm:$0xff]  }
 0x8a6   : > { %4883 = vmatprep.subr.bf16.mxu0 %v5291_v20 }
 0x8a9   : > { %4884 = vmatpush3.bf16.msra.mxu0 %v5291_v20 }
 0x8aa   : > { %4921 = vmatprep.subr.bf16.mxu0 %v7617_v41 }
 0x954   : > { %v7123_v38 = vpop.f32.mrb[52].mxu1 }
 0x955   : > { %v4823_v30 = vpop.f32.mrb[48].mxu0  ;;  %v4803_v12 = vpop.f32.mrb[53].mxu1 }
 0x956   : > { %v2809_v40 = vpop.f32.mrb[49].mxu0  ;;  %v7125_v60 = vpop.f32.mrb[54].mxu1 }
 0x957   : > { %v4824_v36 = vpop.f32.mrb[50].mxu0  ;;  %v3590_v18 = vpack.c.bf16 %v7125_v60, %v7123_v38  ;;  %v4804_v1 = vpop.f32.mrb[55].mxu1 }
 0x958   : > { %v2873_v42 = vpack.c.bf16 %v4824_v36, %v4823_v30  ;;  %v2812_v15 = vpop.f32.mrb[51].mxu0 }
 0x959   : > { %v2872_v53 = vpack.c.bf16 %v2812_v15, %v2809_v40  ;;  %v5292_v40 = vld [vmem:[#allocation23] sm:$0xff]  }
 0x95b   : > { %4853 = vmatprep.mubr.bf16.mxu1 %v2872_v53 }
 0x95c   : > { %4854 = vmatmul.mubr.bf16.vlgmr.msra.gmra.mrb[56].mxu1 %v2873_v42 }
 0x95d   : > { %v4827_v21 = vpop.f32.mrb[52].mxu0 }
 0x95e   : > { %v2825_v29 = vpop.f32.mrb[53].mxu0 }
 0x95f   : > { %v4828_v63 = vpop.f32.mrb[54].mxu0 }
 0x960   : > { %v2875_v4 = vpack.c.bf16 %v4828_v63, %v4827_v21  ;;  %v2828_v54 = vpop.f32.mrb[55].mxu0  ;;  %v5293_v63 = vld [vmem:[#allocation23 + $0x8] sm:$0xff]  }
 0x961   : > { %v2874_v58 = vpack.c.bf16 %v2828_v54, %v2825_v29 }
 0x963   : > { %4857 = vmatprep.mubr.bf16.mxu1 %v2874_v58 }
 0x964   : > { %4858 = vmatmul.mubr.bf16.gmra.mrb[60].mxu1 %v2875_v4 }
 0x965   : > { %v4831_v37 = vpop.f32.mrb[56].mxu0 }
 0x966   : > { %v2841_v28 = vpop.f32.mrb[57].mxu0 }
 0x967   : > { %v4832_v17 = vpop.f32.mrb[58].mxu0 }
 0x968   : > { %v2877_v16 = vpack.c.bf16 %v4832_v17, %v4831_v37  ;;  %v2844_v43 = vpop.f32.mrb[59].mxu0 }
 0x969   : > { %v2876_v50 = vpack.c.bf16 %v2844_v43, %v2841_v28  ;;  %v5294_v43 = vld [vmem:[#allocation23 + $0x10] sm:$0xff]  }
 0x96b   : > { %4861 = vmatprep.mubr.bf16.mxu1 %v2876_v50 }
 0x96c   : > { %4862 = vmatmul.mubr.bf16.gmra.mrb[64].mxu1 %v2877_v16 }
 0x96d   : > { %v4835_v6 = vpop.f32.mrb[60].mxu0 }
 0x96e   : > { %v2857_v24 = vpop.f32.mrb[61].mxu0 }
 0x96f   : > { %v4836_v13 = vpop.f32.mrb[62].mxu0 }
 0x970   : > { %v2879_v23 = vpack.c.bf16 %v4836_v13, %v4835_v6  ;;  %v2860_v51 = vpop.f32.mrb[63].mxu0 }
 0x971   : > { %v2878_v52 = vpack.c.bf16 %v2860_v51, %v2857_v24 }
 0x973   : > { %4865 = vmatprep.mubr.bf16.mxu1 %v2878_v52 }
 0x974   : > { %4866 = vmatmul.mubr.bf16.gmra.mrb[68].mxu1 %v2879_v23 }
 0x975   : > { %4917 = vmatprep.mubr.msk.bf16.mxu1 %vm5938_vm0, %v7617_v41 }
 0xa2f   : > { %v4855_v39 = vpop.f32.mrb[56].mxu1 }
 0xa30   : > { %v2994_v22 = vadd.f32 %v4855_v39, %v7138_v27  ;;  %v2985_v46 = vpop.f32.mrb[57].mxu1 }
 0xa31   : > { %v2986_v56 = vadd.f32 %v7138_v27, %v2985_v46  ;;  %v4856_v0 = vpop.f32.mrb[58].mxu1 }
 0xa32   : > { %v2997_v25 = vadd.f32 %v4856_v0, %v7138_v27  ;;  %v2988_v2 = vpop.f32.mrb[59].mxu1  ;;  %v3050_v32 = vmax.f32 %v2994_v22, 0.0 }
 0xa33   : > { %v2989_v11 = vadd.f32 %v7138_v27, %v2988_v2  ;;  %v3048_v45 = vmax.f32 %v2986_v56, 0.0  ;;  %v5296_v2 = vld [vmem:[#allocation23 + $0x20] sm:$0xff]  }
 0xa34   : > { %v3051_v35 = vmax.f32 %v2997_v25, 0.0 }
 0xa35   : > { %v3049_v47 = vmax.f32 %v2989_v11, 0.0 }
 0xa36   : > { %v3065_v9 = vpack.c.bf16 %v3051_v35, %v3050_v32 }
 0xa37   : > { %v3064_v30 = vpack.c.bf16 %v3049_v47, %v3048_v45  ;;  %v4859_v12 = vpop.f32.mrb[60].mxu1 }
 0xa38   : > { %v3010_v36 = vadd.f32 %v4859_v12, %v7138_v27  ;;  %v3001_v1 = vpop.f32.mrb[61].mxu1  ;;  %v5297_v12 = vld [vmem:[#allocation23 + $0x28] sm:$0xff]  }
 0xa39   : > { %v3002_v42 = vadd.f32 %v7138_v27, %v3001_v1  ;;  %v4860_v15 = vpop.f32.mrb[62].mxu1  ;;  %4885 = vmatprep.mubr.bf16.mxu0 %v3064_v30 }
 0xa3a   : > { %v3013_v53 = vadd.f32 %v4860_v15, %v7138_v27  ;;  %v3004_v21 = vpop.f32.mrb[63].mxu1  ;;  %4886 = vmatmul.mubr.bf16.vlgmr.msra.gmra.mrb[64].mxu0 %v3065_v9  ;;  %v3054_v4 = vmax.f32 %v3010_v36, 0.0 }
 0xa3b   : > { %v3005_v29 = vadd.f32 %v7138_v27, %v3004_v21  ;;  %4922 = vmatpush3.bf16.msra.mxu0 %v5292_v40  ;;  %v3052_v58 = vmax.f32 %v3002_v42, 0.0  ;;  %v5298_v21 = vld [vmem:[#allocation23 + $0x30] sm:$0xff]  }
 0xa3c   : > { %v3055_v54 = vmax.f32 %v3013_v53, 0.0  ;;  %4923 = vmatprep.subr.bf16.mxu0 %v7617_v41 }
 0xa3d   : > { %v3053_v37 = vmax.f32 %v3005_v29, 0.0  ;;  %v5299_v29 = vld [vmem:[#allocation23 + $0x38] sm:$0xff]  }
 0xa3e   : > { %v3067_v28 = vpack.c.bf16 %v3055_v54, %v3054_v4  ;;  %v5301_v4 = vld [vmem:[#allocation25 + $0x8] sm:$0xff]   ;;  %v5302_v54 = vld [vmem:[#allocation25 + $0x10] sm:$0xff]  }
 0xa3f   : > { %v3066_v17 = vpack.c.bf16 %v3053_v37, %v3052_v58  ;;  %4924 = vmatpush3.bf16.msra.mxu0 %v5293_v63  ;;  %v4863_v16 = vpop.f32.mrb[64].mxu1  ;;  %v7619_v63 = vpack.c.bf16 %v6909_v59, %v6907_v55  ;;  %v5303_v58 = vld [vmem:[#allocation25 + $0x18] sm:$0xff]   ;;  %v5304_v37 = vld [vmem:[#allocation25 + $0x20] sm:$0xff]   ;;  %v5305_v55 = vld [vmem:[#allocation25 + $0x28] sm:$0xff]  }
 0xa40   : > { %v3026_v50 = vadd.f32 %v4863_v16, %v7138_v27  ;;  %v3017_v6 = vpop.f32.mrb[65].mxu1  ;;  %4925 = vmatprep.subr.bf16.mxu0 %v7617_v41  ;;  %v5306_v59 = vld [vmem:[#allocation25 + $0x30] sm:$0xff]  }
 0xa41   : > { %v3018_v24 = vadd.f32 %v7138_v27, %v3017_v6  ;;  %v4864_v13 = vpop.f32.mrb[66].mxu1  ;;  %4889 = vmatprep.mubr.bf16.mxu0 %v3066_v17  ;;  %v7187_v17 = vld [vmem:[%s7620_s14] ss:$0 sm:$0xff]  ;;  %s4238_s14 = sshll.u32 %s6553_s0, 4 }
 0xa42   : > { %v3029_v23 = vadd.f32 %v4864_v13, %v7138_v27  ;;  %v3020_v51 = vpop.f32.mrb[67].mxu1  ;;  %4890 = vmatmul.mubr.bf16.gmra.mrb[68].mxu0 %v3067_v28  ;;  %v3058_v20 = vmax.f32 %v3026_v50, 0.0  ;;  %v5307_v28 = vld [vmem:[#allocation25 + $0x38] sm:$0xff]   ;;  %s1126_s11 = scalar_lea.vmem [#allocation29], %s4238_s14  ;;  %s3924_s14 = scalar_lea.sflag [#allocation4], %s6553_s0 }
 0xa43   : > { %v3021_v52 = vadd.f32 %v7138_v27, %v3020_v51  ;;  %4926 = vmatpush3.bf16.msra.mxu0 %v5294_v43  ;;  %v3056_v22 = vmax.f32 %v3018_v24, 0.0  ;;  %s3937_s25 = sshll.u32 %s1126_s11, 4  ;;  %s7435_s25 = int_to_ptr.vmem [resolvable:$true] %s3937_s25 }
 0xa44   : > { %v3059_v39 = vmax.f32 %v3029_v23, 0.0  ;;  %4927 = vmatprep.subr.bf16.mxu0 %v7617_v41  ;;  %p5824_p9 = scmp.lt.s32.totalorder %s7435_s25, %s5822_s10 }
 0xa45   : > { %v3057_v46 = vmax.f32 %v3021_v52, 0.0 }
 0xa46   : > { %v3069_v56 = vpack.c.bf16 %v3059_v39, %v3058_v20 }
 0xa47   : > { %v3068_v0 = vpack.c.bf16 %v3057_v46, %v3056_v22  ;;  %4928 = vmatpush3.bf16.msra.mxu0 %v5295_v31  ;;  %v4867_v25 = vpop.f32.mrb[68].mxu1 }
 0xa48   : > { %v3042_v11 = vadd.f32 %v4867_v25, %v7138_v27  ;;  %v3033_v32 = vpop.f32.mrb[69].mxu1  ;;  %4929 = vmatprep.subr.bf16.mxu0 %v7617_v41 }
 0xa49   : > { %v3034_v35 = vadd.f32 %v7138_v27, %v3033_v32  ;;  %v4868_v45 = vpop.f32.mrb[70].mxu1  ;;  %4893 = vmatprep.mubr.bf16.mxu0 %v3068_v0 }
 0xa4a   : > { %v3045_v47 = vadd.f32 %v4868_v45, %v7138_v27  ;;  %v3036_v9 = vpop.f32.mrb[71].mxu1  ;;  %4894 = vmatmul.mubr.bf16.gmra.mrb[72].mxu0 %v3069_v56  ;;  %v3062_v40 = vmax.f32 %v3042_v11, 0.0 }
 0xa4b   : > { %v3037_v30 = vadd.f32 %v7138_v27, %v3036_v9  ;;  %4930 = vmatpush3.bf16.msra.mxu0 %v5296_v2  ;;  %v3060_v1 = vmax.f32 %v3034_v35, 0.0  ;;  %v5300_v27 = vld [vmem:[#allocation25] sm:$0xff]  }
 0xa4c   : > { %v3063_v36 = vmax.f32 %v3045_v47, 0.0  ;;  %4931 = vmatprep.subr.bf16.mxu0 %v7617_v41 }
 0xa4d   : > { %v3061_v42 = vmax.f32 %v3037_v30, 0.0 }
 0xa4e   : > { %v3071_v15 = vpack.c.bf16 %v3063_v36, %v3062_v40 }
 0xa4f   : > { %v3070_v53 = vpack.c.bf16 %v3061_v42, %v3060_v1  ;;  %4932 = vmatpush3.bf16.msra.mxu0 %v5297_v12 }
 0xa50   : > { %4933 = vmatprep.subr.bf16.mxu0 %v7617_v41 }
 0xa51   : > { %4897 = vmatprep.mubr.bf16.mxu0 %v3070_v53 }
 0xa52   : > { %4898 = vmatmul.mubr.bf16.gmra.mrb[76].mxu0 %v3071_v15 }
 0xa53   : > { %4934 = vmatpush3.bf16.msra.mxu0 %v5298_v21  ;;  %4937 = vmatprep.mubr.msk.bf16.mxu0 %vm5938_vm0, %v7617_v41 }
 0xa54   : > { %4935 = vmatprep.subr.bf16.mxu0 %v7617_v41 }
 0xa57   : > { %4936 = vmatpush3.bf16.msra.mxu0 %v5299_v29 }
 0xa58   : > { %4941 = vmatprep.subr.bf16.mxu0 %v7617_v41 }
 0xa5a   : > { %4938 = vmatmul.mubr.bf16.vlgmr.msra.gmra.mrb[80].mxu0 %v7619_v63 }
 0xa5b   : > { %4942 = vmatpush3.bf16.msra.mxu0 %v5300_v27  ;;  %4957 = vmatprep.mubr.msk.bf16.mxu0 %vm5938_vm0, %v7617_v41 }
 0xa5c   : > { %4943 = vmatprep.subr.bf16.mxu0 %v7617_v41 }
 0xa5f   : > { %4944 = vmatpush3.bf16.msra.mxu0 %v5301_v4 }
 0xa60   : > { %4945 = vmatprep.subr.bf16.mxu0 %v7617_v41 }
 0xa63   : > { %4946 = vmatpush3.bf16.msra.mxu0 %v5302_v54 }
 0xa64   : > { %4947 = vmatprep.subr.bf16.mxu0 %v7617_v41 }
 0xa67   : > { %4948 = vmatpush3.bf16.msra.mxu0 %v5303_v58 }
 0xa68   : > { %4949 = vmatprep.subr.bf16.mxu0 %v7617_v41 }
 0xa6b   : > { %4950 = vmatpush3.bf16.msra.mxu0 %v5304_v37 }
 0xa6c   : > { %4951 = vmatprep.subr.bf16.mxu0 %v7617_v41 }
 0xa6f   : > { %4952 = vmatpush3.bf16.msra.mxu0 %v5305_v55 }
 0xa70   : > { %4953 = vmatprep.subr.bf16.mxu0 %v7617_v41 }
 0xa73   : > { %4954 = vmatpush3.bf16.msra.mxu0 %v5306_v59 }
 0xa74   : > { %4955 = vmatprep.subr.bf16.mxu0 %v7617_v41 }
 0xa77   : > { %4956 = vmatpush3.bf16.msra.mxu0 %v5307_v28 }
 0xa78   : > { %4961 = vmatprep.subr.bf16.mxu0 %v7617_v41 }
 0xa7a   : > { %4958 = vmatmul.mubr.bf16.vlgmr.msra.gmra.mrb[80].mxu0 %v3590_v18 }
 0xa7b   : > { %4977 = vmatprep.mubr.msk.bf16.mxu0 %vm5938_vm0, %v7617_v41 }
 0xb0d   : > { %v4887_v16 = vpop.f32.mrb[64].mxu0 }
 0xb0e   : > { %v3177_v43 = vpop.f32.mrb[65].mxu0  ;;  %v7190_v50 = vadd.f32 %v4887_v16, %v7187_v17 }
 0xb0f   : > { %v7193_v6 = vadd.f32 %v7187_v17, %v3177_v43  ;;  %v4888_v24 = vpop.f32.mrb[66].mxu0 }
 0xb10   : > { %v7196_v38 = vadd.f32 %v4888_v24, %v7187_v17  ;;  %v3180_v60 = vpop.f32.mrb[67].mxu0  ;;  %v3242_v23 = vmax.f32 %v7190_v50, 0.0 }
 0xb11   : > { %v3240_v18 = vmax.f32 %v7193_v6, 0.0  ;;  %v7200_v13 = vadd.f32 %v7187_v17, %v3180_v60 }
 0xb12   : > { %v3243_v52 = vmax.f32 %v7196_v38, 0.0  ;;  %v3258_v46 = vmul.f32 %v3242_v23, %v6647_v5 }
 0xb13   : > { %v3241_v51 = vmax.f32 %v7200_v13, 0.0  ;;  %v3256_v31 = vmul.f32 %v3240_v18, %v6645_v3 }
 0xb14   : > { %v3259_v11 = vmul.f32 %v3243_v52, %v6652_v8 }
 0xb15   : > { %v3257_v20 = vmul.f32 %v3241_v51, %v6650_v7  ;;  %v4891_v39 = vpop.f32.mrb[68].mxu0 }
 0xb16   : > { %v3193_v22 = vpop.f32.mrb[69].mxu0  ;;  %v7215_v0 = vadd.f32 %v4891_v39, %v7187_v17 }
 0xb17   : > { %v3272_v56 = vadd.f32 %v3257_v20, %v3256_v31  ;;  %v7218_v25 = vadd.f32 %v7187_v17, %v3193_v22  ;;  %v4892_v2 = vpop.f32.mrb[70].mxu0 }
 0xb18   : > { %v3196_v32 = vpop.f32.mrb[71].mxu0  ;;  %v7225_v47 = vadd.f32 %v4892_v2, %v7187_v17  ;;  %v3246_v30 = vmax.f32 %v7215_v0, 0.0 }
 0xb19   : > { %v3273_v35 = vadd.f32 %v3272_v56, %v3258_v46  ;;  %v3244_v45 = vmax.f32 %v7218_v25, 0.0  ;;  %v7228_v9 = vadd.f32 %v7187_v17, %v3196_v32 }
 0xb1a   : > { %v3247_v42 = vmax.f32 %v7225_v47, 0.0  ;;  %v3262_v29 = vmul.f32 %v3246_v30, %v6685_v26 }
 0xb1b   : > { %v3260_v12 = vmul.f32 %v3244_v45, %v6665_v14  ;;  %v3274_v40 = vadd.f32 %v3273_v35, %v3259_v11  ;;  %v3245_v36 = vmax.f32 %v7228_v9, 0.0 }
 0xb1c   : > { %v3263_v55 = vmul.f32 %v3247_v42, %v6696_v33 }
 0xb1d   : > { %v3275_v1 = vadd.f32 %v3274_v40, %v3260_v12  ;;  %v3261_v15 = vmul.f32 %v3245_v36, %v6674_v19  ;;  %v4895_v53 = vpop.f32.mrb[72].mxu0 }
 0xb1e   : > { %v3209_v21 = vpop.f32.mrb[73].mxu0  ;;  %v7243_v63 = vadd.f32 %v4895_v53, %v7187_v17 }
 0xb1f   : > { %v3276_v27 = vadd.f32 %v3275_v1, %v3261_v15  ;;  %v7246_v4 = vadd.f32 %v7187_v17, %v3209_v21  ;;  %v4896_v54 = vpop.f32.mrb[74].mxu0 }
 0xb20   : > { %v7249_v58 = vadd.f32 %v4896_v54, %v7187_v17  ;;  %v3212_v37 = vpop.f32.mrb[75].mxu0  ;;  %v3250_v43 = vmax.f32 %v7243_v63, 0.0 }
 0xb21   : > { %v3277_v59 = vadd.f32 %v3276_v27, %v3262_v29  ;;  %v3248_v28 = vmax.f32 %v7246_v4, 0.0  ;;  %v7256_v16 = vadd.f32 %v7187_v17, %v3212_v37 }
 0xb22   : > { %v3251_v20 = vmax.f32 %v7249_v58, 0.0  ;;  %v3266_v2 = vmul.f32 %v3250_v43, %v6733_v62 }
 0xb23   : > { %v3264_v24 = vmul.f32 %v3248_v28, %v6713_v44  ;;  %v3278_v60 = vadd.f32 %v3277_v59, %v3263_v55  ;;  %v3249_v31 = vmax.f32 %v7256_v16, 0.0  ;;  %v5308_v59 = vld [vmem:[#allocation26] sm:$0xff]  }
 0xb24   : > { %v3267_v40 = vmul.f32 %v3251_v20, %v6737_v10  ;;  %4962 = vmatpush3.bf16.msra.mxu0 %v5308_v59 }
 0xb25   : > { %v3279_v39 = vadd.f32 %v3278_v60, %v3264_v24  ;;  %v3265_v22 = vmul.f32 %v3249_v31, %v6719_v49  ;;  %v4899_v46 = vpop.f32.mrb[76].mxu0  ;;  %4963 = vmatprep.subr.bf16.mxu0 %v7617_v41 }
 0xb26   : > { %v3225_v56 = vpop.f32.mrb[77].mxu0  ;;  %v3234_v32 = vadd.f32 %v4899_v46, %v7187_v17 }
 0xb27   : > { %v3280_v11 = vadd.f32 %v3279_v39, %v3265_v22  ;;  %v3226_v35 = vadd.f32 %v7187_v17, %v3225_v56  ;;  %v4900_v12 = vpop.f32.mrb[78].mxu0  ;;  %v5309_v22 = vld [vmem:[#allocation26 + $0x8] sm:$0xff]  }
 0xb28   : > { %v3228_v1 = vpop.f32.mrb[79].mxu0  ;;  %v3237_v21 = vadd.f32 %v4900_v12, %v7187_v17  ;;  %v3254_v27 = vmax.f32 %v3234_v32, 0.0  ;;  %4964 = vmatpush3.bf16.msra.mxu0 %v5309_v22  ;;  %v5311_v12 = vld [vmem:[#allocation26 + $0x18] sm:$0xff]  }
 0xb29   : > { %v3281_v15 = vadd.f32 %v3280_v11, %v3266_v2  ;;  %v3252_v53 = vmax.f32 %v3226_v35, 0.0  ;;  %v3229_v29 = vadd.f32 %v7187_v17, %v3228_v1  ;;  %v5310_v11 = vld [vmem:[#allocation26 + $0x10] sm:$0xff]   ;;  %4965 = vmatprep.subr.bf16.mxu0 %v7617_v41 }
 0xb2a   : > { %v3255_v60 = vmax.f32 %v3237_v21, 0.0  ;;  %v3270_v46 = vmul.f32 %v3254_v27, %v6752_v57 }
 0xb2b   : > { %v3268_v54 = vmul.f32 %v3252_v53, %v6743_v34  ;;  %v3282_v37 = vadd.f32 %v3281_v15, %v3267_v40  ;;  %v3253_v55 = vmax.f32 %v3229_v29, 0.0  ;;  %v5312_v15 = vld [vmem:[#allocation26 + $0x20] sm:$0xff]  }
 0xb2c   : > { %v3271_v2 = vmul.f32 %v3255_v60, %v6755_v61  ;;  %4966 = vmatpush3.bf16.msra.mxu0 %v5310_v11 }
 0xb2d   : > { %v3283_v24 = vadd.f32 %v3282_v37, %v3268_v54  ;;  %v3269_v39 = vmul.f32 %v3253_v55, %v6748_v48  ;;  %4967 = vmatprep.subr.bf16.mxu0 %v7617_v41  ;;  %v5313_v54 = vld [vmem:[#allocation26 + $0x28] sm:$0xff]  }
 0xb2f   : > { %v3284_v56 = vadd.f32 %v3283_v24, %v3269_v39 }
 0xb30   : > { %4968 = vmatpush3.bf16.msra.mxu0 %v5311_v12 }
 0xb31   : > { %v3285_v17 = vadd.f32 %v3284_v56, %v3270_v46  ;;  %4969 = vmatprep.subr.bf16.mxu0 %v7617_v41  ;;  %v5314_v46 = vld [vmem:[#allocation26 + $0x30] sm:$0xff]  }
 0xb33   : > { %v3286_v32 = vadd.f32 %v3285_v17, %v3271_v2 }
 0xb34   : > { %4970 = vmatpush3.bf16.msra.mxu0 %v5312_v15 }
 0xb35   : > { %v3287_v35 = vrot.slane %v3286_v32, 4  ;;  %4971 = vmatprep.subr.bf16.mxu0 %v7617_v41 }
 0xb37   : > { %v3288_v40 = vadd.f32 %v3287_v35, %v3286_v32 }
 0xb38   : > { %4972 = vmatpush3.bf16.msra.mxu0 %v5313_v54 }
 0xb39   : > { %v3289_v1 = vrot.slane %v3288_v40, 2  ;;  %4973 = vmatprep.subr.bf16.mxu0 %v7617_v41 }
 0xb3b   : > { %v3290_v21 = vadd.f32 %v3289_v1, %v3288_v40 }
 0xb3c   : > { %4974 = vmatpush3.bf16.msra.mxu0 %v5314_v46 }
 0xb3d   : > { %v3291_v29 = vrot.slane %v3290_v21, 1  ;;  %4975 = vmatprep.subr.bf16.mxu0 %v7617_v41 }
 0xb3f   : > { %v3292_v37 = vadd.f32 %v3291_v29, %v3290_v21 }
 0xb41   : > { %v7288_v59 = vsub.f32 %v3240_v18, %v3292_v37  ;;  %v7292_v24 = vsub.f32 %v3241_v51, %v3292_v37  ;;  %v7296_v39 = vsub.f32 %v3242_v23, %v3292_v37  ;;  %v7300_v22 = vsub.f32 %v3243_v52, %v3292_v37 }
 0xb42   : > { %v7304_v56 = vsub.f32 %v3244_v45, %v3292_v37  ;;  %v7308_v6 = vsub.f32 %v3245_v36, %v3292_v37  ;;  %v7312_v18 = vsub.f32 %v3246_v30, %v3292_v37  ;;  %v7316_v50 = vsub.f32 %v3247_v42, %v3292_v37 }
 0xb43   : > { %v7321_v38 = vsub.f32 %v3248_v28, %v3292_v37  ;;  %v7325_v13 = vsub.f32 %v3249_v31, %v3292_v37  ;;  %v7329_v23 = vsub.f32 %v3250_v43, %v3292_v37  ;;  %v7333_v51 = vsub.f32 %v3251_v20, %v3292_v37 }
 0xb44   : > { %v7335_v52 = vsub.f32 %v3252_v53, %v3292_v37  ;;  %v3306_v0 = vsub.f32 %v3253_v55, %v3292_v37  ;;  %v7337_v25 = vsub.f32 %v3254_v27, %v3292_v37  ;;  %v7339_v45 = vsub.f32 %v3255_v60, %v3292_v37 }
 0xb45   : > { %v3309_v47 = vmul.f32 %v7288_v59, %v7288_v59  ;;  %v3310_v9 = vmul.f32 %v7292_v24, %v7292_v24  ;;  %v3311_v30 = vmul.f32 %v7296_v39, %v7296_v39  ;;  %v3312_v63 = vmul.f32 %v7300_v22, %v7300_v22 }
 0xb46   : > { %v3313_v4 = vmul.f32 %v7304_v56, %v7304_v56  ;;  %v3314_v16 = vmul.f32 %v7308_v6, %v7308_v6  ;;  %v3316_v53 = vmul.f32 %v7316_v50, %v7316_v50 }
 0xb47   : > { %v3325_v36 = vmul.f32 %v3309_v47, %v6645_v3  ;;  %v3326_v42 = vmul.f32 %v3310_v9, %v6650_v7  ;;  %v3327_v58 = vmul.f32 %v3311_v30, %v6647_v5  ;;  %v3328_v43 = vmul.f32 %v3312_v63, %v6652_v8 }
 0xb48   : > { %v3315_v3 = vmul.f32 %v7312_v18, %v7312_v18  ;;  %v3329_v7 = vmul.f32 %v3313_v4, %v6665_v14  ;;  %v3330_v27 = vmul.f32 %v3314_v16, %v6674_v19  ;;  %v3317_v5 = vmul.f32 %v7321_v38, %v7321_v38 }
 0xb49   : > { %v3341_v28 = vadd.f32 %v3326_v42, %v3325_v36  ;;  %v3318_v8 = vmul.f32 %v7325_v13, %v7325_v13  ;;  %v3332_v17 = vmul.f32 %v3316_v53, %v6696_v33  ;;  %v3319_v14 = vmul.f32 %v7329_v23, %v7329_v23 }
 0xb4a   : > { %v3331_v60 = vmul.f32 %v3315_v3, %v6685_v26  ;;  %v3333_v32 = vmul.f32 %v3317_v5, %v6713_v44  ;;  %v3320_v19 = vmul.f32 %v7333_v51, %v7333_v51  ;;  %v3321_v26 = vmul.f32 %v7335_v52, %v7335_v52 }
 0xb4b   : > { %v3342_v31 = vadd.f32 %v3341_v28, %v3327_v58  ;;  %v3334_v12 = vmul.f32 %v3318_v8, %v6719_v49  ;;  %v3335_v1 = vmul.f32 %v3319_v14, %v6733_v62  ;;  %v3322_v33 = vmul.f32 %v3306_v0, %v3306_v0 }
 0xb4c   : > { %v3336_v21 = vmul.f32 %v3320_v19, %v6737_v10  ;;  %v3323_v44 = vmul.f32 %v7337_v25, %v7337_v25  ;;  %v3337_v54 = vmul.f32 %v3321_v26, %v6743_v34  ;;  %v3324_v49 = vmul.f32 %v7339_v45, %v7339_v45 }
 0xb4d   : > { %v3343_v20 = vadd.f32 %v3342_v31, %v3328_v43  ;;  %v3338_v46 = vmul.f32 %v3322_v33, %v6748_v48  ;;  %v4320_v48 = vld [vmem:[%s7621_s21] ss:$0 sm:$0xff]  ;;  %s7624_s21 = sld [smem:[#allocation62_spill]] }
 0xb4e   : > { %v3339_v9 = vmul.f32 %v3323_v44, %v6752_v57  ;;  %v3340_v30 = vmul.f32 %v3324_v49, %v6755_v61 }
 0xb4f   : > { %v3344_v55 = vadd.f32 %v3343_v20, %v3329_v7  ;;  %v4321_v7 = vld [vmem:[%s7622_s20] ss:$0 sm:$0xff]  ;;  %s4365_s20 = sshll.u32 %s7592_s6, 8  ;;  %s5817_s6 = scalar_lea.vmem %s7435_s25, 256 }
 0xb50   : > { %p5818_p3 = scmp.ne.s32.totalorder %s7435_s25, %s5817_s6 }
 0xb51   : > { %v3345_v2 = vadd.f32 %v3344_v55, %v3330_v27 }
 0xb52   : > { %p5819_p7 = pnand %p5818_p3, %p7626_p5 }
 0xb53   : > { %v3346_v11 = vadd.f32 %v3345_v2, %v3331_v60 }
 0xb54   : > { %p5820_p6 = pneg %p5819_p7 }
 0xb55   : > { %v3347_v35 = vadd.f32 %v3346_v11, %v3332_v17 }
 0xb57   : > { %v3348_v40 = vadd.f32 %v3347_v35, %v3333_v32 }
 0xb59   : > { %v3349_v15 = vadd.f32 %v3348_v40, %v3334_v12 }
 0xb5b   : > { %v3350_v29 = vadd.f32 %v3349_v15, %v3335_v1 }
 0xb5d   : > { %v3351_v37 = vadd.f32 %v3350_v29, %v3336_v21 }
 0xb5f   : > { %v3352_v47 = vadd.f32 %v3351_v37, %v3337_v54 }
 0xb61   : > { %v3353_v62 = vadd.f32 %v3352_v47, %v3338_v46 }
 0xb63   : > { %v3354_v36 = vadd.f32 %v3353_v62, %v3339_v9 }
 0xb65   : > { %v3355_v10 = vadd.f32 %v3354_v36, %v3340_v30 }
 0xb67   : > { %v3356_v42 = vrot.slane %v3355_v10, 4 }
 0xb69   : > { %v3357_v63 = vadd.f32 %v3356_v42, %v3355_v10 }
 0xb6b   : > { %v3358_v4 = vrot.slane %v3357_v63, 2 }
 0xb6d   : > { %v3359_v58 = vadd.f32 %v3358_v4, %v3357_v63 }
 0xb6f   : > { %v3360_v28 = vrot.slane %v3359_v58, 1 }
 0xb71   : > { %v3361_v34 = vadd.f32 %v3360_v28, %v3359_v58  ;;  %v5338_v58 = vld [vmem:[%s6557_s28] sm:$0xff]   ;;  %v5315_v28 = vld [vmem:[#allocation26 + $0x38] sm:$0xff]  }
 0xb72   : > { %4976 = vmatpush3.bf16.msra.mxu0 %v5315_v28 }
 0xb73   : > { %v3362_v16 = vadd.f32 1e-05, %v3361_v34  ;;  %v5316_v34 = vld [vmem:[#allocation28] sm:$0xff]  }
 0xb75   : > { %5328 = vrsqrt.f32 %v3362_v16  ;;  %v5317_v16 = vld [vmem:[#allocation28 + $0x8] sm:$0xff]  }
 0xb7f   : > { %v5329_v43 = vpop.eup %5328 }
 0xb80   : > { %v3377_v31 = vmul.f32 %v5329_v43, %v3306_v0  ;;  %v3364_v57 = vmul.f32 %v5329_v43, %v7288_v59  ;;  %v3365_v61 = vmul.f32 %v5329_v43, %v7292_v24  ;;  %v3366_v3 = vmul.f32 %v5329_v43, %v7296_v39 }
 0xb81   : > { %v3367_v20 = vmul.f32 %v5329_v43, %v7300_v22  ;;  %v3368_v53 = vmul.f32 %v5329_v43, %v7304_v56  ;;  %v3369_v27 = vmul.f32 %v5329_v43, %v7308_v6  ;;  %v3370_v55 = vmul.f32 %v5329_v43, %v7312_v18 }
 0xb82   : > { %v3400_v5 = vmul.f32 %v4320_v48, %v3377_v31  ;;  %v3387_v0 = vmul.f32 %v4320_v48, %v3364_v57  ;;  %v3388_v60 = vmul.f32 %v4320_v48, %v3365_v61  ;;  %v3389_v59 = vmul.f32 %v4320_v48, %v3366_v3  ;;  %v5320_v31 = vld [vmem:[#allocation28 + $0x20] sm:$0xff]   ;;  %v5321_v57 = vld [vmem:[#allocation28 + $0x28] sm:$0xff]  }
 0xb83   : > { %v3390_v2 = vmul.f32 %v4320_v48, %v3367_v20  ;;  %v3391_v24 = vmul.f32 %v4320_v48, %v3368_v53  ;;  %v3392_v8 = vmul.f32 %v4320_v48, %v3369_v27  ;;  %v3371_v39 = vmul.f32 %v5329_v43, %v7316_v50  ;;  %v5322_v27 = vld [vmem:[#allocation28 + $0x30] sm:$0xff]  }
 0xb84   : > { %v3423_v17 = vadd.f32 %v4321_v7, %v3400_v5  ;;  %v3410_v11 = vadd.f32 %v4321_v7, %v3387_v0  ;;  %v3411_v14 = vadd.f32 %v4321_v7, %v3388_v60  ;;  %v3412_v32 = vadd.f32 %v4321_v7, %v3389_v59  ;;  %v4330_v5 = vld [vmem:[%s7623_s27] ss:$0 sm:$0xff]  ;;  %s7625_s27 = sld [smem:[#allocation63_spill]] }
 0xb85   : > { %v3413_v22 = vadd.f32 %v4321_v7, %v3390_v2  ;;  %v3414_v35 = vadd.f32 %v4321_v7, %v3391_v24  ;;  %v3415_v56 = vadd.f32 %v4321_v7, %v3392_v8  ;;  %v3393_v19 = vmul.f32 %v4320_v48, %v3370_v55  ;;  %v5323_v55 = vld [vmem:[#allocation28 + $0x38] sm:$0xff]  }
 0xb86   : > { %v3426_v6 = vpack.c.bf16 %v3411_v14, %v3410_v11  ;;  %v3394_v12 = vmul.f32 %v4320_v48, %v3371_v39  ;;  %v3372_v18 = vmul.f32 %v5329_v43, %v7321_v38  ;;  %v3373_v40 = vmul.f32 %v5329_v43, %v7325_v13 }
 0xb87   : > { %v3427_v26 = vpack.c.bf16 %v3413_v22, %v3412_v32  ;;  %v3428_v1 = vpack.c.bf16 %v3415_v56, %v3414_v35  ;;  %v3416_v15 = vadd.f32 %v4321_v7, %v3393_v19  ;;  %v3374_v33 = vmul.f32 %v5329_v43, %v7329_v23 }
 0xb88   : > { %4902 = vmatpush3.bf16.msra.mxu1 %v3426_v6  ;;  %v3417_v50 = vadd.f32 %v4321_v7, %v3394_v12  ;;  %v3395_v21 = vmul.f32 %v4320_v48, %v3372_v18  ;;  %v3396_v29 = vmul.f32 %v4320_v48, %v3373_v40  ;;  %v3375_v44 = vmul.f32 %v5329_v43, %v7333_v51 }
 0xb89   : > { %4903 = vmatprep.subr.bf16.mxu1 %v7617_v41  ;;  %v3397_v54 = vmul.f32 %v4320_v48, %v3374_v33  ;;  %v3376_v37 = vmul.f32 %v5329_v43, %v7335_v52  ;;  %v3378_v38 = vmul.f32 %v5329_v43, %v7337_v25  ;;  %v3379_v13 = vmul.f32 %v5329_v43, %v7339_v45  ;;  %v5318_v43 = vld [vmem:[#allocation28 + $0x10] sm:$0xff]  }
 0xb8a   : > { %v3429_v49 = vpack.c.bf16 %v3417_v50, %v3416_v15  ;;  %v3418_v46 = vadd.f32 %v4321_v7, %v3395_v21  ;;  %v3419_v47 = vadd.f32 %v4321_v7, %v3396_v29  ;;  %v3398_v9 = vmul.f32 %v4320_v48, %v3375_v44  ;;  %s7440_s1 = scalar_lea.hbm %s7625_s27, %s4365_s20 }
 0xb8b   : > { %v3420_v23 = vadd.f32 %v4321_v7, %v3397_v54  ;;  %v3399_v62 = vmul.f32 %v4320_v48, %v3376_v37  ;;  %v3401_v30 = vmul.f32 %v4320_v48, %v3378_v38  ;;  %v3402_v36 = vmul.f32 %v4320_v48, %v3379_v13  ;;  %v5319_v48 = vld [vmem:[#allocation28 + $0x18] sm:$0xff]  }
 0xb8c   : > { %4904 = vmatpush3.bf16.msra.mxu1 %v3427_v26  ;;  %v3430_v10 = vpack.c.bf16 %v3419_v47, %v3418_v46  ;;  %v3421_v51 = vadd.f32 %v4321_v7, %v3398_v9 }
 0xb8d   : > { %4905 = vmatprep.subr.bf16.mxu1 %v7617_v41  ;;  %v3422_v42 = vadd.f32 %v4321_v7, %v3399_v62  ;;  %v3424_v63 = vadd.f32 %v4321_v7, %v3401_v30  ;;  %v3425_v52 = vadd.f32 %v4321_v7, %v3402_v36 }
 0xb8e   : > { %v3431_v25 = vpack.c.bf16 %v3421_v51, %v3420_v23 }
 0xb8f   : > { %v3432_v4 = vpack.c.bf16 %v3423_v17, %v3422_v42  ;;  %v3433_v45 = vpack.c.bf16 %v3425_v52, %v3424_v63 }
 0xb90   : > { %4906 = vmatpush3.bf16.msra.mxu1 %v3428_v1 }
 0xb91   : > { %4907 = vmatprep.subr.bf16.mxu1 %v7617_v41 }
 0xb94   : > { %4908 = vmatpush3.bf16.msra.mxu1 %v3429_v49 }
 0xb95   : > { %4909 = vmatprep.subr.bf16.mxu1 %v7617_v41 }
 0xb98   : > { %4910 = vmatpush3.bf16.msra.mxu1 %v3430_v10 }
 0xb99   : > { %4911 = vmatprep.subr.bf16.mxu1 %v7617_v41 }
 0xb9c   : > { %4912 = vmatpush3.bf16.msra.mxu1 %v3431_v25 }
 0xb9d   : > { %4913 = vmatprep.subr.bf16.mxu1 %v7617_v41 }
 0xba0   : > { %4914 = vmatpush3.bf16.msra.mxu1 %v3432_v4 }
 0xba1   : > { %4915 = vmatprep.subr.bf16.mxu1 %v7617_v41 }
 0xba4   : > { %4916 = vmatpush3.bf16.msra.mxu1 %v3433_v45 }
 0xba5   : > { %4981 = vmatprep.subr.bf16.mxu1 %v7617_v41 }
 0xba7   : > { %4918 = vmatmul.mubr.bf16.vlgmr.msra.gmra.mrb[72].mxu1 %v5338_v58 }
 0xba8   : > { %4997 = vmatprep.mubr.msk.bf16.mxu1 %vm5938_vm0, %v7617_v41  ;;  %4982 = vmatpush3.bf16.msra.mxu1 %v5316_v34 }
 0xba9   : > { %4983 = vmatprep.subr.bf16.mxu1 %v7617_v41 }
 0xbac   : > { %4984 = vmatpush3.bf16.msra.mxu1 %v5317_v16 }
 0xbad   : > { %4985 = vmatprep.subr.bf16.mxu1 %v7617_v41 }
 0xbb0   : > { %4986 = vmatpush3.bf16.msra.mxu1 %v5318_v43 }
 0xbb1   : > { %4987 = vmatprep.subr.bf16.mxu1 %v7617_v41 }
 0xbb4   : > { %4988 = vmatpush3.bf16.msra.mxu1 %v5319_v48 }
 0xbb5   : > { %4989 = vmatprep.subr.bf16.mxu1 %v7617_v41 }
 0xbb8   : > { %4990 = vmatpush3.bf16.msra.mxu1 %v5320_v31 }
 0xbb9   : > { %4991 = vmatprep.subr.bf16.mxu1 %v7617_v41 }
 0xbbc   : > { %4992 = vmatpush3.bf16.msra.mxu1 %v5321_v57 }
 0xbbd   : > { %4993 = vmatprep.subr.bf16.mxu1 %v7617_v41 }
 0xbc0   : > { %4994 = vmatpush3.bf16.msra.mxu1 %v5322_v27 }
 0xbc1   : > { %4995 = vmatprep.subr.bf16.mxu1 %v7617_v41  ;;  %v4347_v41 = vld [vmem:[%s7624_s21] ss:$0 sm:$0xff]  ;;  %s5823_s21 = scalar_lea.vmem %s5822_s10, 512 }
 0xbc2   : > { %p5825_p12 = scmp.lt.s32.totalorder %s5823_s21, %s5817_s6 }
 0xbc4   : > { %4996 = vmatpush3.bf16.msra.mxu1 %v5323_v55  ;;  %p5826_p1 = por %p5825_p12, %p5824_p9 }
 0xbc6   : > { %p5827_p13 = pnand %p5826_p1, %p5820_p6 }
 0xc7a   : > { %v3468_v61 = vpop.f32.mrb[72].mxu1 }
 0xc7b   : > { %v4919_v3 = vpop.f32.mrb[73].mxu1 }
 0xc7c   : > { %v3471_v7 = vpop.f32.mrb[74].mxu1 }
 0xc7d   : > { %v3698_v20 = vpack.c.bf16 %v3471_v7, %v3468_v61  ;;  %v4920_v53 = vpop.f32.mrb[75].mxu1 }
 0xc7f   : > { %4978 = vmatmul.mubr.bf16.vlgmr.msra.gmra.mrb[80].mxu0 %v3698_v20 }
 0xd52   : > { %v3797_v0 = vpop.f32.mrb[80].mxu0 }
 0xd53   : > { %v5001_v60 = vadd.f32 %v4330_v5, %v3797_v0  ;;  %v4979_v59 = vpop.f32.mrb[81].mxu0 }
 0xd54   : > { %v3800_v2 = vpop.f32.mrb[82].mxu0 }
 0xd55   : > { %v5002_v24 = vadd.f32 %v4330_v5, %v3800_v2  ;;  %v4980_v8 = vpop.f32.mrb[83].mxu0  ;;  %v3806_v39 = vmax.f32 %v5001_v60, 0.0 }
 0xd57   : > { %v3807_v17 = vmax.f32 %v5002_v24, 0.0 }
 0xd59   : > { %v3808_v11 = vpack.c.bf16 %v3807_v17, %v3806_v39 }
 0xd5b   : > { %4998 = vmatmul.mubr.bf16.vlgmr.msra.gmra.mrb[76].mxu1 %v3808_v11 }
 0xe2e   : > { %v3914_v14 = vpop.f32.mrb[76].mxu1 }
 0xe2f   : > { %v3915_v32 = vadd.f32 %v4347_v41, %v3914_v14  ;;  %v4999_v22 = vpop.f32.mrb[77].mxu1 }
 0xe30   : > { %v3917_v35 = vpop.f32.mrb[78].mxu1 }
 0xe31   : > { %3921 = vst [vmem:[%s1126_s11] sm:$0xff] %v3915_v32  ;;  %v3918_v56 = vadd.f32 %v4347_v41, %v3917_v35  ;;  %v5000_v19 = vpop.f32.mrb[79].mxu1 }
 0xe33   : > { %3922 = vst [vmem:[%s1126_s11 + $0x8] sm:$0xff] %v3918_v56 }
 0xe34   : > { %5830 = shalt.err (!%p5827_p13)
}
 0xe35   : > { %s5831_s11 = scalar_lea.hbm %s7440_s1, 256  ;;  %s5835_s12 = scalar_lea.hbm %s7625_s27, 512 }
 0xe36   : > { %p5832_p0 = scmp.ne.s32.totalorder %s7440_s1, %s5831_s11  ;;  %p5836_p4 = scmp.lt.u32.totalorder %s7440_s1, %s7625_s27 }
 0xe37   : > { %p5837_p10 = scmp.lt.u32.totalorder %s5835_s12, %s5831_s11  ;;  %p5839_p3 = scmp.lt.u32.totalorder %s5831_s11, %s7440_s1 }
 0xe38   : > { %p5833_p2 = pnand %p5832_p0, %p7626_p5 }
 0xe39   : > { %p5838_p11 = por %p5837_p10, %p5836_p4 }
 0xe3a   : > { %p5834_p8 = pneg %p5833_p2 }
 0xe3b   : > { %p5840_p7 = por %p5839_p3, %p5838_p11 }
 0xe3d   : > { %p5841_p6 = pnand %p5840_p7, %p5834_p8 }
 0xe3f   : > { %5844 = shalt.err (!%p5841_p6)
}
 0xe40   : > { %s5940_s6 = smov 128   ;;  %s5941_s21 = smov 8  }
 0xe41   : > { %5077 = dma.vmem_to_hbm [thread:$0]  (%p7626_p5), %s7435_s25, 256, %s7440_s1, %s3924_s14, %s5940_s6, %s5940_s6, %s5941_s21  }
 0xe42 PF: > { %s7627_s20 = sld [smem:[#allocation40_spill]]  ;;  %p7628_p9 = scmp.ne.s32.totalorder %s7586_s8, 0 }
 0xe43   : > { %p7629_p12 = scmp.ge.s32.totalorder %s5915_s30, 2 }
 0xe45   : > { %p5133_p1 = pnand %p7629_p12, %p7628_p9 }
 0xe48   : > { %s3952_s28 = sand.u32 1, %s7627_s20  }
 0xe49   : > { %s3953_s11 = scalar_lea.sflag [#allocation4], %s3952_s28 }
 0xe4a   : > { %5898 = dma.done.wait (!%p5133_p1), %s3953_s11, 256  }
 0xe4b   : > { %5900 = vsyncadd (!%p5133_p1), %s3953_s11, 4294967040  ;;  %p49_p13 = scmp.ge.s32.totalorder %s6471_s7, 4   ;;  %s7630_s8 = smov %s5907_s5 }
 0xe4c   : > { %s7631_s5 = smov %s5911_s9  ;;  %s7632_s9 = smov %s6482_s29 }
 0xe4d   : > { %s7633_s30 = smov %s6471_s7  ;;  %51 = sbr.rel (!%p49_p13) target bundleno = 35 (0x23), region = 250 }
 0xe54   :  { %3958 = vsyncpa [#allocation3], 1 }
 0xe55   :  { %3960 = vsyncpa [#allocation3 + $0x1], 1 }
 0xe56   :  { %3961 = vsyncpa [#allocation6], 1 }
 0xe57   :  { %3962 = vsyncpa [#allocation9], 1 }
 0xe58   :  { %3963 = vsyncpa [#allocation12], 1 }
 0xe59   :  { %3964 = vsyncpa [#allocation15], 1 }
 0xe5a   :  { %3965 = vsyncpa [#allocation18], 1 }
 0xe5b   :  { %3966 = vsyncpa [#allocation21], 1 }
 0xe5c   :  { %3967 = vsyncpa [#allocation24], 1 }
 0xe5d   :  { %3968 = vsyncpa [#allocation27], 1 }
 0xe5e   :  { %3969 = vsyncpa [#allocation4], 1 }
 0xe5f   :  { %3971 = vsyncpa [#allocation4 + $0x1], 1 }

</bundles_post_ra>
